<compile_context>
chip_gen: v5e
topology: v5e:2x2
jax: 0.10.0
libtpu: 0.0.40
codegen_flags: <defaults>
</compile_context>

<pallas_src>
import math

import numpy as np
import jax
import jax.numpy as jnp
from jax.experimental import pallas as pl
from jax.experimental.pallas import tpu as pltpu


def _round_up(a: int, b: int) -> int:
    return ((a + b - 1) // b) * b


def _nerf_kernel(x_ref, s_ref, off_ref, o_ref):
    # x_ref:   (tb, K)      packed input rows, f32 (zero-padded columns)
    # s_ref:   (K, N)       frequency scatter matrix, bf16 (powers of two, exact)
    # off_ref: (1, N)       phase offsets (0 for sin slots, pi/2 for cos slots)
    # o_ref:   (tb, N)      lane-dense interleaved embedding
    x = x_ref[...]

    # Exact 3-term bf16 split of x via mantissa truncation:
    #   hi = top 8 mantissa bits, mid = next 8, lo = last 8  ->  x == hi+mid+lo
    # with every term exactly representable in bf16.  Each bf16*2**l MXU product
    # is exact in f32 and the partial sums are exactly representable, so the
    # phase below equals x * 2**l bit-for-bit (no precision=HIGHEST needed).
    mask = jnp.uint32(0xFFFF0000)
    hi_f = pltpu.bitcast(pltpu.bitcast(x, jnp.uint32) & mask, jnp.float32)
    r1 = x - hi_f
    mid_f = pltpu.bitcast(pltpu.bitcast(r1, jnp.uint32) & mask, jnp.float32)
    lo_f = r1 - mid_f

    s = s_ref[...]
    phase = jnp.dot(hi_f.astype(jnp.bfloat16), s, preferred_element_type=jnp.float32)
    phase = phase + jnp.dot(mid_f.astype(jnp.bfloat16), s,
                            preferred_element_type=jnp.float32)
    phase = phase + jnp.dot(lo_f.astype(jnp.bfloat16), s,
                            preferred_element_type=jnp.float32)
    phase = phase + off_ref[...]          # (1, N) broadcasts over (tb, N)
    o_ref[...] = jnp.sin(phase).astype(o_ref.dtype)


def _build_constants(D: int, L: int, g: int, K: int):
    """S[gi*D+d, (gi*D+d)*2L + 2l + s] = 2**l; off = pi/2 on cos slots."""
    gD = g * D
    N = gD * 2 * L
    S = np.zeros((K, N), dtype=np.float32)          # rows >= gD stay zero (K pad)
    freqs = (2.0 ** np.arange(L)).astype(np.float32)
    for row in range(gD):                           # row = gi*D + d
        base = row * 2 * L
        cols = base + 2 * np.arange(L)
        S[row, cols] = freqs                        # sin slots
        S[row, cols + 1] = freqs                    # cos slots
    off = np.zeros((1, N), dtype=np.float32)
    off[0, 1::2] = np.pi / 2.0                      # cos(t) == sin(t + pi/2)
    return S, off


def nerf_embedding(x: jax.Array, L: int, *, row_tile: int = 512,
                   out_dtype=None) -> jax.Array:
    """Pallas NeRF embedding. x: (B, D) -> (B, D*L*2).

    Pass out_dtype=jnp.bfloat16 to halve output writeback if downstream allows.
    For zero post-kernel copies, supply B such that no padding is needed
    (B a multiple of g = 128 // gcd(2*D*L, 128) and of the chosen tiling).
    """
    B, D = x.shape
    out_dtype = x.dtype if out_dtype is None else out_dtype
    per_row = 2 * D * L                             # output features per batch row

    # Pack g batch rows per kernel row so the lane axis is a multiple of 128.
    g = 128 // math.gcd(per_row, 128)
    gD = g * D
    N = g * per_row
    K = _round_up(gD, 128)                          # full-lane contraction dim

    # Balanced tiles: tb multiple of 8, >= 2 grid steps when there is enough
    # work (megacore sharding on v7x), minimal padding otherwise.
    R = pl.cdiv(B, g)
    steps = max(pl.cdiv(R, row_tile), 2 if R >= 16 else 1)
    tb = _round_up(pl.cdiv(R, steps), 8)
    R_pad = steps * tb
    B_pad = R_pad * g

    # Single padding pass on the (small) input; the packed reshape is free.
    x32 = x.astype(jnp.float32)
    if B_pad != B:
        x32 = jnp.pad(x32, ((0, B_pad - B), (0, 0)))
    x_packed = x32.reshape(R_pad, gD)
    if K != gD:
        x_packed = jnp.pad(x_packed, ((0, 0), (0, K - gD)))

    S_np, off_np = _build_constants(D, L, g, K)
    S = jnp.asarray(S_np).astype(jnp.bfloat16)      # powers of two: exact in bf16
    off = jnp.asarray(off_np)

    # Explicit VMEM budget: double-buffered x/S/off/out blocks + headroom,
    # capped at 64 MiB so the request is legal on v7x's smaller VMEM.
    out_itemsize = jnp.dtype(out_dtype).itemsize
    est_vmem = 2 * (tb * K * 4 + K * N * 2 + N * 4 + tb * N * out_itemsize)
    vmem_limit = int(min(max(est_vmem + (4 << 20), 32 << 20), 64 << 20))

    out_packed = pl.pallas_call(
        _nerf_kernel,
        out_shape=jax.ShapeDtypeStruct((R_pad, N), out_dtype),
        grid=(steps,),
        in_specs=[
            pl.BlockSpec((tb, K), lambda i: (i, 0)),    # packed coordinates
            pl.BlockSpec((K, N), lambda i: (0, 0)),     # frequency matrix (resident)
            pl.BlockSpec((1, N), lambda i: (0, 0)),     # phase offsets (resident)
        ],
        out_specs=pl.BlockSpec((tb, N), lambda i: (i, 0)),
        compiler_params=pltpu.CompilerParams(
            dimension_semantics=("parallel",),
            vmem_limit_bytes=vmem_limit,
        ),
    )(x_packed, S, off)

    # Contiguous unpack: (R_pad, g*per_row) -> (B_pad, per_row) is a free
    # reshape; the only copy is the trailing slice, and only if B was padded.
    out = out_packed.reshape(B_pad, per_row)
    if B_pad != B:
        out = out[:B]
    return out


def nerf_embedding_ref(x: jax.Array, L: int) -> jax.Array:
    """Pure-JAX reference mirroring the PyTorch module (f32 compute)."""
    b, d = x.shape
    emb = 2.0 ** jnp.arange(L, dtype=jnp.float32)                  # (L,)
    xe = x.astype(jnp.float32)[:, :, None] * emb[None, None, :]    # (b, d, L)
    s, c = jnp.sin(xe), jnp.cos(xe)
    return jnp.stack([s, c], axis=-1).reshape(b, d * L * 2).astype(x.dtype)


if __name__ == "__main__":
    L = 10           # typical NeRF positional-encoding depth
    B, D = 100, 3    # small batch of 3-D coordinates (exercises the padding path)
    key = jax.random.PRNGKey(0)
    x = jax.random.uniform(key, (B, D), dtype=jnp.float32, minval=-1.0, maxval=1.0)

    emb_fn = jax.jit(nerf_embedding, static_argnums=(1,))
    out = jax.block_until_ready(emb_fn(x, L))
    ref = nerf_embedding_ref(x, L)

    assert out.shape == (B, D * L * 2), out.shape
    # Phase (x * 2**l) is bit-exact in the kernel; residual difference comes
    # from f32 sine argument reduction at |x| * 2**(L-1) ~ 512 and the
    # cos == sin(t + pi/2) identity, so allow a small absolute slack.
    np.testing.assert_allclose(np.asarray(out), np.asarray(ref),
                               rtol=1e-4, atol=2e-4)

    print("KERNEL_OK")
</pallas_src>

<mosaic_0001>
module attributes {stable_mosaic.version = 11 : i64} {
  func.func @_nerf_kernel(%arg0: i32, %arg1: memref<8x128xf32, #tpu.memory_space<vmem>>, %arg2: memref<128x1920xbf16, #tpu.memory_space<vmem>>, %arg3: memref<1x1920xf32, #tpu.memory_space<vmem>>, %arg4: memref<8x1920xf32, #tpu.memory_space<vmem>>) attributes {dimension_semantics = [#tpu.dimension_semantics<parallel>], iteration_bounds = array<i64: 1>, scalar_prefetch = 0 : i64, scratch_operands = 0 : i64, tpu.core_type = #tpu.core_type<tc>, window_params = [{transform_indices = @transform_0, window_bounds = array<i64: 8, 128>}, {pipeline_mode = #tpu.pipeline_mode<synchronous>, transform_indices = @transform_1, window_bounds = array<i64: 128, 1920>}, {pipeline_mode = #tpu.pipeline_mode<synchronous>, transform_indices = @transform_2, window_bounds = array<i64: 1, 1920>}, {transform_indices = @transform_3, window_bounds = array<i64: 8, 1920>}]} {
    %c0 = arith.constant 0 : index
    %c0_0 = arith.constant 0 : index
    %0 = vector.load %arg1[%c0, %c0_0] : memref<8x128xf32, #tpu.memory_space<vmem>>, vector<8x128xf32>
    %1 = tpu.bitcast %0 : vector<8x128xf32> -> vector<8x128xi32>
    %c-65536_i32 = arith.constant -65536 : i32
    %2 = vector.broadcast %c-65536_i32 : i32 to vector<8x128xi32>
    %3 = arith.andi %1, %2 : vector<8x128xi32>
    %4 = tpu.bitcast %3 : vector<8x128xi32> -> vector<8x128xf32>
    %5 = arith.subf %0, %4 : vector<8x128xf32>
    %6 = tpu.bitcast %5 : vector<8x128xf32> -> vector<8x128xi32>
    %c-65536_i32_1 = arith.constant -65536 : i32
    %7 = vector.broadcast %c-65536_i32_1 : i32 to vector<8x128xi32>
    %8 = arith.andi %6, %7 : vector<8x128xi32>
    %9 = tpu.bitcast %8 : vector<8x128xi32> -> vector<8x128xf32>
    %10 = arith.subf %5, %9 : vector<8x128xf32>
    %c0_2 = arith.constant 0 : index
    %c0_3 = arith.constant 0 : index
    %11 = vector.load %arg2[%c0_2, %c0_3] : memref<128x1920xbf16, #tpu.memory_space<vmem>>, vector<128x1920xbf16>
    %12 = arith.truncf %4 : vector<8x128xf32> to vector<8x128xbf16>
    %cst = arith.constant dense<0.000000e+00> : vector<8x1920xf32>
    %13 = tpu.matmul %12, %11, %cst {dimension_numbers = #tpu.dot_dimension_numbers<[1], [0], [0], [1], [0, 0, 1, 1], [], []>} : vector<8x128xbf16>, vector<128x1920xbf16>, vector<8x1920xf32> -> vector<8x1920xf32>
    %14 = arith.truncf %9 : vector<8x128xf32> to vector<8x128xbf16>
    %cst_4 = arith.constant dense<0.000000e+00> : vector<8x1920xf32>
    %15 = tpu.matmul %14, %11, %cst_4 {dimension_numbers = #tpu.dot_dimension_numbers<[1], [0], [0], [1], [0, 0, 1, 1], [], []>} : vector<8x128xbf16>, vector<128x1920xbf16>, vector<8x1920xf32> -> vector<8x1920xf32>
    %16 = arith.addf %13, %15 : vector<8x1920xf32>
    %17 = arith.truncf %10 : vector<8x128xf32> to vector<8x128xbf16>
    %cst_5 = arith.constant dense<0.000000e+00> : vector<8x1920xf32>
    %18 = tpu.matmul %17, %11, %cst_5 {dimension_numbers = #tpu.dot_dimension_numbers<[1], [0], [0], [1], [0, 0, 1, 1], [], []>} : vector<8x128xbf16>, vector<128x1920xbf16>, vector<8x1920xf32> -> vector<8x1920xf32>
    %19 = arith.addf %16, %18 : vector<8x1920xf32>
    %c0_6 = arith.constant 0 : index
    %c0_7 = arith.constant 0 : index
    %20 = vector.load %arg3[%c0_6, %c0_7] : memref<1x1920xf32, #tpu.memory_space<vmem>>, vector<1x1920xf32>
    %21 = vector.broadcast %20 : vector<1x1920xf32> to vector<8x1920xf32>
    %22 = arith.addf %19, %21 : vector<8x1920xf32>
    %23 = math.sin %22 : vector<8x1920xf32>
    %c0_8 = arith.constant 0 : index
    %c0_9 = arith.constant 0 : index
    %24 = vector.load %arg4[%c0_8, %c0_9] : memref<8x1920xf32, #tpu.memory_space<vmem>>, vector<8x1920xf32>
    tpu.vector_store %arg4[%c0_8, %c0_9], %23 {strides = array<i32>} : memref<8x1920xf32, #tpu.memory_space<vmem>>, vector<8x1920xf32>,
    return
  }
  func.func @transform_0(%arg0: i32) -> (i32, i32) {
    %c0_i32 = arith.constant 0 : i32
    %c0_i32_0 = arith.constant 0 : i32
    return %arg0, %c0_i32 : i32, i32
  }
  func.func @transform_1(%arg0: i32) -> (i32, i32) {
    %c0_i32 = arith.constant 0 : i32
    %c0_i32_0 = arith.constant 0 : i32
    %c0_i32_1 = arith.constant 0 : i32
    return %c0_i32, %c0_i32_0 : i32, i32
  }
  func.func @transform_2(%arg0: i32) -> (i32, i32) {
    %c0_i32 = arith.constant 0 : i32
    %c0_i32_0 = arith.constant 0 : i32
    %c0_i32_1 = arith.constant 0 : i32
    return %c0_i32, %c0_i32_0 : i32, i32
  }
  func.func @transform_3(%arg0: i32) -> (i32, i32) {
    %c0_i32 = arith.constant 0 : i32
    %c0_i32_0 = arith.constant 0 : i32
    return %arg0, %c0_i32 : i32, i32
  }
}

</mosaic_0001>

<bundles_post_ra>
// kernel: nerf_embedding.1
= control target key start
LH: loop header
LB: loop body
LE: loop exit
PB: predicated region body
PF: predicated region fallthrough
CT: control target
= control target key end

     0   :  { %8 = vsyncpa [#allocation3], 0  ;;  %s4455_s15 = smov [#allocation2]   ;;  %s4456_s17 = smov 960   ;;  %s7023_s0 = inlined_call_operand.vmem [shape: f32[8,128], index: 0, kind: input, shape index: {}]   ;;  %s7024_s1 = inlined_call_operand.hbm [shape: bf16[128,1920], index: 1, kind: input, shape index: {}]   ;;  %s7025_s2 = inlined_call_operand.vmem [shape: f32[1,1920], index: 2, kind: input, shape index: {}]   ;;  %s7026_s3 = inlined_call_operand.vmem [shape: f32[8,1920], index: 3, kind: output, shape index: {}]  }
   0x1   :  { %s15_s14 = sshll.u32 %s7024_s1, 4  ;;  %s17_s16 = sshll.u32 %s4455_s15, 4  ;;  %s16_s14 = int_to_ptr.hbm [resolvable:$true] %s15_s14  ;;  %s18_s16 = int_to_ptr.vmem [resolvable:$true] %s17_s16 }
   0x2   :  { %s4457_s18 = smov 60  }
   0x3   :  { %23 = dma.hbm_to_vmem [thread:$0]  %s16_s14, 15360, %s18_s16, [#allocation3], %s4456_s17, %s4456_s17, %s4457_s18  }
   0x4   :  { %4453 = dma.done.wait [#allocation3], 15360  }
   0x5   :  { %4454 = vsyncadd [#allocation3], 4294951936  ;;  %v4194_v0 = vld [vmem:[#allocation2 + $0x348] sm:$0xf]  ;;  %v4409_v1 = vld [vmem:[#allocation2 + $0x380] sm:$0xf0] }
   0x6   :  { %v4402_v2 = vld [vmem:[#allocation2 + $0x34c] sm:$0xf]  ;;  %v4488_v3 = vor.u32 %v4409_v1, %v4194_v0  ;;  %v4196_v4 = vld [vmem:[#allocation2 + $0x384] sm:$0xf0]  ;;  %v4202_v5 = vld [vmem:[#allocation2 + $0x350] sm:$0xf] }
   0x7   :  { %v4410_v6 = vld [vmem:[#allocation2 + $0x388] sm:$0xf0]  ;;  %v4490_v7 = vor.u32 %v4402_v2, %v4196_v4  ;;  %v4403_v9 = vld [vmem:[#allocation2 + $0x354] sm:$0xf]  ;;  %v4204_v10 = vld [vmem:[#allocation2 + $0x38c] sm:$0xf0] }
   0x8   :  { %7191 = vst [vmem:[#allocation5_spill] sm:$0xff] %v4488_v3  ;;  %v4492_v8 = vor.u32 %v4410_v6, %v4202_v5  ;;  %v4134_v11 = vld [vmem:[#allocation2 + $0x2d0] sm:$0xf]  ;;  %777 = vmatpush.bf16.msra.mxu0 %v4488_v3  ;;  %v4495_v12 = vor.u32 %v4403_v9, %v4204_v10  ;;  %v4394_v13 = vld [vmem:[#allocation2 + $0x308] sm:$0xf0] }
   0x9   :  { %v4387_v14 = vld [vmem:[#allocation2 + $0x2d4] sm:$0xf]  ;;  %v4136_v15 = vld [vmem:[#allocation2 + $0x30c] sm:$0xf0]  ;;  %790 = vmatpush.bf16.msra.mxu1 %v4490_v7  ;;  %v4499_v16 = vor.u32 %v4394_v13, %v4134_v11  ;;  %v4142_v18 = vld [vmem:[#allocation2 + $0x2d8] sm:$0xf] }
   0xa   :  { %803 = vmatpush.bf16.msra.mxu2 %v4492_v8  ;;  %v4501_v17 = vor.u32 %v4387_v14, %v4136_v15  ;;  %v4395_v19 = vld [vmem:[#allocation2 + $0x310] sm:$0xf0]  ;;  %v4388_v20 = vld [vmem:[#allocation2 + $0x2dc] sm:$0xf]  ;;  %816 = vmatpush.bf16.msra.mxu3 %v4495_v12  ;;  %v4144_v22 = vld [vmem:[#allocation2 + $0x314] sm:$0xf0] }
   0xb   :  { %7192 = vst [vmem:[#allocation6_spill] sm:$0xff] %v4499_v16  ;;  %v4504_v21 = vor.u32 %v4395_v19, %v4142_v18  ;;  %v4074_v23 = vld [vmem:[#allocation2 + $0x258] sm:$0xf]  ;;  %v4379_v24 = vld [vmem:[#allocation2 + $0x290] sm:$0xf0]  ;;  %v4506_v25 = vor.u32 %v4388_v20, %v4144_v22 }
   0xc   :  { %v4372_v26 = vld [vmem:[#allocation2 + $0x25c] sm:$0xf]  ;;  %v4076_v27 = vld [vmem:[#allocation2 + $0x294] sm:$0xf0]  ;;  %v4082_v28 = vld [vmem:[#allocation2 + $0x260] sm:$0xf]  ;;  %778 = vmatpush.bf16.msra.mxu0 %v4499_v16  ;;  %v4509_v29 = vor.u32 %v4379_v24, %v4074_v23 }
   0xd   :  { %v4380_v30 = vld [vmem:[#allocation2 + $0x298] sm:$0xf0]  ;;  %v4373_v31 = vld [vmem:[#allocation2 + $0x264] sm:$0xf]  ;;  %v4084_v32 = vld [vmem:[#allocation2 + $0x29c] sm:$0xf0]  ;;  %791 = vmatpush.bf16.msra.mxu1 %v4501_v17  ;;  %v4513_v33 = vor.u32 %v4372_v26, %v4076_v27 }
   0xe   :  { %7193 = vst [vmem:[#allocation7_spill] sm:$0xff] %v4509_v29  ;;  %804 = vmatpush.bf16.msra.mxu2 %v4504_v21  ;;  %v4515_v34 = vor.u32 %v4380_v30, %v4082_v28  ;;  %v4014_v35 = vld [vmem:[#allocation2 + $0x1e0] sm:$0xf]  ;;  %v4364_v36 = vld [vmem:[#allocation2 + $0x218] sm:$0xf0]  ;;  %817 = vmatpush.bf16.msra.mxu3 %v4506_v25  ;;  %v4518_v38 = vor.u32 %v4373_v31, %v4084_v32 }
   0xf   :  { %v4357_v37 = vld [vmem:[#allocation2 + $0x1e4] sm:$0xf]  ;;  %v4016_v39 = vld [vmem:[#allocation2 + $0x21c] sm:$0xf0]  ;;  %v4022_v40 = vld [vmem:[#allocation2 + $0x1e8] sm:$0xf]  ;;  %v4521_v44 = vor.u32 %v4364_v36, %v4014_v35 }
  0x10   :  { %v4365_v41 = vld [vmem:[#allocation2 + $0x220] sm:$0xf0]  ;;  %v4358_v42 = vld [vmem:[#allocation2 + $0x1ec] sm:$0xf]  ;;  %v4024_v43 = vld [vmem:[#allocation2 + $0x224] sm:$0xf0]  ;;  %779 = vmatpush.bf16.msra.mxu0 %v4509_v29  ;;  %v4525_v45 = vor.u32 %v4357_v37, %v4016_v39 }
  0x11   :  { %7194 = vst [vmem:[#allocation8_spill] sm:$0xff] %v4521_v44  ;;  %792 = vmatpush.bf16.msra.mxu1 %v4513_v33  ;;  %v4527_v46 = vor.u32 %v4365_v41, %v4022_v40  ;;  %v3954_v47 = vld [vmem:[#allocation2 + $0x168] sm:$0xf]  ;;  %v4349_v48 = vld [vmem:[#allocation2 + $0x1a0] sm:$0xf0]  ;;  %v4530_v50 = vor.u32 %v4358_v42, %v4024_v43 }
  0x12   :  { %805 = vmatpush.bf16.msra.mxu2 %v4515_v34  ;;  %v4342_v49 = vld [vmem:[#allocation2 + $0x16c] sm:$0xf]  ;;  %818 = vmatpush.bf16.msra.mxu3 %v4518_v38  ;;  %v3956_v51 = vld [vmem:[#allocation2 + $0x1a4] sm:$0xf0]  ;;  %v3962_v52 = vld [vmem:[#allocation2 + $0x170] sm:$0xf]  ;;  %v4533_v56 = vor.u32 %v4349_v48, %v3954_v47 }
  0x13   :  { %v4350_v53 = vld [vmem:[#allocation2 + $0x1a8] sm:$0xf0]  ;;  %v4343_v54 = vld [vmem:[#allocation2 + $0x174] sm:$0xf]  ;;  %v3964_v55 = vld [vmem:[#allocation2 + $0x1ac] sm:$0xf0]  ;;  %v4537_v57 = vor.u32 %v4342_v49, %v3956_v51 }
  0x14   :  { %780 = vmatpush.bf16.msra.mxu0 %v4521_v44  ;;  %7195 = vst [vmem:[#allocation9_spill] sm:$0xff] %v4533_v56  ;;  %v4539_v58 = vor.u32 %v4350_v53, %v3962_v52  ;;  %v3894_v59 = vld [vmem:[#allocation2 + $0xf0] sm:$0xf]  ;;  %v4334_v60 = vld [vmem:[#allocation2 + $0x128] sm:$0xf0]  ;;  %v4542_v62 = vor.u32 %v4343_v54, %v3964_v55 }
  0x15   :  { %793 = vmatpush.bf16.msra.mxu1 %v4525_v45  ;;  %v4327_v61 = vld [vmem:[#allocation2 + $0xf4] sm:$0xf]  ;;  %v3896_v63 = vld [vmem:[#allocation2 + $0x12c] sm:$0xf0]  ;;  %v3902_v0 = vld [vmem:[#allocation2 + $0xf8] sm:$0xf]  ;;  %v4545_v5 = vor.u32 %v4334_v60, %v3894_v59 }
  0x16   :  { %806 = vmatpush.bf16.msra.mxu2 %v4527_v46  ;;  %819 = vmatpush.bf16.msra.mxu3 %v4530_v50  ;;  %v4335_v1 = vld [vmem:[#allocation2 + $0x130] sm:$0xf0]  ;;  %v4328_v2 = vld [vmem:[#allocation2 + $0xfc] sm:$0xf]  ;;  %v3904_v4 = vld [vmem:[#allocation2 + $0x134] sm:$0xf0]  ;;  %v4549_v6 = vor.u32 %v4327_v61, %v3896_v63 }
  0x17   :  { %v4551_v9 = vor.u32 %v4335_v1, %v3902_v0  ;;  %v3834_v10 = vld [vmem:[#allocation2 + $0x78] sm:$0xf]  ;;  %v4319_v11 = vld [vmem:[#allocation2 + $0xb0] sm:$0xf0]  ;;  %v4312_v13 = vld [vmem:[#allocation2 + $0x7c] sm:$0xf]  ;;  %v4554_v14 = vor.u32 %v4328_v2, %v3904_v4 }
  0x18   :  { %781 = vmatpush.bf16.msra.mxu0 %v4533_v56  ;;  %v3836_v15 = vld [vmem:[#allocation2 + $0xb4] sm:$0xf0]  ;;  %v3842_v18 = vld [vmem:[#allocation2 + $0x80] sm:$0xf]  ;;  %v4320_v19 = vld [vmem:[#allocation2 + $0xb8] sm:$0xf0]  ;;  %v4557_v23 = vor.u32 %v4319_v11, %v3834_v10 }
  0x19   :  { %794 = vmatpush.bf16.msra.mxu1 %v4537_v57  ;;  %7196 = vst [vmem:[#allocation10_spill] sm:$0xff] %v4551_v9  ;;  %v4313_v20 = vld [vmem:[#allocation2 + $0x84] sm:$0xf]  ;;  %v3844_v22 = vld [vmem:[#allocation2 + $0xbc] sm:$0xf0]  ;;  %v4561_v27 = vor.u32 %v4312_v13, %v3836_v15  ;;  %v4563_v28 = vor.u32 %v4320_v19, %v3842_v18 }
  0x1a   :  { %807 = vmatpush.bf16.msra.mxu2 %v4539_v58  ;;  %820 = vmatpush.bf16.msra.mxu3 %v4542_v62  ;;  %7197 = vst [vmem:[#allocation11_spill] sm:$0xff] %v4554_v14  ;;  %v3774_v24 = vld [vmem:[#allocation2] sm:$0xf]  ;;  %v4304_v26 = vld [vmem:[#allocation2 + $0x38] sm:$0xf0]  ;;  %v4566_v35 = vor.u32 %v4313_v20, %v3844_v22 }
  0x1b   :  { %7198 = vst [vmem:[#allocation12_spill] sm:$0xff] %v4563_v28  ;;  %v4297_v30 = vld [vmem:[#allocation2 + $0x4] sm:$0xf]  ;;  %v3776_v31 = vld [vmem:[#allocation2 + $0x3c] sm:$0xf0]  ;;  %v4569_v43 = vor.u32 %v4304_v26, %v3774_v24 }
  0x1c   :  { %782 = vmatpush.bf16.msra.mxu0 %v4545_v5  ;;  %v3782_v32 = vld [vmem:[#allocation2 + $0x8] sm:$0xf]  ;;  %7199 = vst [vmem:[#allocation13_spill] sm:$0xff] %v4566_v35  ;;  %v4305_v36 = vld [vmem:[#allocation2 + $0x40] sm:$0xf0]  ;;  %v4573_v51 = vor.u32 %v4297_v30, %v3776_v31 }
  0x1d   :  { %795 = vmatpush.bf16.msra.mxu1 %v4549_v6  ;;  %v4298_v37 = vld [vmem:[#allocation2 + $0xc] sm:$0xf]  ;;  %v3784_v39 = vld [vmem:[#allocation2 + $0x44] sm:$0xf0]  ;;  %v4210_v40 = vld [vmem:[#allocation2 + $0x358] sm:$0xf]  ;;  %v4575_v52 = vor.u32 %v4305_v36, %v3782_v32 }
  0x1e   :  { %808 = vmatpush.bf16.msra.mxu2 %v4551_v9  ;;  %821 = vmatpush.bf16.msra.mxu3 %v4554_v14  ;;  %v4411_v41 = vld [vmem:[#allocation2 + $0x390] sm:$0xf0]  ;;  %v4404_v42 = vld [vmem:[#allocation2 + $0x35c] sm:$0xf]  ;;  %v4212_v47 = vld [vmem:[#allocation2 + $0x394] sm:$0xf0]  ;;  %v4578_v55 = vor.u32 %v4298_v37, %v3784_v39 }
  0x1f   :  { %v4218_v48 = vld [vmem:[#allocation2 + $0x360] sm:$0xf]  ;;  %v4412_v49 = vld [vmem:[#allocation2 + $0x398] sm:$0xf0]  ;;  %7200 = vst [vmem:[#allocation14_spill] sm:$0xff] %v4573_v51  ;;  %v4580_v59 = vor.u32 %v4411_v41, %v4210_v40  ;;  %v4582_v60 = vor.u32 %v4404_v42, %v4212_v47 }
  0x20   :  { %783 = vmatpush.bf16.msra.mxu0 %v4557_v23  ;;  %7201 = vst [vmem:[#allocation15_spill] sm:$0xff] %v4575_v52  ;;  %v4405_v53 = vld [vmem:[#allocation2 + $0x364] sm:$0xf]  ;;  %v4220_v54 = vld [vmem:[#allocation2 + $0x39c] sm:$0xf0]  ;;  %v4584_v61 = vor.u32 %v4412_v49, %v4218_v48 }
  0x21   :  { %796 = vmatpush.bf16.msra.mxu1 %v4561_v27  ;;  %7202 = vst [vmem:[#allocation16_spill] sm:$0xff] %v4578_v55  ;;  %v4150_v63 = vld [vmem:[#allocation2 + $0x2e0] sm:$0xf]  ;;  %v4396_v0 = vld [vmem:[#allocation2 + $0x318] sm:$0xf0]  ;;  %v4587_v2 = vor.u32 %v4405_v53, %v4220_v54 }
  0x22   :  { %809 = vmatpush.bf16.msra.mxu2 %v4563_v28  ;;  %822 = vmatpush.bf16.msra.mxu3 %v4566_v35  ;;  %7203 = vst [vmem:[#allocation17_spill] sm:$0xff] %v4582_v60  ;;  %v4389_v1 = vld [vmem:[#allocation2 + $0x2e4] sm:$0xf]  ;;  %v4152_v4 = vld [vmem:[#allocation2 + $0x31c] sm:$0xf0]  ;;  %v4593_v18 = vor.u32 %v4396_v0, %v4150_v63 }
  0x23   :  { %7204 = vst [vmem:[#allocation18_spill] sm:$0xff] %v4584_v61  ;;  %v4158_v10 = vld [vmem:[#allocation2 + $0x2e8] sm:$0xf]  ;;  %v4397_v11 = vld [vmem:[#allocation2 + $0x320] sm:$0xf0]  ;;  %v4597_v19 = vor.u32 %v4389_v1, %v4152_v4 }
  0x24   :  { %784 = vmatpush.bf16.msra.mxu0 %v4569_v43  ;;  %7205 = vst [vmem:[#allocation19_spill] sm:$0xff] %v4587_v2  ;;  %v4390_v13 = vld [vmem:[#allocation2 + $0x2ec] sm:$0xf]  ;;  %v4160_v15 = vld [vmem:[#allocation2 + $0x324] sm:$0xf0]  ;;  %v4599_v20 = vor.u32 %v4397_v11, %v4158_v10  ;;  %v30_v42 = vld [vmem:[%s7023_s0] sm:$0xff] }
  0x25   :  { %797 = vmatpush.bf16.msra.mxu1 %v4573_v51  ;;  %7206 = vst [vmem:[#allocation20_spill] sm:$0xff] %v4597_v19  ;;  %v4090_v22 = vld [vmem:[#allocation2 + $0x268] sm:$0xf]  ;;  %v4381_v24 = vld [vmem:[#allocation2 + $0x2a0] sm:$0xf0]  ;;  %v4602_v30 = vor.u32 %v4390_v13, %v4160_v15  ;;  %v4616_v54 = vand.u32 4294901760, %v30_v42 }
  0x26   :  { %810 = vmatpush.bf16.msra.mxu2 %v4575_v52  ;;  %823 = vmatpush.bf16.msra.mxu3 %v4578_v55  ;;  %7207 = vst [vmem:[#allocation21_spill] sm:$0xff] %v4599_v20  ;;  %v4374_v26 = vld [vmem:[#allocation2 + $0x26c] sm:$0xf]  ;;  %v4092_v31 = vld [vmem:[#allocation2 + $0x2a4] sm:$0xf0]  ;;  %v4605_v40 = vor.u32 %v4381_v24, %v4090_v22 }
  0x27   :  { %7208 = vst [vmem:[#allocation22_spill] sm:$0xff] %v4602_v30  ;;  %v4098_v32 = vld [vmem:[#allocation2 + $0x270] sm:$0xf]  ;;  %v4382_v36 = vld [vmem:[#allocation2 + $0x2a8] sm:$0xf0]  ;;  %v4612_v47 = vor.u32 %v4374_v26, %v4092_v31  ;;  %v4622_v13 = vsub.f32 %v30_v42, %v4616_v54 }
  0x28   :  { %829 = vmatpush.bf16.msrb.mxu0 %v4580_v59  ;;  %v4375_v37 = vld [vmem:[#allocation2 + $0x274] sm:$0xf]  ;;  %v4100_v39 = vld [vmem:[#allocation2 + $0x2ac] sm:$0xf0]  ;;  %v4614_v48 = vor.u32 %v4382_v36, %v4098_v32  ;;  %v4366_v49 = vld [vmem:[#allocation2 + $0x228] sm:$0xf0] }
  0x29   :  { %842 = vmatpush.bf16.msrb.mxu1 %v4582_v60  ;;  %v4030_v41 = vld [vmem:[#allocation2 + $0x1f0] sm:$0xf]  ;;  %7209 = vst [vmem:[#allocation23_spill] sm:$0xff] %v4612_v47  ;;  %v4359_v53 = vld [vmem:[#allocation2 + $0x1f4] sm:$0xf]  ;;  %v4619_v63 = vor.u32 %v4375_v37, %v4100_v39  ;;  %v4634_v36 = vand.u32 4294901760, %v4622_v13 }
  0x2a   :  { %855 = vmatpush.bf16.msrb.mxu2 %v4584_v61  ;;  %868 = vmatpush.bf16.msrb.mxu3 %v4587_v2  ;;  %7210 = vst [vmem:[#allocation24_spill] sm:$0xff] %v4614_v48  ;;  %v4032_v0 = vld [vmem:[#allocation2 + $0x22c] sm:$0xf0]  ;;  %v4038_v1 = vld [vmem:[#allocation2 + $0x1f8] sm:$0xf]  ;;  %v4625_v15 = vor.u32 %v4366_v49, %v4030_v41 }
  0x2b   :  { %7211 = vst [vmem:[#allocation25_spill] sm:$0xff] %v4619_v63  ;;  %v4367_v4 = vld [vmem:[#allocation2 + $0x230] sm:$0xf0]  ;;  %v4360_v10 = vld [vmem:[#allocation2 + $0x1fc] sm:$0xf]  ;;  %v4629_v24 = vor.u32 %v4359_v53, %v4032_v0  ;;  %v4641_v53 = vpack.c.bf16 %v4634_v36, %v4634_v36 }
  0x2c   :  { %830 = vmatpush.bf16.msrb.mxu0 %v4593_v18  ;;  %v4040_v11 = vld [vmem:[#allocation2 + $0x234] sm:$0xf0]  ;;  %7212 = vst [vmem:[#allocation26_spill] sm:$0xff] %v4622_v13  ;;  %v4631_v26 = vor.u32 %v4367_v4, %v4038_v1  ;;  %v4351_v31 = vld [vmem:[#allocation2 + $0x1b0] sm:$0xf0] }
  0x2d   :  { %843 = vmatpush.bf16.msrb.mxu1 %v4597_v19  ;;  %v3970_v22 = vld [vmem:[#allocation2 + $0x178] sm:$0xf]  ;;  %7213 = vst [vmem:[#allocation27_spill] sm:$0xff] %v4629_v24  ;;  %v4344_v32 = vld [vmem:[#allocation2 + $0x17c] sm:$0xf]  ;;  %v4637_v37 = vor.u32 %v4360_v10, %v4040_v11  ;;  %785 = vmatmul.bf16.vlgmr.msra.gmra.mxu0 %v4641_v53 }
  0x2e   :  { %856 = vmatpush.bf16.msrb.mxu2 %v4599_v20  ;;  %869 = vmatpush.bf16.msrb.mxu3 %v4602_v30  ;;  %7214 = vst [vmem:[#allocation28_spill] sm:$0xff] %v4631_v26  ;;  %v3972_v39 = vld [vmem:[#allocation2 + $0x1b4] sm:$0xf0]  ;;  %v3978_v41 = vld [vmem:[#allocation2 + $0x180] sm:$0xf]  ;;  %v4644_v0 = vor.u32 %v4351_v31, %v3970_v22 }
  0x2f   :  { %7215 = vst [vmem:[#allocation29_spill] sm:$0xff] %v4634_v36  ;;  %v4352_v42 = vld [vmem:[#allocation2 + $0x1b8] sm:$0xf0]  ;;  %v4345_v49 = vld [vmem:[#allocation2 + $0x184] sm:$0xf]  ;;  %v4648_v1 = vor.u32 %v4344_v32, %v3972_v39  ;;  %798 = vmatmul.bf16.vlgmr.msra.gmra.mxu1 %v4641_v53  ;;  %811 = vmatmul.bf16.vlgmr.msra.gmra.mxu2 %v4641_v53 }
  0x30   :  { %831 = vmatpush.bf16.msrb.mxu0 %v4605_v40  ;;  %7216 = vst [vmem:[#allocation30_spill] sm:$0xff] %v4637_v37  ;;  %v4650_v4 = vor.u32 %v4352_v42, %v3978_v41  ;;  %v3910_v10 = vld [vmem:[#allocation2 + $0x100] sm:$0xf]  ;;  %v4336_v11 = vld [vmem:[#allocation2 + $0x138] sm:$0xf0]  ;;  %824 = vmatmul.bf16.vlgmr.msra.gmra.mxu3 %v4641_v53 }
  0x31   :  { %844 = vmatpush.bf16.msrb.mxu1 %v4612_v47  ;;  %v3980_v47 = vld [vmem:[#allocation2 + $0x1bc] sm:$0xf0]  ;;  %7217 = vst [vmem:[#allocation31_spill] sm:$0xff] %v4648_v1  ;;  %v4329_v13 = vld [vmem:[#allocation2 + $0x104] sm:$0xf]  ;;  %v4659_v32 = vor.u32 %v4336_v11, %v3910_v10 }
  0x32   :  { %857 = vmatpush.bf16.msrb.mxu2 %v4614_v48  ;;  %870 = vmatpush.bf16.msrb.mxu3 %v4619_v63  ;;  %7218 = vst [vmem:[#allocation32_spill] sm:$0xff] %v4650_v4  ;;  %v4653_v63 = vor.u32 %v4345_v49, %v3980_v47  ;;  %v3912_v36 = vld [vmem:[#allocation2 + $0x13c] sm:$0xf0]  ;;  %v3918_v48 = vld [vmem:[#allocation2 + $0x108] sm:$0xf] }
  0x33   :  { %v4337_v30 = vld [vmem:[#allocation2 + $0x140] sm:$0xf0]  ;;  %v4330_v22 = vld [vmem:[#allocation2 + $0x10c] sm:$0xf]  ;;  %v3920_v31 = vld [vmem:[#allocation2 + $0x144] sm:$0xf0]  ;;  %v4664_v47 = vor.u32 %v4329_v13, %v3912_v36 }
  0x34   :  { %832 = vmatpush.bf16.msrb.mxu0 %v4625_v15  ;;  %7219 = vst [vmem:[#allocation33_spill] sm:$0xff] %v4653_v63  ;;  %v4666_v39 = vor.u32 %v4337_v30, %v3918_v48  ;;  %v3850_v41 = vld [vmem:[#allocation2 + $0x88] sm:$0xf]  ;;  %v4321_v42 = vld [vmem:[#allocation2 + $0xc0] sm:$0xf0] }
  0x35   :  { %845 = vmatpush.bf16.msrb.mxu1 %v4629_v24  ;;  %7220 = vst [vmem:[#allocation34_spill] sm:$0xff] %v4659_v32  ;;  %v4314_v49 = vld [vmem:[#allocation2 + $0x8c] sm:$0xf]  ;;  %v3858_v10 = vld [vmem:[#allocation2 + $0x90] sm:$0xf] }
  0x36   :  { %858 = vmatpush.bf16.msrb.mxu2 %v4631_v26  ;;  %871 = vmatpush.bf16.msrb.mxu3 %v4637_v37  ;;  %7221 = vst [vmem:[#allocation35_spill] sm:$0xff] %v4664_v47  ;;  %v4669_v37 = vor.u32 %v4330_v22, %v3920_v31  ;;  %v3852_v26 = vld [vmem:[#allocation2 + $0xc4] sm:$0xf0]  ;;  %v4322_v11 = vld [vmem:[#allocation2 + $0xc8] sm:$0xf0] }
  0x37   :  { %7222 = vst [vmem:[#allocation36_spill] sm:$0xff] %v4666_v39  ;;  %v4315_v24 = vld [vmem:[#allocation2 + $0x94] sm:$0xf]  ;;  %v3860_v20 = vld [vmem:[#allocation2 + $0xcc] sm:$0xf0]  ;;  %v4676_v30 = vor.u32 %v4314_v49, %v3852_v26  ;;  %v4678_v48 = vor.u32 %v4322_v11, %v3858_v10 }
  0x38   :  { %833 = vmatpush.bf16.msrb.mxu0 %v4644_v0  ;;  %7223 = vst [vmem:[#allocation37_spill] sm:$0xff] %v4669_v37  ;;  %v3790_v13 = vld [vmem:[#allocation2 + $0x10] sm:$0xf]  ;;  %v4306_v36 = vld [vmem:[#allocation2 + $0x48] sm:$0xf0] }
  0x39   :  { %846 = vmatpush.bf16.msrb.mxu1 %v4648_v1  ;;  %v4672_v1 = vor.u32 %v4321_v42, %v3850_v41  ;;  %7225 = vst [vmem:[#allocation39_spill] sm:$0xff] %v4676_v30  ;;  %v4299_v22 = vld [vmem:[#allocation2 + $0x14] sm:$0xf]  ;;  %v3792_v31 = vld [vmem:[#allocation2 + $0x4c] sm:$0xf0] }
  0x3a   :  { %859 = vmatpush.bf16.msrb.mxu2 %v4650_v4  ;;  %872 = vmatpush.bf16.msrb.mxu3 %v4653_v63  ;;  %7226 = vst [vmem:[#allocation40_spill] sm:$0xff] %v4678_v48  ;;  %v3798_v63 = vld [vmem:[#allocation2 + $0x18] sm:$0xf]  ;;  %v4681_v4 = vor.u32 %v4315_v24, %v3860_v20  ;;  %v4307_v19 = vld [vmem:[#allocation2 + $0x50] sm:$0xf0]  ;;  %v4688_v11 = vor.u32 %v4299_v22, %v3792_v31 }
  0x3b   :  { %7224 = vst [vmem:[#allocation38_spill] sm:$0xff] %v4672_v1  ;;  %v4300_v41 = vld [vmem:[#allocation2 + $0x1c] sm:$0xf]  ;;  %v3800_v42 = vld [vmem:[#allocation2 + $0x54] sm:$0xf0]  ;;  %v4690_v20 = vor.u32 %v4307_v19, %v3798_v63 }
  0x3c   :  { %834 = vmatpush.bf16.msrb.mxu0 %v4659_v32  ;;  %7227 = vst [vmem:[#allocation41_spill] sm:$0xff] %v4681_v4  ;;  %v4226_v2 = vld [vmem:[#allocation2 + $0x368] sm:$0xf]  ;;  %v4413_v61 = vld [vmem:[#allocation2 + $0x3a0] sm:$0xf0] }
  0x3d   :  { %847 = vmatpush.bf16.msrb.mxu1 %v4664_v47  ;;  %v4406_v60 = vld [vmem:[#allocation2 + $0x36c] sm:$0xf]  ;;  %v4228_v26 = vld [vmem:[#allocation2 + $0x3a4] sm:$0xf0]  ;;  %v4234_v49 = vld [vmem:[#allocation2 + $0x370] sm:$0xf]  ;;  %v4693_v47 = vor.u32 %v4300_v41, %v3800_v42  ;;  %v4695_v55 = vor.u32 %v4413_v61, %v4226_v2 }
  0x3e   :  { %860 = vmatpush.bf16.msrb.mxu2 %v4666_v39  ;;  %873 = vmatpush.bf16.msrb.mxu3 %v4669_v37  ;;  %v4684_v39 = vor.u32 %v4306_v36, %v3790_v13  ;;  %v4414_v10 = vld [vmem:[#allocation2 + $0x3a8] sm:$0xf0]  ;;  %7229 = vst [vmem:[#allocation43_spill] sm:$0xff] %v4688_v11  ;;  %v4407_v24 = vld [vmem:[#allocation2 + $0x374] sm:$0xf]  ;;  %v4697_v13 = vor.u32 %v4406_v60, %v4228_v26 }
  0x3f   :  { %7230 = vst [vmem:[#allocation44_spill] sm:$0xff] %v4690_v20  ;;  %v4236_v37 = vld [vmem:[#allocation2 + $0x3ac] sm:$0xf0]  ;;  %v4699_v36 = vor.u32 %v4414_v10, %v4234_v49  ;;  %v4391_v51 = vld [vmem:[#allocation2 + $0x2f4] sm:$0xf] }
  0x40   :  { %835 = vmatpush.bf16.msrb.mxu0 %v4672_v1  ;;  %7228 = vst [vmem:[#allocation42_spill] sm:$0xff] %v4684_v39  ;;  %v4166_v52 = vld [vmem:[#allocation2 + $0x2f0] sm:$0xf]  ;;  %v4702_v22 = vor.u32 %v4407_v24, %v4236_v37  ;;  %v4174_v63 = vld [vmem:[#allocation2 + $0x2f8] sm:$0xf] }
  0x41   :  { %848 = vmatpush.bf16.msrb.mxu1 %v4676_v30  ;;  %7231 = vst [vmem:[#allocation45_spill] sm:$0xff] %v4693_v47  ;;  %v4398_v30 = vld [vmem:[#allocation2 + $0x328] sm:$0xf0]  ;;  %v4168_v19 = vld [vmem:[#allocation2 + $0x32c] sm:$0xf0] }
  0x42   :  { %861 = vmatpush.bf16.msrb.mxu2 %v4678_v48  ;;  %874 = vmatpush.bf16.msrb.mxu3 %v4681_v4  ;;  %7232 = vst [vmem:[#allocation46_spill] sm:$0xff] %v4695_v55  ;;  %v4399_v31 = vld [vmem:[#allocation2 + $0x330] sm:$0xf0]  ;;  %v4392_v61 = vld [vmem:[#allocation2 + $0x2fc] sm:$0xf]  ;;  %v4708_v60 = vor.u32 %v4398_v30, %v4166_v52  ;;  %v4712_v37 = vor.u32 %v4391_v51, %v4168_v19 }
  0x43   :  { %7233 = vst [vmem:[#allocation47_spill] sm:$0xff] %v4697_v13  ;;  %v4176_v2 = vld [vmem:[#allocation2 + $0x334] sm:$0xf0]  ;;  %v4714_v41 = vor.u32 %v4399_v31, %v4174_v63  ;;  %v4383_v26 = vld [vmem:[#allocation2 + $0x2b0] sm:$0xf0] }
  0x44   :  { %7234 = vst [vmem:[#allocation48_spill] sm:$0xff] %v4699_v36  ;;  %836 = vmatpush.bf16.msrb.mxu0 %v4684_v39  ;;  %v4106_v42 = vld [vmem:[#allocation2 + $0x278] sm:$0xf]  ;;  %v4376_v49 = vld [vmem:[#allocation2 + $0x27c] sm:$0xf]  ;;  %v4717_v10 = vor.u32 %v4392_v61, %v4176_v2 }
  0x45   :  { %7235 = vst [vmem:[#allocation49_spill] sm:$0xff] %v4702_v22  ;;  %849 = vmatpush.bf16.msrb.mxu1 %v4688_v11  ;;  %v4108_v24 = vld [vmem:[#allocation2 + $0x2b4] sm:$0xf0]  ;;  %v4377_v52 = vld [vmem:[#allocation2 + $0x284] sm:$0xf]  ;;  %v4723_v51 = vor.u32 %v4383_v26, %v4106_v42 }
  0x46   :  { %862 = vmatpush.bf16.msrb.mxu2 %v4690_v20  ;;  %875 = vmatpush.bf16.msrb.mxu3 %v4693_v47  ;;  %7236 = vst [vmem:[#allocation50_spill] sm:$0xff] %v4708_v60  ;;  %v4114_v47 = vld [vmem:[#allocation2 + $0x280] sm:$0xf]  ;;  %v4384_v20 = vld [vmem:[#allocation2 + $0x2b8] sm:$0xf0]  ;;  %v4728_v19 = vor.u32 %v4376_v49, %v4108_v24 }
  0x47   :  { %7237 = vst [vmem:[#allocation51_spill] sm:$0xff] %v4712_v37  ;;  %837 = vmatmul.bf16.vlgmr.msrb.gmra.mxu0 %v4641_v53  ;;  %v4116_v30 = vld [vmem:[#allocation2 + $0x2bc] sm:$0xf0]  ;;  %v4730_v63 = vor.u32 %v4384_v20, %v4114_v47  ;;  %v4368_v61 = vld [vmem:[#allocation2 + $0x238] sm:$0xf0] }
  0x48   :  { %881 = vmatpush.bf16.msra.mxu0 %v4695_v55  ;;  %7238 = vst [vmem:[#allocation52_spill] sm:$0xff] %v4714_v41  ;;  %850 = vmatmul.bf16.vlgmr.msrb.gmra.mxu1 %v4641_v53  ;;  %v4046_v31 = vld [vmem:[#allocation2 + $0x200] sm:$0xf]  ;;  %v4361_v2 = vld [vmem:[#allocation2 + $0x204] sm:$0xf] }
  0x49   :  { %894 = vmatpush.bf16.msra.mxu1 %v4697_v13  ;;  %7239 = vst [vmem:[#allocation53_spill] sm:$0xff] %v4717_v10  ;;  %876 = vmatmul.bf16.vlgmr.msrb.gmra.mxu3 %v4641_v53  ;;  %v4054_v42 = vld [vmem:[#allocation2 + $0x208] sm:$0xf]  ;;  %v4369_v26 = vld [vmem:[#allocation2 + $0x240] sm:$0xf0] }
  0x4a   :  { %907 = vmatpush.bf16.msra.mxu2 %v4699_v36  ;;  %920 = vmatpush.bf16.msra.mxu3 %v4702_v22  ;;  %7240 = vst [vmem:[#allocation54_spill] sm:$0xff] %v4723_v51  ;;  %v4733_v22 = vor.u32 %v4377_v52, %v4116_v30  ;;  %v4048_v36 = vld [vmem:[#allocation2 + $0x23c] sm:$0xf0]  ;;  %v4362_v13 = vld [vmem:[#allocation2 + $0x20c] sm:$0xf]  ;;  %v4742_v20 = vor.u32 %v4369_v26, %v4054_v42 }
  0x4b   :  { %863 = vmatmul.bf16.vlgmr.msrb.gmra.mxu2 %v4641_v53  ;;  %7241 = vst [vmem:[#allocation55_spill] sm:$0xff] %v4728_v19  ;;  %v4056_v11 = vld [vmem:[#allocation2 + $0x244] sm:$0xf0]  ;;  %v4740_v47 = vor.u32 %v4361_v2, %v4048_v36  ;;  %v4353_v24 = vld [vmem:[#allocation2 + $0x1c0] sm:$0xf0] }
  0x4c   :  { %882 = vmatpush.bf16.msra.mxu0 %v4708_v60  ;;  %7242 = vst [vmem:[#allocation56_spill] sm:$0xff] %v4730_v63  ;;  %v3986_v49 = vld [vmem:[#allocation2 + $0x188] sm:$0xf]  ;;  %v4346_v52 = vld [vmem:[#allocation2 + $0x18c] sm:$0xf]  ;;  %v4745_v30 = vor.u32 %v4362_v13, %v4056_v11 }
  0x4d   :  { %895 = vmatpush.bf16.msra.mxu1 %v4712_v37  ;;  %7243 = vst [vmem:[#allocation57_spill] sm:$0xff] %v4733_v22  ;;  %v4736_v37 = vor.u32 %v4368_v61, %v4046_v31  ;;  %v4354_v4 = vld [vmem:[#allocation2 + $0x1c8] sm:$0xf0]  ;;  %v4347_v31 = vld [vmem:[#allocation2 + $0x194] sm:$0xf] }
  0x4e   :  { %908 = vmatpush.bf16.msra.mxu2 %v4714_v41  ;;  %921 = vmatpush.bf16.msra.mxu3 %v4717_v10  ;;  %7245 = vst [vmem:[#allocation59_spill] sm:$0xff] %v4740_v47  ;;  %v3988_v10 = vld [vmem:[#allocation2 + $0x1c4] sm:$0xf0]  ;;  %v3994_v41 = vld [vmem:[#allocation2 + $0x190] sm:$0xf] }
  0x4f   :  { %7244 = vst [vmem:[#allocation58_spill] sm:$0xff] %v4736_v37  ;;  %v3996_v61 = vld [vmem:[#allocation2 + $0x1cc] sm:$0xf0]  ;;  %v4752_v36 = vor.u32 %v4346_v52, %v3988_v10  ;;  %v4754_v2 = vor.u32 %v4354_v4, %v3994_v41  ;;  %v4338_v11 = vld [vmem:[#allocation2 + $0x148] sm:$0xf0] }
  0x50   :  { %883 = vmatpush.bf16.msra.mxu0 %v4723_v51  ;;  %7246 = vst [vmem:[#allocation60_spill] sm:$0xff] %v4742_v20  ;;  %v3926_v42 = vld [vmem:[#allocation2 + $0x110] sm:$0xf]  ;;  %v4331_v13 = vld [vmem:[#allocation2 + $0x114] sm:$0xf]  ;;  %v4757_v26 = vor.u32 %v4347_v31, %v3996_v61 }
  0x51   :  { %896 = vmatpush.bf16.msra.mxu1 %v4728_v19  ;;  %7247 = vst [vmem:[#allocation61_spill] sm:$0xff] %v4745_v30  ;;  %v4748_v19 = vor.u32 %v4353_v24, %v3986_v49  ;;  %v4339_v48 = vld [vmem:[#allocation2 + $0x150] sm:$0xf0]  ;;  %v4332_v49 = vld [vmem:[#allocation2 + $0x11c] sm:$0xf] }
  0x52   :  { %909 = vmatpush.bf16.msra.mxu2 %v4730_v63  ;;  %922 = vmatpush.bf16.msra.mxu3 %v4733_v22  ;;  %7249 = vst [vmem:[#allocation63_spill] sm:$0xff] %v4752_v36  ;;  %v3928_v22 = vld [vmem:[#allocation2 + $0x14c] sm:$0xf0]  ;;  %v3934_v63 = vld [vmem:[#allocation2 + $0x118] sm:$0xf] }
  0x53   :  { %7248 = vst [vmem:[#allocation62_spill] sm:$0xff] %v4748_v19  ;;  %v3936_v24 = vld [vmem:[#allocation2 + $0x154] sm:$0xf0]  ;;  %v4764_v4 = vor.u32 %v4331_v13, %v3928_v22  ;;  %v4766_v41 = vor.u32 %v4339_v48, %v3934_v63  ;;  %v4323_v52 = vld [vmem:[#allocation2 + $0xd0] sm:$0xf0] }
  0x54   :  { %884 = vmatpush.bf16.msra.mxu0 %v4736_v37  ;;  %7250 = vst [vmem:[#allocation64_spill] sm:$0xff] %v4754_v2  ;;  %v3866_v10 = vld [vmem:[#allocation2 + $0x98] sm:$0xf]  ;;  %v4316_v31 = vld [vmem:[#allocation2 + $0x9c] sm:$0xf]  ;;  %v4769_v61 = vor.u32 %v4332_v49, %v3936_v24 }
  0x55   :  { %897 = vmatpush.bf16.msra.mxu1 %v4740_v47  ;;  %7251 = vst [vmem:[#allocation65_spill] sm:$0xff] %v4757_v26  ;;  %v4760_v47 = vor.u32 %v4338_v11, %v3926_v42  ;;  %v4317_v42 = vld [vmem:[#allocation2 + $0xa4] sm:$0xf]  ;;  %v3876_v11 = vld [vmem:[#allocation2 + $0xdc] sm:$0xf0] }
  0x56   :  { %910 = vmatpush.bf16.msra.mxu2 %v4742_v20  ;;  %923 = vmatpush.bf16.msra.mxu3 %v4745_v30  ;;  %7253 = vst [vmem:[#allocation67_spill] sm:$0xff] %v4764_v4  ;;  %v3868_v30 = vld [vmem:[#allocation2 + $0xd4] sm:$0xf0]  ;;  %v3874_v20 = vld [vmem:[#allocation2 + $0xa0] sm:$0xf] }
  0x57   :  { %7252 = vst [vmem:[#allocation66_spill] sm:$0xff] %v4760_v47  ;;  %v3806_v22 = vld [vmem:[#allocation2 + $0x20] sm:$0xf]  ;;  %v4308_v13 = vld [vmem:[#allocation2 + $0x58] sm:$0xf0]  ;;  %v4776_v48 = vor.u32 %v4316_v31, %v3868_v30 }
  0x58   :  { %885 = vmatpush.bf16.msra.mxu0 %v4748_v19  ;;  %7254 = vst [vmem:[#allocation68_spill] sm:$0xff] %v4766_v41  ;;  %v4324_v19 = vld [vmem:[#allocation2 + $0xd8] sm:$0xf0]  ;;  %v4301_v49 = vld [vmem:[#allocation2 + $0x24] sm:$0xf] }
  0x59   :  { %898 = vmatpush.bf16.msra.mxu1 %v4752_v36  ;;  %7255 = vst [vmem:[#allocation69_spill] sm:$0xff] %v4769_v61  ;;  %v4772_v36 = vor.u32 %v4323_v52, %v3866_v10  ;;  %v4778_v63 = vor.u32 %v4324_v19, %v3874_v20  ;;  %v3808_v24 = vld [vmem:[#allocation2 + $0x5c] sm:$0xf0]  ;;  %v4302_v10 = vld [vmem:[#allocation2 + $0x2c] sm:$0xf] }
  0x5a   :  { %911 = vmatpush.bf16.msra.mxu2 %v4754_v2  ;;  %924 = vmatpush.bf16.msra.mxu3 %v4757_v26  ;;  %v3814_v26 = vld [vmem:[#allocation2 + $0x28] sm:$0xf]  ;;  %v4781_v2 = vor.u32 %v4317_v42, %v3876_v11  ;;  %v4242_v37 = vld [vmem:[#allocation2 + $0x378] sm:$0xf]  ;;  %v4415_v51 = vld [vmem:[#allocation2 + $0x3b0] sm:$0xf0]  ;;  %v4788_v31 = vor.u32 %v4301_v49, %v3808_v24 }
  0x5b   :  { %7256 = vst [vmem:[#allocation70_spill] sm:$0xff] %v4772_v36  ;;  %v3816_v52 = vld [vmem:[#allocation2 + $0x64] sm:$0xf0]  ;;  %v4408_v60 = vld [vmem:[#allocation2 + $0x37c] sm:$0xf] }
  0x5c   :  { %886 = vmatpush.bf16.msra.mxu0 %v4760_v47  ;;  %7257 = vst [vmem:[#allocation71_spill] sm:$0xff] %v4778_v63  ;;  %v4309_v47 = vld [vmem:[#allocation2 + $0x60] sm:$0xf0]  ;;  %v4244_v30 = vld [vmem:[#allocation2 + $0x3b4] sm:$0xf0]  ;;  %v4793_v11 = vor.u32 %v4302_v10, %v3816_v52 }
  0x5d   :  { %899 = vmatpush.bf16.msra.mxu1 %v4764_v4  ;;  %7258 = vst [vmem:[#allocation72_spill] sm:$0xff] %v4781_v2  ;;  %v4250_v19 = vld [vmem:[#allocation2 + $0x380] sm:$0xf]  ;;  %v4416_v20 = vld [vmem:[#allocation2 + $0x3b8] sm:$0xf0]  ;;  %v4790_v42 = vor.u32 %v4309_v47, %v3814_v26  ;;  %v4797_v4 = vor.u32 %v4408_v60, %v4244_v30 }
  0x5e   :  { %912 = vmatpush.bf16.msra.mxu2 %v4766_v41  ;;  %925 = vmatpush.bf16.msra.mxu3 %v4769_v61  ;;  %v4784_v41 = vor.u32 %v4308_v13, %v3806_v22  ;;  %7261 = vst [vmem:[#allocation75_spill] sm:$0xff] %v4793_v11  ;;  %v4795_v61 = vor.u32 %v4415_v51, %v4242_v37  ;;  %v4182_v13 = vld [vmem:[#allocation2 + $0x300] sm:$0xf]  ;;  %v4393_v55 = vld [vmem:[#allocation2 + $0x304] sm:$0xf] }
  0x5f   :  { %7260 = vst [vmem:[#allocation74_spill] sm:$0xff] %v4790_v42  ;;  %v4799_v22 = vor.u32 %v4416_v20, %v4250_v19  ;;  %v4190_v49 = vld [vmem:[#allocation2 + $0x308] sm:$0xf]  ;;  %v4401_v24 = vld [vmem:[#allocation2 + $0x340] sm:$0xf0] }
  0x60   :  { %887 = vmatpush.bf16.msra.mxu0 %v4772_v36  ;;  %7259 = vst [vmem:[#allocation73_spill] sm:$0xff] %v4784_v41  ;;  %v4400_v36 = vld [vmem:[#allocation2 + $0x338] sm:$0xf0]  ;;  %v4812_v51 = vor.u32 %v4401_v24, %v4190_v49  ;;  %v4122_v47 = vld [vmem:[#allocation2 + $0x288] sm:$0xf] }
  0x61   :  { %900 = vmatpush.bf16.msra.mxu1 %v4776_v48  ;;  %7262 = vst [vmem:[#allocation76_spill] sm:$0xff] %v4795_v61  ;;  %v4806_v60 = vor.u32 %v4400_v36, %v4182_v13  ;;  %v4385_v26 = vld [vmem:[#allocation2 + $0x2c0] sm:$0xf0]  ;;  %v4378_v10 = vld [vmem:[#allocation2 + $0x28c] sm:$0xf] }
  0x62   :  { %913 = vmatpush.bf16.msra.mxu2 %v4778_v63  ;;  %926 = vmatpush.bf16.msra.mxu3 %v4781_v2  ;;  %7263 = vst [vmem:[#allocation77_spill] sm:$0xff] %v4799_v22  ;;  %v4184_v63 = vld [vmem:[#allocation2 + $0x33c] sm:$0xf0]  ;;  %v4124_v52 = vld [vmem:[#allocation2 + $0x2c4] sm:$0xf0] }
  0x63   :  { %7264 = vst [vmem:[#allocation78_spill] sm:$0xff] %v4806_v60  ;;  %v4810_v37 = vor.u32 %v4393_v55, %v4184_v63  ;;  %v4130_v30 = vld [vmem:[#allocation2 + $0x290] sm:$0xf]  ;;  %v4386_v19 = vld [vmem:[#allocation2 + $0x2c8] sm:$0xf0]  ;;  %v4819_v55 = vor.u32 %v4385_v26, %v4122_v47  ;;  %v4824_v36 = vor.u32 %v4378_v10, %v4124_v52 }
  0x64   :  { %888 = vmatpush.bf16.msra.mxu0 %v4784_v41  ;;  %7266 = vst [vmem:[#allocation80_spill] sm:$0xff] %v4812_v51  ;;  %v4826_v63 = vor.u32 %v4386_v19, %v4130_v30  ;;  %v4062_v20 = vld [vmem:[#allocation2 + $0x210] sm:$0xf]  ;;  %v4370_v13 = vld [vmem:[#allocation2 + $0x248] sm:$0xf0] }
  0x65   :  { %901 = vmatpush.bf16.msra.mxu1 %v4788_v31  ;;  %7265 = vst [vmem:[#allocation79_spill] sm:$0xff] %v4810_v37  ;;  %v4363_v49 = vld [vmem:[#allocation2 + $0x214] sm:$0xf]  ;;  %v4064_v24 = vld [vmem:[#allocation2 + $0x24c] sm:$0xf0]  ;;  %v4830_v47 = vor.u32 %v4370_v13, %v4062_v20 }
  0x66   :  { %914 = vmatpush.bf16.msra.mxu2 %v4790_v42  ;;  %927 = vmatpush.bf16.msra.mxu3 %v4793_v11  ;;  %7267 = vst [vmem:[#allocation81_spill] sm:$0xff] %v4819_v55  ;;  %v4834_v26 = vor.u32 %v4363_v49, %v4064_v24  ;;  %v4002_v52 = vld [vmem:[#allocation2 + $0x198] sm:$0xf]  ;;  %v4355_v30 = vld [vmem:[#allocation2 + $0x1d0] sm:$0xf0] }
  0x67   :  { %889 = vmatmul.bf16.vlgmr.msra.gmra.mxu0 %v4641_v53  ;;  %7268 = vst [vmem:[#allocation82_spill] sm:$0xff] %v4824_v36  ;;  %v4348_v19 = vld [vmem:[#allocation2 + $0x19c] sm:$0xf]  ;;  %v4840_v20 = vor.u32 %v4355_v30, %v4002_v52  ;;  %v4333_v24 = vld [vmem:[#allocation2 + $0x124] sm:$0xf] }
  0x68   :  { %933 = vmatpush.bf16.msrb.mxu0 %v4795_v61  ;;  %902 = vmatmul.bf16.vlgmr.msra.gmra.mxu1 %v4641_v53  ;;  %7269 = vst [vmem:[#allocation83_spill] sm:$0xff] %v4826_v63  ;;  %v4340_v49 = vld [vmem:[#allocation2 + $0x158] sm:$0xf0]  ;;  %v4325_v30 = vld [vmem:[#allocation2 + $0xe0] sm:$0xf0] }
  0x69   :  { %946 = vmatpush.bf16.msrb.mxu1 %v4797_v4  ;;  %928 = vmatmul.bf16.vlgmr.msra.gmra.mxu3 %v4641_v53  ;;  %7270 = vst [vmem:[#allocation84_spill] sm:$0xff] %v4834_v26 }
  0x6a   :  { %959 = vmatpush.bf16.msrb.mxu2 %v4799_v22  ;;  %972 = vmatpush.bf16.msrb.mxu3 %v4488_v3  ;;  %v4070_v3 = vld [vmem:[#allocation2 + $0x218] sm:$0xf]  ;;  %v4371_v22 = vld [vmem:[#allocation2 + $0x250] sm:$0xf0] }
  0x6b   :  { %915 = vmatmul.bf16.vlgmr.msra.gmra.mxu2 %v4641_v53  ;;  %v4836_v10 = vor.u32 %v4371_v22, %v4070_v3  ;;  %v3942_v22 = vld [vmem:[#allocation2 + $0x120] sm:$0xf] }
  0x6c   :  { %934 = vmatpush.bf16.msrb.mxu0 %v4806_v60  ;;  %v4850_v52 = vor.u32 %v4340_v49, %v3942_v22  ;;  %v4310_v49 = vld [vmem:[#allocation2 + $0x68] sm:$0xf0] }
  0x6d   :  { %947 = vmatpush.bf16.msrb.mxu1 %v4810_v37  ;;  %7271 = vst [vmem:[#allocation85_spill] sm:$0xff] %v4836_v10  ;;  %v4356_v37 = vld [vmem:[#allocation2 + $0x1d8] sm:$0xf0] }
  0x6e   :  { %960 = vmatpush.bf16.msrb.mxu2 %v4812_v51  ;;  %973 = vmatpush.bf16.msrb.mxu3 %v4499_v16  ;;  %v4004_v16 = vld [vmem:[#allocation2 + $0x1d4] sm:$0xf0]  ;;  %v4010_v51 = vld [vmem:[#allocation2 + $0x1a0] sm:$0xf]  ;;  %7274 = vst [vmem:[#allocation88_spill] sm:$0xff] %v4850_v52 }
  0x6f   :  { %v4844_v13 = vor.u32 %v4348_v19, %v4004_v16  ;;  %v4846_v3 = vor.u32 %v4356_v37, %v4010_v51  ;;  %v3882_v51 = vld [vmem:[#allocation2 + $0xa8] sm:$0xf]  ;;  %v4318_v19 = vld [vmem:[#allocation2 + $0xac] sm:$0xf] }
  0x70   :  { %935 = vmatpush.bf16.msrb.mxu0 %v4819_v55  ;;  %v4860_v22 = vor.u32 %v4325_v30, %v3882_v51  ;;  %v7282_v30 = vld [vmem:[#allocation19_spill] sm:$0xff] }
  0x71   :  { %948 = vmatpush.bf16.msrb.mxu1 %v4824_v36  ;;  %7272 = vst [vmem:[#allocation86_spill] sm:$0xff] %v4844_v13  ;;  %v4341_v36 = vld [vmem:[#allocation2 + $0x160] sm:$0xf0] }
  0x72   :  { %961 = vmatpush.bf16.msrb.mxu2 %v4826_v63  ;;  %974 = vmatpush.bf16.msrb.mxu3 %v4509_v29  ;;  %7273 = vst [vmem:[#allocation87_spill] sm:$0xff] %v4846_v3  ;;  %v3944_v29 = vld [vmem:[#allocation2 + $0x15c] sm:$0xf0]  ;;  %v3950_v63 = vld [vmem:[#allocation2 + $0x128] sm:$0xf] }
  0x73   :  { %v4854_v16 = vor.u32 %v4333_v24, %v3944_v29  ;;  %v4856_v37 = vor.u32 %v4341_v36, %v3950_v63  ;;  %7275 = vst [vmem:[#allocation89_spill] sm:$0xff] %v4860_v22  ;;  %v3822_v63 = vld [vmem:[#allocation2 + $0x30] sm:$0xf]  ;;  %v4303_v24 = vld [vmem:[#allocation2 + $0x34] sm:$0xf] }
  0x74   :  { %936 = vmatpush.bf16.msrb.mxu0 %v4830_v47  ;;  %v4870_v51 = vor.u32 %v4310_v49, %v3822_v63  ;;  %v7284_v63 = vld [vmem:[#allocation20_spill] sm:$0xff]  ;;  %v7285_v49 = vld [vmem:[#allocation21_spill] sm:$0xff] }
  0x75   :  { %949 = vmatpush.bf16.msrb.mxu1 %v4834_v26  ;;  %v4326_v26 = vld [vmem:[#allocation2 + $0xe8] sm:$0xf0] }
  0x76   :  { %962 = vmatpush.bf16.msrb.mxu2 %v4836_v10  ;;  %975 = vmatpush.bf16.msrb.mxu3 %v4521_v44  ;;  %v3884_v44 = vld [vmem:[#allocation2 + $0xe4] sm:$0xf0]  ;;  %v3890_v10 = vld [vmem:[#allocation2 + $0xb0] sm:$0xf]  ;;  %7276 = vst [vmem:[#allocation90_spill] sm:$0xff] %v4870_v51 }
  0x77   :  { %v4864_v29 = vor.u32 %v4318_v19, %v3884_v44  ;;  %v4866_v36 = vor.u32 %v4326_v26, %v3890_v10  ;;  %v4884_v10 = vpack.c.bf16 %v4616_v54, %v4616_v54  ;;  %v7278_v54 = vld [vmem:[#allocation15_spill] sm:$0xff]  ;;  %v7283_v19 = vld [vmem:[#allocation46_spill] sm:$0xff] }
  0x78   :  { %937 = vmatpush.bf16.msrb.mxu0 %v4840_v20 }
  0x79   :  { %950 = vmatpush.bf16.msrb.mxu1 %v4844_v13  ;;  %v4311_v13 = vld [vmem:[#allocation2 + $0x70] sm:$0xf0] }
  0x7a   :  { %963 = vmatpush.bf16.msrb.mxu2 %v4846_v3  ;;  %976 = vmatpush.bf16.msrb.mxu3 %v4533_v56  ;;  %v3824_v56 = vld [vmem:[#allocation2 + $0x6c] sm:$0xf0]  ;;  %v3830_v3 = vld [vmem:[#allocation2 + $0x38] sm:$0xf] }
  0x7b   :  { %v4874_v44 = vor.u32 %v4303_v24, %v3824_v56  ;;  %v4876_v26 = vor.u32 %v4311_v13, %v3830_v3  ;;  %v7277_v56 = vld [vmem:[#allocation14_spill] sm:$0xff]  ;;  %v7280_v13 = vld [vmem:[#allocation17_spill] sm:$0xff] }
  0x7c   :  { %938 = vmatpush.bf16.msrb.mxu0 %v4850_v52  ;;  %v7281_v3 = vld [vmem:[#allocation18_spill] sm:$0xff] }
  0x7d   :  { %951 = vmatpush.bf16.msrb.mxu1 %v4854_v16  ;;  %v7286_v24 = vld [vmem:[#allocation22_spill] sm:$0xff] }
  0x7e   :  { %964 = vmatpush.bf16.msrb.mxu2 %v4856_v37  ;;  %977 = vmatpush.bf16.msrb.mxu3 %v4545_v5 }
  0x80   :  { %939 = vmatpush.bf16.msrb.mxu0 %v4860_v22 }
  0x81   :  { %952 = vmatpush.bf16.msrb.mxu1 %v4864_v29 }
  0x82   :  { %965 = vmatpush.bf16.msrb.mxu2 %v4866_v36  ;;  %978 = vmatpush.bf16.msrb.mxu3 %v4557_v23 }
  0x84   :  { %940 = vmatpush.bf16.msrb.mxu0 %v4870_v51 }
  0x85   :  { %953 = vmatpush.bf16.msrb.mxu1 %v4874_v44 }
  0x86   :  { %966 = vmatpush.bf16.msrb.mxu2 %v4876_v26  ;;  %979 = vmatpush.bf16.msrb.mxu3 %v4569_v43 }
  0x87   :  { %941 = vmatmul.bf16.vlgmr.msrb.gmra.mxu0 %v4641_v53 }
  0x88   :  { %985 = vmatpush.bf16.msra.mxu0 %v4490_v7  ;;  %954 = vmatmul.bf16.vlgmr.msrb.gmra.mxu1 %v4641_v53 }
  0x89   :  { %998 = vmatpush.bf16.msra.mxu1 %v4492_v8  ;;  %980 = vmatmul.bf16.vlgmr.msrb.gmra.mxu3 %v4884_v10 }
  0x8a   :  { %1011 = vmatpush.bf16.msra.mxu2 %v4495_v12  ;;  %1024 = vmatpush.bf16.msra.mxu3 %v4580_v59 }
  0x8b   :  { %967 = vmatmul.bf16.vlgmr.msrb.gmra.mxu2 %v4641_v53  ;;  %v7279_v53 = vld [vmem:[#allocation16_spill] sm:$0xff] }
  0x8c   :  { %986 = vmatpush.bf16.msra.mxu0 %v4501_v17 }
  0x8d   :  { %999 = vmatpush.bf16.msra.mxu1 %v4504_v21 }
  0x8e   :  { %1012 = vmatpush.bf16.msra.mxu2 %v4506_v25  ;;  %1025 = vmatpush.bf16.msra.mxu3 %v4593_v18 }
  0x90   :  { %987 = vmatpush.bf16.msra.mxu0 %v4513_v33 }
  0x91   :  { %1000 = vmatpush.bf16.msra.mxu1 %v4515_v34 }
  0x92   :  { %1013 = vmatpush.bf16.msra.mxu2 %v4518_v38  ;;  %1026 = vmatpush.bf16.msra.mxu3 %v4605_v40 }
  0x94   :  { %988 = vmatpush.bf16.msra.mxu0 %v4525_v45 }
  0x95   :  { %1001 = vmatpush.bf16.msra.mxu1 %v4527_v46 }
  0x96   :  { %1014 = vmatpush.bf16.msra.mxu2 %v4530_v50  ;;  %1027 = vmatpush.bf16.msra.mxu3 %v4625_v15 }
  0x98   :  { %989 = vmatpush.bf16.msra.mxu0 %v4537_v57 }
  0x99   :  { %1002 = vmatpush.bf16.msra.mxu1 %v4539_v58 }
  0x9a   :  { %1015 = vmatpush.bf16.msra.mxu2 %v4542_v62  ;;  %1028 = vmatpush.bf16.msra.mxu3 %v4644_v0 }
  0x9c   :  { %990 = vmatpush.bf16.msra.mxu0 %v4549_v6 }
  0x9d   :  { %1003 = vmatpush.bf16.msra.mxu1 %v4551_v9  ;;  %v7307_v9 = vld [vmem:[#allocation41_spill] sm:$0xff] }
  0x9e   :  { %1016 = vmatpush.bf16.msra.mxu2 %v4554_v14  ;;  %1029 = vmatpush.bf16.msra.mxu3 %v4659_v32  ;;  %v7299_v32 = vld [vmem:[#allocation62_spill] sm:$0xff]  ;;  %v7303_v14 = vld [vmem:[#allocation37_spill] sm:$0xff] }
  0xa0   :  { %991 = vmatpush.bf16.msra.mxu0 %v4561_v27 }
  0xa1   :  { %1004 = vmatpush.bf16.msra.mxu1 %v4563_v28  ;;  %v7295_v28 = vld [vmem:[#allocation58_spill] sm:$0xff] }
  0xa2   :  { %1017 = vmatpush.bf16.msra.mxu2 %v4566_v35  ;;  %1030 = vmatpush.bf16.msra.mxu3 %v4672_v1  ;;  %v7293_v1 = vld [vmem:[#allocation28_spill] sm:$0xff]  ;;  %v7294_v35 = vld [vmem:[#allocation30_spill] sm:$0xff] }
  0xa4   :  { %992 = vmatpush.bf16.msra.mxu0 %v7277_v56 }
  0xa5   :  { %1005 = vmatpush.bf16.msra.mxu1 %v7278_v54  ;;  %v7292_v54 = vld [vmem:[#allocation27_spill] sm:$0xff] }
  0xa6   :  { %1018 = vmatpush.bf16.msra.mxu2 %v7279_v53  ;;  %1031 = vmatpush.bf16.msra.mxu3 %v4684_v39  ;;  %v7287_v39 = vld [vmem:[#allocation50_spill] sm:$0xff] }
  0xa7   :  { %993 = vmatmul.bf16.vlgmr.msra.gmra.mxu0 %v4884_v10  ;;  %v7291_v53 = vld [vmem:[#allocation54_spill] sm:$0xff] }
  0xa8   :  { %1037 = vmatpush.bf16.msrb.mxu0 %v7280_v13  ;;  %1006 = vmatmul.bf16.vlgmr.msra.gmra.mxu1 %v4884_v10 }
  0xa9   :  { %1050 = vmatpush.bf16.msrb.mxu1 %v7281_v3  ;;  %1019 = vmatmul.bf16.vlgmr.msra.gmra.mxu2 %v4884_v10  ;;  %v7288_v3 = vld [vmem:[#allocation23_spill] sm:$0xff] }
  0xaa   :  { %1063 = vmatpush.bf16.msrb.mxu2 %v7282_v30  ;;  %1076 = vmatpush.bf16.msrb.mxu3 %v7283_v19  ;;  %v7289_v30 = vld [vmem:[#allocation24_spill] sm:$0xff]  ;;  %v7290_v19 = vld [vmem:[#allocation25_spill] sm:$0xff] }
  0xab   :  { %1032 = vmatmul.bf16.vlgmr.msra.gmra.mxu3 %v4884_v10 }
  0xac   :  { %1038 = vmatpush.bf16.msrb.mxu0 %v7284_v63 }
  0xad   :  { %1051 = vmatpush.bf16.msrb.mxu1 %v7285_v49  ;;  %v7296_v49 = vld [vmem:[#allocation31_spill] sm:$0xff] }
  0xae   :  { %1064 = vmatpush.bf16.msrb.mxu2 %v7286_v24  ;;  %1077 = vmatpush.bf16.msrb.mxu3 %v7287_v39  ;;  %v7297_v24 = vld [vmem:[#allocation32_spill] sm:$0xff]  ;;  %v7298_v39 = vld [vmem:[#allocation33_spill] sm:$0xff] }
  0xb0   :  { %1039 = vmatpush.bf16.msrb.mxu0 %v7288_v3 }
  0xb1   :  { %1052 = vmatpush.bf16.msrb.mxu1 %v7289_v30  ;;  %v4947_v30 = vpop.f32.mrf.mxu0 }
  0xb2   :  { %1065 = vmatpush.bf16.msrb.mxu2 %v7290_v19  ;;  %1078 = vmatpush.bf16.msrb.mxu3 %v7291_v53  ;;  %7300 = vst [vmem:[#allocation14_spill] sm:$0xff] %v4947_v30  ;;  %v7301_v19 = vld [vmem:[#allocation35_spill] sm:$0xff]  ;;  %v7302_v53 = vld [vmem:[#allocation36_spill] sm:$0xff] }
  0xb3   :  { %v7310_v30 = vld [vmem:[#allocation43_spill] sm:$0xff] }
  0xb4   :  { %1040 = vmatpush.bf16.msrb.mxu0 %v7292_v54 }
  0xb5   :  { %1053 = vmatpush.bf16.msrb.mxu1 %v7293_v1  ;;  %v7304_v1 = vld [vmem:[#allocation66_spill] sm:$0xff] }
  0xb6   :  { %1066 = vmatpush.bf16.msrb.mxu2 %v7294_v35  ;;  %1079 = vmatpush.bf16.msrb.mxu3 %v7295_v28  ;;  %v7305_v35 = vld [vmem:[#allocation39_spill] sm:$0xff]  ;;  %v7306_v28 = vld [vmem:[#allocation40_spill] sm:$0xff] }
  0xb8   :  { %1041 = vmatpush.bf16.msrb.mxu0 %v7296_v49 }
  0xb9   :  { %1054 = vmatpush.bf16.msrb.mxu1 %v7297_v24  ;;  %v7308_v24 = vld [vmem:[#allocation70_spill] sm:$0xff] }
  0xba   :  { %1067 = vmatpush.bf16.msrb.mxu2 %v7298_v39  ;;  %1080 = vmatpush.bf16.msrb.mxu3 %v7299_v32  ;;  %v788_v39 = vpop.f32.mrf.mxu0  ;;  %v4957_v32 = vpop.f32.mrf.mxu3 }
  0xbb   :  { %7309 = vst [vmem:[#allocation17_spill] sm:$0xff] %v4957_v32  ;;  %v7318_v39 = vld [vmem:[#allocation51_spill] sm:$0xff]  ;;  %v7319_v32 = vld [vmem:[#allocation52_spill] sm:$0xff] }
  0xbc   :  { %1042 = vmatpush.bf16.msrb.mxu0 %v7301_v19  ;;  %v7311_v19 = vld [vmem:[#allocation44_spill] sm:$0xff] }
  0xbd   :  { %1055 = vmatpush.bf16.msrb.mxu1 %v7302_v53  ;;  %v7312_v53 = vld [vmem:[#allocation45_spill] sm:$0xff] }
  0xbe   :  { %1068 = vmatpush.bf16.msrb.mxu2 %v7303_v14  ;;  %1081 = vmatpush.bf16.msrb.mxu3 %v7304_v1  ;;  %v7313_v1 = vld [vmem:[#allocation47_spill] sm:$0xff]  ;;  %v4964_v14 = vpop.f32.mrf.mxu1 }
  0xbf   :  { %7314 = vst [vmem:[#allocation20_spill] sm:$0xff] %v4964_v14  ;;  %v7320_v14 = vld [vmem:[#allocation53_spill] sm:$0xff] }
  0xc0   :  { %1043 = vmatpush.bf16.msrb.mxu0 %v7305_v35 }
  0xc1   :  { %1056 = vmatpush.bf16.msrb.mxu1 %v7306_v28  ;;  %v4966_v28 = vpop.f32.mrf.mxu2 }
  0xc2   :  { %1069 = vmatpush.bf16.msrb.mxu2 %v7307_v9  ;;  %1082 = vmatpush.bf16.msrb.mxu3 %v7308_v24  ;;  %7315 = vst [vmem:[#allocation23_spill] sm:$0xff] %v4966_v28  ;;  %v7316_v9 = vld [vmem:[#allocation48_spill] sm:$0xff]  ;;  %v7317_v24 = vld [vmem:[#allocation49_spill] sm:$0xff]  ;;  %v827_v28 = vpop.f32.mrf.mxu3 }
  0xc4   :  { %1044 = vmatpush.bf16.msrb.mxu0 %v7310_v30 }
  0xc5   :  { %1057 = vmatpush.bf16.msrb.mxu1 %v7311_v19  ;;  %v7324_v19 = vld [vmem:[#allocation57_spill] sm:$0xff] }
  0xc6   :  { %1070 = vmatpush.bf16.msrb.mxu2 %v7312_v53  ;;  %1083 = vmatpush.bf16.msrb.mxu3 %v4784_v41  ;;  %v7323_v53 = vld [vmem:[#allocation56_spill] sm:$0xff] }
  0xc7   :  { %1045 = vmatmul.bf16.vlgmr.msrb.gmra.mxu0 %v4884_v10 }
  0xc8   :  { %1089 = vmatpush.bf16.msra.mxu0 %v7313_v1  ;;  %1058 = vmatmul.bf16.vlgmr.msrb.gmra.mxu1 %v4884_v10 }
  0xc9   :  { %1102 = vmatpush.bf16.msra.mxu1 %v7316_v9  ;;  %1071 = vmatmul.bf16.vlgmr.msrb.gmra.mxu2 %v4884_v10  ;;  %v801_v9 = vpop.f32.mrf.mxu1  ;;  %v814_v41 = vpop.f32.mrf.mxu2 }
  0xca   :  { %1115 = vmatpush.bf16.msra.mxu2 %v7317_v24  ;;  %1128 = vmatpush.bf16.msra.mxu3 %v4795_v61  ;;  %v4979_v24 = vpop.f32.mrf.mxu0  ;;  %v7322_v61 = vld [vmem:[#allocation55_spill] sm:$0xff]  ;;  %v7330_v9 = vld [vmem:[#allocation64_spill] sm:$0xff]  ;;  %v7331_v41 = vld [vmem:[#allocation65_spill] sm:$0xff] }
  0xcb   :  { %1084 = vmatmul.bf16.vlgmr.msrb.gmra.mxu3 %v4884_v10  ;;  %7321 = vst [vmem:[#allocation27_spill] sm:$0xff] %v4979_v24 }
  0xcc   :  { %1090 = vmatpush.bf16.msra.mxu0 %v7318_v39  ;;  %v7325_v39 = vld [vmem:[#allocation59_spill] sm:$0xff]  ;;  %v4989_v28 = vpop.f32.mrf.mxu3 }
  0xcd   :  { %1103 = vmatpush.bf16.msra.mxu1 %v7319_v32  ;;  %v7326_v32 = vld [vmem:[#allocation60_spill] sm:$0xff]  ;;  %7328 = vst [vmem:[#allocation31_spill] sm:$0xff] %v4989_v28 }
  0xce   :  { %1116 = vmatpush.bf16.msra.mxu2 %v7320_v14  ;;  %1129 = vmatpush.bf16.msra.mxu3 %v4806_v60  ;;  %v7327_v14 = vld [vmem:[#allocation61_spill] sm:$0xff]  ;;  %v7329_v60 = vld [vmem:[#allocation63_spill] sm:$0xff] }
  0xd0   :  { %1091 = vmatpush.bf16.msra.mxu0 %v7322_v61 }
  0xd1   :  { %1104 = vmatpush.bf16.msra.mxu1 %v7323_v53 }
  0xd2   :  { %1117 = vmatpush.bf16.msra.mxu2 %v7324_v19  ;;  %1130 = vmatpush.bf16.msra.mxu3 %v4819_v55  ;;  %v840_v24 = vpop.f32.mrf.mxu0  ;;  %v7332_v55 = vld [vmem:[#allocation67_spill] sm:$0xff]  ;;  %v4996_v19 = vpop.f32.mrf.mxu1 }
  0xd3   :  { %7333 = vst [vmem:[#allocation39_spill] sm:$0xff] %v4996_v19  ;;  %v5002_v24 = vpop.f32.mrf.mxu2 }
  0xd4   :  { %1092 = vmatpush.bf16.msra.mxu0 %v7325_v39  ;;  %v879_v28 = vpop.f32.mrf.mxu3  ;;  %7336 = vst [vmem:[#allocation43_spill] sm:$0xff] %v5002_v24  ;;  %v7339_v24 = vld [vmem:[#allocation5_spill] sm:$0xff] }
  0xd5   :  { %1105 = vmatpush.bf16.msra.mxu1 %v7326_v32  ;;  %v7334_v32 = vld [vmem:[#allocation68_spill] sm:$0xff]  ;;  %v7338_v28 = vld [vmem:[#allocation77_spill] sm:$0xff] }
  0xd6   :  { %1118 = vmatpush.bf16.msra.mxu2 %v7327_v14  ;;  %1131 = vmatpush.bf16.msra.mxu3 %v4830_v47  ;;  %v7335_v14 = vld [vmem:[#allocation69_spill] sm:$0xff] }
  0xd8   :  { %1093 = vmatpush.bf16.msra.mxu0 %v7329_v60 }
  0xd9   :  { %1106 = vmatpush.bf16.msra.mxu1 %v7330_v9  ;;  %v7337_v9 = vld [vmem:[#allocation71_spill] sm:$0xff] }
  0xda   :  { %1119 = vmatpush.bf16.msra.mxu2 %v7331_v41  ;;  %1132 = vmatpush.bf16.msra.mxu3 %v4840_v20  ;;  %v853_v19 = vpop.f32.mrf.mxu1 }
  0xdb   :  { %v7340_v19 = vld [vmem:[#allocation79_spill] sm:$0xff] }
  0xdc   :  { %1094 = vmatpush.bf16.msra.mxu0 %v7332_v55 }
  0xdd   :  { %1107 = vmatpush.bf16.msra.mxu1 %v7334_v32 }
  0xde   :  { %1120 = vmatpush.bf16.msra.mxu2 %v7335_v14  ;;  %1133 = vmatpush.bf16.msra.mxu3 %v4850_v52  ;;  %v7352_v52 = vld [vmem:[#allocation87_spill] sm:$0xff] }
  0xe0   :  { %1095 = vmatpush.bf16.msra.mxu0 %v4776_v48 }
  0xe1   :  { %1108 = vmatpush.bf16.msra.mxu1 %v7337_v9  ;;  %v7349_v9 = vld [vmem:[#allocation85_spill] sm:$0xff] }
  0xe2   :  { %1121 = vmatpush.bf16.msra.mxu2 %v4781_v2  ;;  %1134 = vmatpush.bf16.msra.mxu3 %v4860_v22  ;;  %v866_v22 = vpop.f32.mrf.mxu2  ;;  %v7348_v2 = vld [vmem:[#allocation84_spill] sm:$0xff] }
  0xe3   :  { %v7346_v22 = vld [vmem:[#allocation83_spill] sm:$0xff] }
  0xe4   :  { %1096 = vmatpush.bf16.msra.mxu0 %v4788_v31 }
  0xe5   :  { %1109 = vmatpush.bf16.msra.mxu1 %v4790_v42  ;;  %v7347_v42 = vld [vmem:[#allocation7_spill] sm:$0xff] }
  0xe6   :  { %1122 = vmatpush.bf16.msra.mxu2 %v4793_v11  ;;  %1135 = vmatpush.bf16.msra.mxu3 %v4870_v51  ;;  %v7341_v51 = vld [vmem:[#allocation80_spill] sm:$0xff]  ;;  %v7342_v11 = vld [vmem:[#allocation6_spill] sm:$0xff] }
  0xe7   :  { %1097 = vmatmul.bf16.vlgmr.msra.gmra.mxu0 %v4884_v10 }
  0xe8   :  { %1141 = vmatpush.bf16.msrb.mxu0 %v4797_v4  ;;  %1110 = vmatmul.bf16.vlgmr.msra.gmra.mxu1 %v4884_v10 }
  0xe9   :  { %1154 = vmatpush.bf16.msrb.mxu1 %v7338_v28  ;;  %1123 = vmatmul.bf16.vlgmr.msra.gmra.mxu2 %v4884_v10  ;;  %v5026_v28 = vpop.f32.mrf.mxu1 }
  0xea   :  { %1168 = vmatpush.bf16.msrb.mxu2 %v7339_v24  ;;  %1181 = vmatpush.bf16.msrb.mxu3 %v4490_v7  ;;  %v5023_v24 = vpop.f32.mrf.mxu0  ;;  %v7344_v7 = vld [vmem:[#allocation82_spill] sm:$0xff]  ;;  %7345 = vst [vmem:[#allocation55_spill] sm:$0xff] %v5026_v28 }
  0xeb   :  { %1136 = vmatmul.bf16.vlgmr.msra.gmra.mxu3 %v4884_v10  ;;  %7343 = vst [vmem:[#allocation47_spill] sm:$0xff] %v5023_v24  ;;  %v7351_v28 = vld [vmem:[#allocation86_spill] sm:$0xff] }
  0xec   :  { %1142 = vmatpush.bf16.msrb.mxu0 %v7340_v19 }
  0xed   :  { %1155 = vmatpush.bf16.msrb.mxu1 %v7341_v51  ;;  %v7350_v51 = vld [vmem:[#allocation8_spill] sm:$0xff] }
  0xee   :  { %1169 = vmatpush.bf16.msrb.mxu2 %v7342_v11  ;;  %1182 = vmatpush.bf16.msrb.mxu3 %v4501_v17  ;;  %v5035_v17 = vpop.f32.mrf.mxu3  ;;  %v5037_v24 = vpop.f32.mrf.mxu2 }
  0xf0   :  { %1143 = vmatpush.bf16.msrb.mxu0 %v7344_v7 }
  0xf1   :  { %1156 = vmatpush.bf16.msrb.mxu1 %v7346_v22  ;;  %v905_v22 = vpop.f32.mrf.mxu1 }
  0xf2   :  { %1170 = vmatpush.bf16.msrb.mxu2 %v7347_v42  ;;  %1183 = vmatpush.bf16.msrb.mxu3 %v4513_v33  ;;  %v892_v11 = vpop.f32.mrf.mxu0  ;;  %v7353_v42 = vld [vmem:[#allocation9_spill] sm:$0xff]  ;;  %v7355_v22 = vld [vmem:[#allocation26_spill] sm:$0xff] }
  0xf4   :  { %1144 = vmatpush.bf16.msrb.mxu0 %v7348_v2 }
  0xf5   :  { %1157 = vmatpush.bf16.msrb.mxu1 %v7349_v9 }
  0xf6   :  { %1171 = vmatpush.bf16.msrb.mxu2 %v7350_v51  ;;  %1184 = vmatpush.bf16.msrb.mxu3 %v4525_v45  ;;  %v931_v33 = vpop.f32.mrf.mxu3  ;;  %v918_v45 = vpop.f32.mrf.mxu2  ;;  %v7354_v51 = vld [vmem:[#allocation29_spill] sm:$0xff] }
  0xf7   :  { %v38_v11 = vsub.f32 %v7355_v22, %v7354_v51  ;;  %v7377_v33 = vld [vmem:[#allocation30_spill] sm:$0xff] }
  0xf8   :  { %1145 = vmatpush.bf16.msrb.mxu0 %v7351_v28  ;;  %v7378_v45 = vld [vmem:[#allocation58_spill] sm:$0xff] }
  0xf9   :  { %1158 = vmatpush.bf16.msrb.mxu1 %v7352_v52 }
  0xfa   :  { %1172 = vmatpush.bf16.msrb.mxu2 %v7353_v42  ;;  %1185 = vmatpush.bf16.msrb.mxu3 %v4537_v57  ;;  %v5056_v57 = vpack.c.bf16 %v38_v11, %v38_v11  ;;  %v7376_v42 = vld [vmem:[#allocation28_spill] sm:$0xff] }
  0xfc   :  { %1146 = vmatpush.bf16.msrb.mxu0 %v4854_v16 }
  0xfd   :  { %1159 = vmatpush.bf16.msrb.mxu1 %v4856_v37 }
  0xfe   :  { %1173 = vmatpush.bf16.msrb.mxu2 %v4545_v5  ;;  %1186 = vmatpush.bf16.msrb.mxu3 %v4549_v6  ;;  %v7358_v5 = vld [vmem:[#allocation34_spill] sm:$0xff]  ;;  %v7359_v6 = vld [vmem:[#allocation35_spill] sm:$0xff] }
 0x100   :  { %1147 = vmatpush.bf16.msrb.mxu0 %v4864_v29 }
 0x101   :  { %1160 = vmatpush.bf16.msrb.mxu1 %v4866_v36 }
 0x102   :  { %1174 = vmatpush.bf16.msrb.mxu2 %v4557_v23  ;;  %1187 = vmatpush.bf16.msrb.mxu3 %v4561_v27 }
 0x104   :  { %1148 = vmatpush.bf16.msrb.mxu0 %v4874_v44 }
 0x105   :  { %1161 = vmatpush.bf16.msrb.mxu1 %v4876_v26 }
 0x106   :  { %1175 = vmatpush.bf16.msrb.mxu2 %v4569_v43  ;;  %1188 = vmatpush.bf16.msrb.mxu3 %v7277_v56  ;;  %v7360_v43 = vld [vmem:[#allocation12_spill] sm:$0xff]  ;;  %v7370_v56 = vld [vmem:[#allocation22_spill] sm:$0xff] }
 0x107   :  { %1149 = vmatmul.bf16.vlgmr.msrb.gmra.mxu0 %v4884_v10 }
 0x108   :  { %1194 = vmatpush.bf16.msra.mxu0 %v4492_v8  ;;  %1162 = vmatmul.bf16.vlgmr.msrb.gmra.mxu1 %v4884_v10  ;;  %v5071_v8 = vpop.f32.mrf.mxu0  ;;  %v7368_v10 = vld [vmem:[#allocation46_spill] sm:$0xff] }
 0x109   :  { %1207 = vmatpush.bf16.msra.mxu1 %v4495_v12  ;;  %1176 = vmatmul.bf16.vlgmr.msrb.gmra.mxu2 %v5056_v57  ;;  %v5074_v12 = vpop.f32.mrf.mxu1 }
 0x10a   :  { %1220 = vmatpush.bf16.msra.mxu2 %v4580_v59  ;;  %1233 = vmatpush.bf16.msra.mxu3 %v7280_v13  ;;  %v7362_v59 = vld [vmem:[#allocation38_spill] sm:$0xff]  ;;  %v7372_v13 = vld [vmem:[#allocation51_spill] sm:$0xff] }
 0x10b   :  { %1189 = vmatmul.bf16.vlgmr.msrb.gmra.mxu3 %v5056_v57 }
 0x10c   :  { %1195 = vmatpush.bf16.msra.mxu0 %v4504_v21  ;;  %v5083_v21 = vpop.f32.mrf.mxu3 }
 0x10d   :  { %1208 = vmatpush.bf16.msra.mxu1 %v4506_v25 }
 0x10e   :  { %1221 = vmatpush.bf16.msra.mxu2 %v4593_v18  ;;  %1234 = vmatpush.bf16.msra.mxu3 %v7284_v63  ;;  %v5085_v25 = vpop.f32.mrf.mxu2  ;;  %v7364_v18 = vld [vmem:[#allocation16_spill] sm:$0xff]  ;;  %v7374_v63 = vld [vmem:[#allocation25_spill] sm:$0xff] }
 0x110   :  { %1196 = vmatpush.bf16.msra.mxu0 %v4515_v34  ;;  %v944_v34 = vpop.f32.mrf.mxu0 }
 0x111   :  { %1209 = vmatpush.bf16.msra.mxu1 %v4518_v38  ;;  %v957_v38 = vpop.f32.mrf.mxu1  ;;  %v7379_v34 = vld [vmem:[#allocation32_spill] sm:$0xff] }
 0x112   :  { %1222 = vmatpush.bf16.msra.mxu2 %v4605_v40  ;;  %1235 = vmatpush.bf16.msra.mxu3 %v7288_v3  ;;  %v7365_v40 = vld [vmem:[#allocation42_spill] sm:$0xff] }
 0x114   :  { %1197 = vmatpush.bf16.msra.mxu0 %v4527_v46  ;;  %v7356_v46 = vld [vmem:[#allocation10_spill] sm:$0xff]  ;;  %v983_v23 = vpop.f32.mrf.mxu3 }
 0x115   :  { %1210 = vmatpush.bf16.msra.mxu1 %v4530_v50  ;;  %v7357_v50 = vld [vmem:[#allocation11_spill] sm:$0xff] }
 0x116   :  { %1223 = vmatpush.bf16.msra.mxu2 %v4625_v15  ;;  %1236 = vmatpush.bf16.msra.mxu3 %v7292_v54  ;;  %v970_v27 = vpop.f32.mrf.mxu2  ;;  %v7366_v15 = vld [vmem:[#allocation18_spill] sm:$0xff] }
 0x117   :  { %v7371_v54 = vld [vmem:[#allocation50_spill] sm:$0xff]  ;;  %v7385_v27 = vld [vmem:[#allocation40_spill] sm:$0xff] }
 0x118   :  { %1198 = vmatpush.bf16.msra.mxu0 %v4539_v58  ;;  %v7361_v58 = vld [vmem:[#allocation13_spill] sm:$0xff] }
 0x119   :  { %1211 = vmatpush.bf16.msra.mxu1 %v4542_v62  ;;  %v7363_v62 = vld [vmem:[#allocation15_spill] sm:$0xff] }
 0x11a   :  { %1224 = vmatpush.bf16.msra.mxu2 %v4644_v0  ;;  %1237 = vmatpush.bf16.msra.mxu3 %v7296_v49  ;;  %v7367_v0 = vld [vmem:[#allocation19_spill] sm:$0xff]  ;;  %v7375_v49 = vld [vmem:[#allocation54_spill] sm:$0xff] }
 0x11c   :  { %1199 = vmatpush.bf16.msra.mxu0 %v7356_v46  ;;  %v7380_v46 = vld [vmem:[#allocation33_spill] sm:$0xff] }
 0x11d   :  { %1212 = vmatpush.bf16.msra.mxu1 %v7357_v50  ;;  %v7381_v50 = vld [vmem:[#allocation62_spill] sm:$0xff] }
 0x11e   :  { %1225 = vmatpush.bf16.msra.mxu2 %v7358_v5  ;;  %1238 = vmatpush.bf16.msra.mxu3 %v7359_v6  ;;  %v7383_v5 = vld [vmem:[#allocation37_spill] sm:$0xff]  ;;  %v7384_v6 = vld [vmem:[#allocation66_spill] sm:$0xff] }
 0x120   :  { %1200 = vmatpush.bf16.msra.mxu0 %v7360_v43  ;;  %v7386_v43 = vld [vmem:[#allocation41_spill] sm:$0xff] }
 0x121   :  { %1213 = vmatpush.bf16.msra.mxu1 %v7361_v58  ;;  %v7387_v58 = vld [vmem:[#allocation70_spill] sm:$0xff] }
 0x122   :  { %1226 = vmatpush.bf16.msra.mxu2 %v7362_v59  ;;  %1239 = vmatpush.bf16.msra.mxu3 %v7305_v35  ;;  %v7369_v35 = vld [vmem:[#allocation21_spill] sm:$0xff]  ;;  %v7388_v59 = vld [vmem:[#allocation44_spill] sm:$0xff] }
 0x124   :  { %1201 = vmatpush.bf16.msra.mxu0 %v7363_v62  ;;  %v5115_v3 = vpop.f32.mrf.mxu0  ;;  %v7390_v62 = vld [vmem:[#allocation73_spill] sm:$0xff] }
 0x125   :  { %1214 = vmatpush.bf16.msra.mxu1 %v7364_v18  ;;  %v7391_v18 = vld [vmem:[#allocation48_spill] sm:$0xff] }
 0x126   :  { %1227 = vmatpush.bf16.msra.mxu2 %v7365_v40  ;;  %1240 = vmatpush.bf16.msra.mxu3 %v7310_v30  ;;  %v7373_v30 = vld [vmem:[#allocation24_spill] sm:$0xff] }
 0x127   :  { %1202 = vmatmul.bf16.vlgmr.msra.gmra.mxu0 %v5056_v57  ;;  %v7393_v40 = vld [vmem:[#allocation76_spill] sm:$0xff] }
 0x128   :  { %1246 = vmatpush.bf16.msrb.mxu0 %v7366_v15  ;;  %1215 = vmatmul.bf16.vlgmr.msra.gmra.mxu1 %v5056_v57  ;;  %v7395_v15 = vld [vmem:[#allocation53_spill] sm:$0xff] }
 0x129   :  { %1259 = vmatpush.bf16.msrb.mxu1 %v7367_v0  ;;  %1228 = vmatmul.bf16.vlgmr.msra.gmra.mxu2 %v5056_v57 }
 0x12a   :  { %1272 = vmatpush.bf16.msrb.mxu2 %v7368_v10  ;;  %1285 = vmatpush.bf16.msrb.mxu3 %v7313_v1  ;;  %v5118_v1 = vpop.f32.mrf.mxu1  ;;  %v7397_v10 = vld [vmem:[#allocation57_spill] sm:$0xff] }
 0x12b   :  { %1241 = vmatmul.bf16.vlgmr.msra.gmra.mxu3 %v5056_v57 }
 0x12c   :  { %1247 = vmatpush.bf16.msrb.mxu0 %v7369_v35  ;;  %v5127_v51 = vpop.f32.mrf.mxu2  ;;  %v996_v11 = vpop.f32.mrf.mxu0  ;;  %v7398_v35 = vld [vmem:[#allocation81_spill] sm:$0xff] }
 0x12d   :  { %1260 = vmatpush.bf16.msrb.mxu1 %v7370_v56  ;;  %v7399_v56 = vld [vmem:[#allocation60_spill] sm:$0xff] }
 0x12e   :  { %1273 = vmatpush.bf16.msrb.mxu2 %v7371_v54  ;;  %1286 = vmatpush.bf16.msrb.mxu3 %v7372_v13  ;;  %v5129_v22 = vpop.f32.mrf.mxu3  ;;  %v7400_v54 = vld [vmem:[#allocation61_spill] sm:$0xff] }
 0x130   :  { %1248 = vmatpush.bf16.msrb.mxu0 %v7373_v30  ;;  %v7401_v30 = vld [vmem:[#allocation64_spill] sm:$0xff] }
 0x131   :  { %1261 = vmatpush.bf16.msrb.mxu1 %v7374_v63 }
 0x132   :  { %1274 = vmatpush.bf16.msrb.mxu2 %v7375_v49  ;;  %1287 = vmatpush.bf16.msrb.mxu3 %v7322_v61  ;;  %v1009_v38 = vpop.f32.mrf.mxu1  ;;  %v7382_v61 = vld [vmem:[#allocation36_spill] sm:$0xff]  ;;  %v7403_v49 = vld [vmem:[#allocation71_spill] sm:$0xff] }
 0x134   :  { %1249 = vmatpush.bf16.msrb.mxu0 %v7376_v42  ;;  %v7404_v42 = vld [vmem:[#allocation72_spill] sm:$0xff] }
 0x135   :  { %1262 = vmatpush.bf16.msrb.mxu1 %v7377_v33  ;;  %v7405_v33 = vld [vmem:[#allocation89_spill] sm:$0xff] }
 0x136   :  { %1275 = vmatpush.bf16.msrb.mxu2 %v7378_v45  ;;  %1288 = vmatpush.bf16.msrb.mxu3 %v7325_v39  ;;  %v1022_v39 = vpop.f32.mrf.mxu2  ;;  %v1035_v23 = vpop.f32.mrf.mxu3 }
 0x137   :  { %v7413_v39 = vld [vmem:[#allocation20_spill] sm:$0xff] }
 0x138   :  { %1250 = vmatpush.bf16.msrb.mxu0 %v7379_v34 }
 0x139   :  { %1263 = vmatpush.bf16.msrb.mxu1 %v7380_v46 }
 0x13a   :  { %1276 = vmatpush.bf16.msrb.mxu2 %v7381_v50  ;;  %1289 = vmatpush.bf16.msrb.mxu3 %v7329_v60  ;;  %v7389_v60 = vld [vmem:[#allocation45_spill] sm:$0xff] }
 0x13c   :  { %1251 = vmatpush.bf16.msrb.mxu0 %v7382_v61 }
 0x13d   :  { %1264 = vmatpush.bf16.msrb.mxu1 %v7383_v5  ;;  %v5219_v5 = vld [vmem:[%s7025_s2] sm:$0xff] }
 0x13e   :  { %1277 = vmatpush.bf16.msrb.mxu2 %v7384_v6  ;;  %1290 = vmatpush.bf16.msrb.mxu3 %v7332_v55  ;;  %v7392_v55 = vld [vmem:[#allocation49_spill] sm:$0xff]  ;;  %v1382_v6 = vperm.slane %v5219_v5, 0 }
 0x140   :  { %1252 = vmatpush.bf16.msrb.mxu0 %v7385_v27 }
 0x141   :  { %1265 = vmatpush.bf16.msrb.mxu1 %v7386_v43 }
 0x142   :  { %1278 = vmatpush.bf16.msrb.mxu2 %v7387_v58  ;;  %1291 = vmatpush.bf16.msrb.mxu3 %v4776_v48  ;;  %v7394_v48 = vld [vmem:[#allocation52_spill] sm:$0xff] }
 0x144   :  { %1253 = vmatpush.bf16.msrb.mxu0 %v7388_v59  ;;  %v5159_v0 = vpop.f32.mrf.mxu0 }
 0x145   :  { %1266 = vmatpush.bf16.msrb.mxu1 %v7389_v60 }
 0x146   :  { %1279 = vmatpush.bf16.msrb.mxu2 %v7390_v62  ;;  %1292 = vmatpush.bf16.msrb.mxu3 %v4788_v31  ;;  %v7396_v31 = vld [vmem:[#allocation78_spill] sm:$0xff] }
 0x147   :  { %1254 = vmatmul.bf16.vlgmr.msrb.gmra.mxu0 %v5056_v57 }
 0x148   :  { %1298 = vmatpush.bf16.msra.mxu0 %v7391_v18  ;;  %1267 = vmatmul.bf16.vlgmr.msrb.gmra.mxu1 %v5056_v57 }
 0x149   :  { %1311 = vmatpush.bf16.msra.mxu1 %v7392_v55  ;;  %1280 = vmatmul.bf16.vlgmr.msrb.gmra.mxu2 %v5056_v57 }
 0x14a   :  { %1324 = vmatpush.bf16.msra.mxu2 %v7393_v40  ;;  %1337 = vmatpush.bf16.msra.mxu3 %v4797_v4  ;;  %v5162_v4 = vpop.f32.mrf.mxu1 }
 0x14b   :  { %1293 = vmatmul.bf16.vlgmr.msrb.gmra.mxu3 %v5056_v57 }
 0x14c   :  { %1299 = vmatpush.bf16.msra.mxu0 %v7394_v48 }
 0x14d   :  { %1312 = vmatpush.bf16.msra.mxu1 %v7395_v15 }
 0x14e   :  { %1325 = vmatpush.bf16.msra.mxu2 %v7396_v31  ;;  %1338 = vmatpush.bf16.msra.mxu3 %v7340_v19  ;;  %v5171_v19 = vpop.f32.mrf.mxu2  ;;  %v5173_v13 = vpop.f32.mrf.mxu3 }
 0x150   :  { %1300 = vmatpush.bf16.msra.mxu0 %v7323_v53  ;;  %v1048_v53 = vpop.f32.mrf.mxu0 }
 0x151   :  { %1313 = vmatpush.bf16.msra.mxu1 %v7397_v10 }
 0x152   :  { %1326 = vmatpush.bf16.msra.mxu2 %v7398_v35  ;;  %1339 = vmatpush.bf16.msra.mxu3 %v7344_v7  ;;  %v1061_v63 = vpop.f32.mrf.mxu1 }
 0x154   :  { %1301 = vmatpush.bf16.msra.mxu0 %v7399_v56 }
 0x155   :  { %1314 = vmatpush.bf16.msra.mxu1 %v7400_v54 }
 0x156   :  { %1327 = vmatpush.bf16.msra.mxu2 %v4830_v47  ;;  %1340 = vmatpush.bf16.msra.mxu3 %v7348_v2  ;;  %v7402_v47 = vld [vmem:[#allocation88_spill] sm:$0xff]  ;;  %v1074_v2 = vpop.f32.mrf.mxu2  ;;  %v1087_v7 = vpop.f32.mrf.mxu3 }
 0x158   :  { %1302 = vmatpush.bf16.msra.mxu0 %v7401_v30 }
 0x159   :  { %1315 = vmatpush.bf16.msra.mxu1 %v7331_v41  ;;  %v7407_v41 = vld [vmem:[#allocation75_spill] sm:$0xff] }
 0x15a   :  { %1328 = vmatpush.bf16.msra.mxu2 %v4840_v20  ;;  %1341 = vmatpush.bf16.msra.mxu3 %v7351_v28  ;;  %v7406_v20 = vld [vmem:[#allocation74_spill] sm:$0xff]  ;;  %v7411_v28 = vld [vmem:[#allocation83_spill] sm:$0xff] }
 0x15c   :  { %1303 = vmatpush.bf16.msra.mxu0 %v7334_v32  ;;  %v7408_v32 = vld [vmem:[#allocation90_spill] sm:$0xff] }
 0x15d   :  { %1316 = vmatpush.bf16.msra.mxu1 %v7335_v14  ;;  %v7409_v14 = vld [vmem:[#allocation77_spill] sm:$0xff] }
 0x15e   :  { %1329 = vmatpush.bf16.msra.mxu2 %v7402_v47  ;;  %1342 = vmatpush.bf16.msra.mxu3 %v4854_v16  ;;  %v7410_v16 = vld [vmem:[#allocation80_spill] sm:$0xff]  ;;  %v7414_v47 = vld [vmem:[#allocation23_spill] sm:$0xff] }
 0x15f   :  { %v5241_v2 = vadd.f32 %v5118_v1, %v7414_v47 }
 0x160   :  { %1304 = vmatpush.bf16.msra.mxu0 %v7403_v49 }
 0x161   :  { %1317 = vmatpush.bf16.msra.mxu1 %v7404_v42 }
 0x162   :  { %1330 = vmatpush.bf16.msra.mxu2 %v7405_v33  ;;  %1343 = vmatpush.bf16.msra.mxu3 %v4864_v29 }
 0x164   :  { %1305 = vmatpush.bf16.msra.mxu0 %v7406_v20  ;;  %v5197_v29 = vpop.f32.mrf.mxu0 }
 0x165   :  { %1318 = vmatpush.bf16.msra.mxu1 %v7407_v41  ;;  %v5200_v45 = vpop.f32.mrf.mxu1  ;;  %v7415_v41 = vld [vmem:[#allocation17_spill] sm:$0xff] }
 0x166   :  { %1331 = vmatpush.bf16.msra.mxu2 %v7408_v32  ;;  %1344 = vmatpush.bf16.msra.mxu3 %v4874_v44  ;;  %v5247_v32 = vadd.f32 %v5127_v51, %v7415_v41 }
 0x167   :  { %1306 = vmatmul.bf16.vlgmr.msra.gmra.mxu0 %v5056_v57 }
 0x168   :  { %1350 = vmatpush.bf16.msrb.mxu0 %v7409_v14  ;;  %1319 = vmatmul.bf16.vlgmr.msra.gmra.mxu1 %v5056_v57 }
 0x169   :  { %1332 = vmatmul.bf16.vlgmr.msra.gmra.mxu2 %v5056_v57  ;;  %1345 = vmatmul.bf16.vlgmr.msra.gmra.mxu3 %v5056_v57 }
 0x16c   :  { %1351 = vmatpush.bf16.msrb.mxu0 %v7410_v16  ;;  %v5203_v44 = vpop.f32.mrf.mxu2  ;;  %v1100_v34 = vpop.f32.mrf.mxu0 }
 0x16d   :  { %v1113_v38 = vpop.f32.mrf.mxu1 }
 0x16e   :  { %v5205_v11 = vpop.f32.mrf.mxu3  ;;  %v4458_v38 = vmov 683565275  }
 0x170   :  { %1352 = vmatpush.bf16.msrb.mxu0 %v7411_v28 }
 0x174   :  { %1353 = vmatpush.bf16.msrb.mxu0 %v7349_v9  ;;  %v1126_v46 = vpop.f32.mrf.mxu2 }
 0x176   :  { %v1139_v50 = vpop.f32.mrf.mxu3 }
 0x177   :  { %v7176_v50 = vmov 2475754826  }
 0x178   :  { %1354 = vmatpush.bf16.msrb.mxu0 %v7352_v52  ;;  %v7412_v52 = vld [vmem:[#allocation14_spill] sm:$0xff] }
 0x17c   :  { %1355 = vmatpush.bf16.msrb.mxu0 %v4856_v37  ;;  %v982_v37 = vadd.f32 %v5083_v21, %v7412_v52 }
 0x180   :  { %1356 = vmatpush.bf16.msrb.mxu0 %v4866_v36  ;;  %v995_v36 = vadd.f32 %v5115_v3, %v7413_v39 }
 0x184   :  { %1357 = vmatpush.bf16.msrb.mxu0 %v4876_v26  ;;  %v5212_v61 = vpop.f32.mrf.mxu0 }
 0x185   :  { %v5214_v9 = vpop.f32.mrf.mxu1 }
 0x187   :  { %1358 = vmatmul.bf16.vlgmr.msrb.gmra.mxu0 %v5056_v57  ;;  %v1383_v57 = vperm.slane %v5219_v5, 1 }
 0x18c   :  { %v1177_v26 = vpop.f32.mrf.mxu2  ;;  %v1152_v43 = vpop.f32.mrf.mxu0 }
 0x18d   :  { %v1363_v23 = vadd.f32 %v1177_v26, %v982_v37  ;;  %v1165_v59 = vpop.f32.mrf.mxu1  ;;  %v7189_v26 = vmov 2102212464  }
 0x18e   :  { %v1190_v27 = vpop.f32.mrf.mxu3  ;;  %v7182_v59 = vmov 1326507024  }
 0x18f   :  { %v1364_v58 = vadd.f32 %v1190_v27, %v995_v36  ;;  %v5227_v60 = vadd.f32 %v1382_v6, %v1363_v23  ;;  %v7179_v6 = vmov 2131351028   ;;  %v7184_v27 = vmov 920167782  }
 0x191   :  { %v5229_v62 = vadd.f32 %v1383_v57, %v1364_v58  ;;  %v7178_v18 = vand.u32 2147483647, %v5227_v60  ;;  %v1430_v21 = vand.u32 2139095040, %v5227_v60 }
 0x193   :  { %v7175_v55 = vand.u32 2147483647, %v5229_v62  ;;  %v1585_v3 = vand.u32 2139095040, %v5229_v62  ;;  %v1431_v40 = vshrl.u32 %v1430_v21, 23  ;;  %v1434_v48 = vand.u32 8388607, %v7178_v18 }
 0x194   :  { %v1179_v31 = vpop.f32.mrf.mxu2 }
 0x195   :  { %v1586_v15 = vshrl.u32 %v1585_v3, 23  ;;  %v4252_v10 = vadd.s32 4294967169, %v1431_v40  ;;  %v1435_v35 = vor.u32 8388608, %v1434_v48  ;;  %v1589_v56 = vand.u32 8388607, %v7175_v55 }
 0x196   :  { %v1192_v54 = vpop.f32.mrf.mxu3  ;;  %v4464_v55 = vmov 0  }
 0x197   :  { %v4255_v53 = vadd.s32 4294967169, %v1586_v15  ;;  %v1437_v30 = vadd.s32 1, %v4252_v10  ;;  %v5243_v7 = vshll.u32 %v1435_v35, 8  ;;  %v1590_v49 = vor.u32 8388608, %v1589_v56 }
 0x199   :  { %v1592_v63 = vadd.s32 1, %v4255_v53  ;;  %vm1438_vm0 = vcmp.gt.s32.totalorder %v1437_v30, 0  ;;  %v5250_v16 = vand.u32 65535, %v5243_v7  ;;  %v5254_v1 = vshll.u32 %v1590_v49, 8 }
 0x19a   :  { %v1439_v42 = vsel %vm1438_vm0, %v1437_v30, 0  ;;  %v1477_v37 = vshrl.u32 %v5243_v7, 16 }
 0x19b   :  { %vm1593_vm1 = vcmp.gt.s32.totalorder %v1592_v63, 0  ;;  %v1441_v33 = vand.u32 31, %v1439_v42  ;;  %v5256_v34 = vshrl.u32 %v1439_v42, 5 }
 0x19c   :  { %v1594_v20 = vsel %vm1593_vm1, %v1592_v63, 0 }
 0x19d   :  { %v1442_v14 = vsub.s32 32, %v1441_v33  ;;  %v5252_v28 = vand.u32 31, %v1594_v20  ;;  %v1444_v46 = vshll.u32 %v4458_v38, %v1441_v33  ;;  %v1447_v52 = vshll.u32 %v7176_v50, %v1441_v33 }
 0x19e   :  { %v1450_v36 = vshll.u32 %v7179_v6, %v1441_v33  ;;  %v1453_v23 = vshll.u32 %v7189_v26, %v1441_v33  ;;  %v1456_v58 = vshll.u32 %v7184_v27, %v1441_v33  ;;  %vm1459_vm2 = vcmp.lt.s32.totalorder %v5256_v34, 1 }
 0x19f   :  { %v1445_v51 = vshrl.u32 %v7176_v50, %v1442_v14  ;;  %v1448_v39 = vshrl.u32 %v7179_v6, %v1442_v14  ;;  %v1451_v57 = vshrl.u32 %v7189_v26, %v1442_v14  ;;  %v1454_v43 = vshrl.u32 %v7184_v27, %v1442_v14 }
 0x1a0   :  { %v1457_v21 = vshrl.u32 %v7182_v59, %v1442_v14  ;;  %v5270_v15 = vsub.s32 32, %v5252_v28  ;;  %vm1460_vm3 = vcmp.lt.s32.totalorder %v5256_v34, 2  ;;  %v1443_v35 = vshrl.u32 %v4458_v38, %v1442_v14 }
 0x1a1   :  { %v1446_v3 = vor.u32 %v1445_v51, %v1444_v46  ;;  %v1449_v40 = vor.u32 %v1448_v39, %v1447_v52  ;;  %v1452_v48 = vor.u32 %v1451_v57, %v1450_v36  ;;  %v1455_v31 = vor.u32 %v1454_v43, %v1453_v23 }
 0x1a2   :  { %v1458_v10 = vor.u32 %v1457_v21, %v1456_v58  ;;  %vm1462_vm4 = vcmp.lt.s32.totalorder %v5256_v34, 4  ;;  %vm1461_vm5 = vcmp.lt.s32.totalorder %v5256_v34, 3  ;;  %v1599_v47 = vshll.u32 %v4458_v38, %v5252_v28 }
 0x1a3   :  { %v1467_v56 = vsel %vm1459_vm2, %v1446_v3, %v1449_v40  ;;  %v1471_v54 = vsel %vm1459_vm2, %v1449_v40, %v1452_v48  ;;  %v1468_v30 = vsel %vm1462_vm4, %v1455_v31, 920167782  ;;  %v1464_v49 = vsel %vm1462_vm4, %v1452_v48, 2102212464 }
 0x1a4   :  { %v5280_v53 = vpop.f32.mrf.mxu0  ;;  %v1472_v63 = vsel %vm1462_vm4, %v1458_v10, 1326507024  ;;  %v1469_v42 = vsel %vm1461_vm5, %v1452_v48, %v1468_v30  ;;  %v1600_v41 = vshrl.u32 %v7176_v50, %v5270_v15  ;;  %v1602_v52 = vshll.u32 %v7176_v50, %v5252_v28 }
 0x1a5   :  { %v1473_v33 = vsel %vm1461_vm5, %v1455_v31, %v1472_v63  ;;  %v1470_v14 = vsel %vm1460_vm3, %v1467_v56, %v1469_v42  ;;  %v1603_v51 = vshrl.u32 %v7179_v6, %v5270_v15  ;;  %v1463_v43 = vsel %vm1459_vm2, %v1443_v35, %v1446_v3 }
 0x1a6   :  { %v1474_v46 = vsel %vm1460_vm3, %v1471_v54, %v1473_v33  ;;  %v1500_v57 = vand.u32 65535, %v1470_v14  ;;  %v1501_v23 = vshrl.u32 %v1470_v14, 16  ;;  %v1465_v58 = vsel %vm1461_vm5, %v1449_v40, %v1464_v49 }
 0x1a7   :  { %v1478_v39 = vand.u32 65535, %v1474_v46  ;;  %v1479_v36 = vshrl.u32 %v1474_v46, 16  ;;  %v5303_v21 = vshrl.u32 %v1594_v20, 5  ;;  %v5305_v48 = vor.u32 %v1600_v41, %v1599_v47 }
 0x1a8   :  { %v5308_v56 = vor.u32 %v1603_v51, %v1602_v52  ;;  %v1606_v54 = vshrl.u32 %v7189_v26, %v5270_v15  ;;  %v1503_v63 = vmul.u32 %v1501_v23, %v5250_v16  ;;  %v1504_v3 = vmul.u32 %v1500_v57, %v1477_v37 }
 0x1a9   :  { %v1481_v31 = vmul.u32 %v1479_v36, %v5250_v16  ;;  %v1482_v10 = vmul.u32 %v1478_v39, %v1477_v37  ;;  %v1480_v30 = vmul.u32 %v1478_v39, %v5250_v16  ;;  %v1605_v40 = vshll.u32 %v7179_v6, %v5252_v28  ;;  %v5320_v6 = vpop.f32.mrf.mxu1 }
 0x1aa   :  { %v1483_v20 = vmul.u32 %v1479_v36, %v1477_v37  ;;  %v1502_v47 = vmul.u32 %v1500_v57, %v5250_v16  ;;  %v1505_v49 = vmul.u32 %v1501_v23, %v1477_v37  ;;  %v1506_v46 = vshll.u32 %v1503_v63, 16 }
 0x1ab   :  { %v1484_v35 = vshll.u32 %v1481_v31, 16  ;;  %v1485_v33 = vshrl.u32 %v1481_v31, 16  ;;  %v1486_v41 = vshll.u32 %v1482_v10, 16  ;;  %v1487_v14 = vshrl.u32 %v1482_v10, 16 }
 0x1ac   :  { %v1205_v42 = vpop.f32.mrf.mxu0  ;;  %v1508_v51 = vshll.u32 %v1504_v3, 16  ;;  %v1607_v39 = vor.u32 %v1606_v54, %v1605_v40  ;;  %vm1510_vm7 = vc.u32 %v1502_v47, %v1506_v46  ;;  %v1512_v18 = vadd.s32 %v1506_v46, %v1502_v47 }
 0x1ad   :  { %vm1488_vm6 = vc.u32 %v1480_v30, %v1484_v35  ;;  %v1490_v52 = vadd.s32 %v1484_v35, %v1480_v30  ;;  %v1609_v36 = vshrl.u32 %v7184_v27, %v5270_v15  ;;  %v1511_v37 = vsel %vm1510_vm7, 1, %v4464_v55 }
 0x1ae   :  { %v1489_v50 = vsel %vm1488_vm6, 1, %v4464_v55  ;;  %v1608_v57 = vshll.u32 %v7189_v26, %v5252_v28  ;;  %v1513_v31 = vadd.s32 %v1511_v37, %v1505_v49  ;;  %vm1514_vm9 = vc.u32 %v1512_v18, %v1508_v51 }
 0x1af   :  { %v1491_v16 = vadd.s32 %v1489_v50, %v1483_v20  ;;  %vm1492_vm8 = vc.u32 %v1490_v52, %v1486_v41  ;;  %v1611_v10 = vshll.u32 %v7184_v27, %v5252_v28  ;;  %v1515_v30 = vsel %vm1514_vm9, 1, %v4464_v55 }
 0x1b0   :  { %v1493_v23 = vsel %vm1492_vm8, 1, %v4464_v55  ;;  %v1610_v40 = vor.u32 %v1609_v36, %v1608_v57  ;;  %v1612_v50 = vshrl.u32 %v7182_v59, %v5270_v15  ;;  %v1507_v20 = vshrl.u32 %v1503_v63, 16 }
 0x1b1   :  { %v1495_v54 = vadd.s32 %v1493_v23, %v1491_v16  ;;  %v1509_v35 = vshrl.u32 %v1504_v3, 16  ;;  %v5331_v47 = vadd.s32 %v1512_v18, %v1508_v51  ;;  %v1517_v42 = vadd.s32 %v1515_v30, %v1513_v31  ;;  %v1218_v16 = vpop.f32.mrf.mxu1 }
 0x1b2   :  { %v1613_v46 = vor.u32 %v1612_v50, %v1611_v10  ;;  %vm1614_vm10 = vcmp.lt.s32.totalorder %v5303_v21, 1  ;;  %vm1617_vm11 = vcmp.lt.s32.totalorder %v5303_v21, 4  ;;  %vm1616_vm12 = vcmp.lt.s32.totalorder %v5303_v21, 3 }
 0x1b3   :  { %v1496_v41 = vadd.s32 %v1495_v54, %v1485_v33  ;;  %v1518_v49 = vadd.s32 %v1517_v42, %v1507_v20  ;;  %v1622_v28 = vsel %vm1614_vm10, %v5305_v48, %v5308_v56  ;;  %v1623_v63 = vsel %vm1617_vm11, %v1610_v40, 920167782 }
 0x1b4   :  { %vm1615_vm13 = vcmp.lt.s32.totalorder %v5303_v21, 2  ;;  %v1624_v3 = vsel %vm1616_vm12, %v1607_v39, %v1623_v63  ;;  %v1626_v33 = vsel %vm1614_vm10, %v5308_v56, %v1607_v39  ;;  %v1466_v52 = vsel %vm1460_vm3, %v1463_v43, %v1465_v58 }
 0x1b5   :  { %v5342_v18 = vadd.s32 %v1496_v41, %v1487_v14  ;;  %v1519_v51 = vadd.s32 %v1518_v49, %v1509_v35  ;;  %v1625_v36 = vsel %vm1615_vm13, %v1622_v28, %v1624_v3  ;;  %v1627_v14 = vsel %vm1617_vm11, %v1613_v46, 1326507024 }
 0x1b6   :  { %v1628_v37 = vsel %vm1616_vm12, %v1610_v40, %v1627_v14  ;;  %v1631_v57 = vand.u32 65535, %v5254_v1  ;;  %v1655_v23 = vand.u32 65535, %v1625_v36  ;;  %v1632_v43 = vshrl.u32 %v5254_v1, 16 }
 0x1b7   :  { %vm1522_vm14 = vc.u32 %v5342_v18, %v5331_v47  ;;  %v1523_v31 = vadd.s32 1, %v1519_v51  ;;  %v1629_v34 = vsel %vm1615_vm13, %v1626_v33, %v1628_v37  ;;  %v1656_v58 = vshrl.u32 %v1625_v36, 16 }
 0x1b8   :  { %v1520_v10 = vmul.u32 %v5243_v7, %v1466_v52  ;;  %v1633_v54 = vand.u32 65535, %v1629_v34  ;;  %v1634_v30 = vshrl.u32 %v1629_v34, 16  ;;  %v1384_v50 = vperm.slane %v5219_v5, 2 }
 0x1b9   :  { %v1524_v20 = vsel %vm1522_vm14, %v1523_v31, %v1519_v51  ;;  %v1598_v40 = vshrl.u32 %v4458_v38, %v5270_v15  ;;  %v1658_v35 = vmul.u32 %v1656_v58, %v1631_v57  ;;  %v1659_v42 = vmul.u32 %v1655_v23, %v1632_v43 }
 0x1ba   :  { %v1525_v41 = vadd.s32 %v1524_v20, %v1520_v10  ;;  %v1619_v46 = vsel %vm1617_vm11, %v1607_v39, 2102212464  ;;  %v1636_v49 = vmul.u32 %v1634_v30, %v1631_v57  ;;  %v1637_v28 = vmul.u32 %v1633_v54, %v1632_v43 }
 0x1bb   :  { %v1657_v63 = vmul.u32 %v1655_v23, %v1631_v57  ;;  %v1660_v3 = vmul.u32 %v1656_v58, %v1632_v43  ;;  %v1661_v33 = vshll.u32 %v1658_v35, 16  ;;  %v1365_v7 = vadd.f32 %v5280_v53, %v5241_v2 }
 0x1bc   :  { %v1526_v52 = vadd.s32 536870912, %v1525_v41  ;;  %v1635_v36 = vmul.u32 %v1633_v54, %v1631_v57  ;;  %v1638_v51 = vmul.u32 %v1634_v30, %v1632_v43  ;;  %v1639_v14 = vshll.u32 %v1636_v49, 16 }
 0x1bd   :  { %v1641_v16 = vshll.u32 %v1637_v28, 16  ;;  %v1663_v15 = vshll.u32 %v1659_v42, 16  ;;  %vm1665_vm15 = vc.u32 %v1657_v63, %v1661_v33  ;;  %v1667_v37 = vadd.s32 %v1661_v33, %v1657_v63 }
 0x1be   :  { %v1527_v31 = vshrl.u32 %v1526_v52, 30  ;;  %vm1643_vm0 = vc.u32 %v1635_v36, %v1639_v14  ;;  %v1645_v34 = vadd.s32 %v1639_v14, %v1635_v36  ;;  %v1666_v39 = vsel %vm1665_vm15, 1, %v4464_v55 }
 0x1bf   :  { %v1618_v23 = vsel %vm1614_vm10, %v1598_v40, %v5305_v48  ;;  %v1644_v58 = vsel %vm1643_vm0, 1, %v4464_v55  ;;  %v1668_v2 = vadd.s32 %v1666_v39, %v1660_v3  ;;  %vm1669_vm1 = vc.u32 %v1667_v37, %v1663_v15 }
 0x1c0   :  { %v1528_v53 = vshll.u32 %v1527_v31, 30  ;;  %v1620_v57 = vsel %vm1616_vm12, %v5308_v56, %v1619_v46  ;;  %v1646_v43 = vadd.s32 %v1644_v58, %v1638_v51  ;;  %vm1647_vm2 = vc.u32 %v1645_v34, %v1641_v16 }
 0x1c1   :  { %v1648_v10 = vsel %vm1647_vm2, 1, %v4464_v55  ;;  %v1670_v54 = vsel %vm1669_vm1, 1, %v4464_v55  ;;  %v5382_v30 = vadd.f32 %v1384_v50, %v1365_v7  ;;  %v5386_v48 = vadd.f32 %v5320_v6, %v5247_v32 }
 0x1c2   :  { %v1529_v20 = vsub.s32 %v1525_v41, %v1528_v53  ;;  %v1640_v40 = vshrl.u32 %v1636_v49, 16  ;;  %v1650_v63 = vadd.s32 %v1648_v10, %v1646_v43  ;;  %v1672_v3 = vadd.s32 %v1670_v54, %v1668_v2 }
 0x1c3   :  { %vm1429_vm3 = vcmp.lt.s32.totalorder %v5227_v60, 0  ;;  %v1551_v33 = vsub.s32 4, %v1527_v31  ;;  %v1662_v56 = vshrl.u32 %v1658_v35, 16  ;;  %v1740_v46 = vand.u32 2139095040, %v5382_v30 }
 0x1c4   :  { %vm1530_vm4 = vcmp.lt.s32.totalorder %v1529_v20, 0  ;;  %v1531_v52 = vsub.s32 0, %v1529_v20  ;;  %v1642_v36 = vshrl.u32 %v1637_v28, 16  ;;  %v1651_v51 = vadd.s32 %v1650_v63, %v1640_v40 }
 0x1c5   :  { %v1621_v50 = vsel %vm1615_vm13, %v1618_v23, %v1620_v57  ;;  %v1664_v7 = vshrl.u32 %v1659_v42, 16  ;;  %v1673_v32 = vadd.s32 %v1672_v3, %v1662_v56  ;;  %v1741_v6 = vshrl.u32 %v1740_v46, 23 }
 0x1c6   :  { %v1532_v41 = vsel %vm1530_vm4, %v1531_v52, %v1529_v20  ;;  %v1652_v49 = vadd.s32 %v1651_v51, %v1642_v36  ;;  %v1671_v14 = vadd.s32 %v1667_v37, %v1663_v15  ;;  %v7181_v16 = vand.u32 2147483647, %v5382_v30  ;;  %v7419_v51 = vld [vmem:[#allocation27_spill] sm:$0xff] }
 0x1c7   :  { %v1533_v34 = vclz %v1532_v41  ;;  %v1552_v35 = vsel %vm1429_vm3, %v1551_v33, %v1527_v31  ;;  %v1674_v39 = vadd.s32 %v1673_v32, %v1664_v7  ;;  %v4258_v58 = vadd.s32 4294967169, %v1741_v6 }
 0x1c8   :  { %v7416_v28 = vand.u32 2147483647, %v5227_v60  ;;  %vm1677_vm6 = vc.u32 %v1652_v49, %v1671_v14  ;;  %v1675_v37 = vmul.u32 %v5254_v1, %v1621_v50  ;;  %v1744_v31 = vand.u32 8388607, %v7181_v16 }
 0x1c9   :  { %v4253_v21 = vadd.s32 4294967294, %v1533_v34  ;;  %v1678_v42 = vadd.s32 1, %v1674_v39  ;;  %v1747_v23 = vadd.s32 1, %v4258_v58  ;;  %v1521_v54 = vadd.s32 %v5331_v47, %v5342_v18 }
 0x1ca   :  { %vm5397_vm5 = vcmp.le.f32.partialorder %v7416_v28, 0.7853982  ;;  %v1745_v56 = vor.u32 8388608, %v1744_v31  ;;  %v5410_v50 = vadd.f32 %v5129_v22, %v7419_v51  ;;  %vm1584_vm9 = vcmp.lt.s32.totalorder %v5229_v62, 0 }
 0x1cb   :  { %v1554_v15 = vsel %vm5397_vm5, 0, %v1552_v35  ;;  %vm4254_vm7 = vcmp.lt.s32.totalorder %v4253_v21, 0  ;;  %v1679_v53 = vsel %vm1677_vm6, %v1678_v42, %v1674_v39  ;;  %vm1748_vm8 = vcmp.gt.s32.totalorder %v1747_v23, 0 }
 0x1cc   :  { %v1536_v57 = vsel %vm4254_vm7, 0, %v4253_v21  ;;  %v1680_v43 = vadd.s32 %v1679_v53, %v1675_v37  ;;  %v1749_v10 = vsel %vm1748_vm8, %v1747_v23, 0  ;;  %v1571_v3 = vadd.s32 3, %v1554_v15 }
 0x1cd   :  { %v1537_v40 = vsub.s32 32, %v1536_v57  ;;  %v1541_v63 = vsub.s32 4294967266, %v1536_v57  ;;  %v1751_v46 = vand.u32 31, %v1749_v10  ;;  %v1538_v52 = vshll.u32 %v1529_v20, %v1536_v57 }
 0x1ce   :  { %v1681_v33 = vadd.s32 536870912, %v1680_v43  ;;  %v5412_v34 = vand.u32 3, %v1571_v3  ;;  %v5415_v47 = vadd.s32 %v1671_v14, %v1652_v49  ;;  %v7420_v35 = vmov 2475754826  }
 0x1cf   :  { %v1539_v1 = vshrl.u32 %v1521_v54, %v1537_v40  ;;  %v1542_v36 = vadd.s32 127, %v1541_v63  ;;  %v1752_v32 = vsub.s32 32, %v1751_v46  ;;  %v5418_v20 = vshll.u32 %v1745_v56, 8  ;;  %v7425_v40 = vld [vmem:[#allocation39_spill] sm:$0xff] }
 0x1d0   :  { %v1682_v7 = vshrl.u32 %v1681_v33, 30  ;;  %v1385_v58 = vperm.slane %v5219_v5, 3  ;;  %v5421_v22 = vshrl.u32 %v1749_v10, 5  ;;  %v1754_v21 = vshll.u32 %v4458_v38, %v1751_v46 }
 0x1d1   :  { %v1540_v6 = vor.u32 %v1539_v1, %v1538_v52  ;;  %v1543_v41 = vshll.u32 %v1542_v36, 23  ;;  %v1755_v39 = vshrl.u32 %v7420_v35, %v1752_v32  ;;  %v7421_v42 = vmov 2131351028  }
 0x1d2   :  { %v1683_v18 = vshll.u32 %v1682_v7, 30  ;;  %v1758_v23 = vshrl.u32 %v7421_v42, %v1752_v32  ;;  %v1757_v37 = vshll.u32 %v7420_v35, %v1751_v46  ;;  %v1761_v49 = vshrl.u32 %v7189_v26, %v1752_v32 }
 0x1d3   :  { %v1544_v28 = vor.u32 4788187, %v1543_v41  ;;  %v1764_v14 = vshrl.u32 %v7184_v27, %v1752_v32  ;;  %v1547_v53 = vcvt.s32.f32 %v1540_v6  ;;  %v1760_v57 = vshll.u32 %v7421_v42, %v1751_v46 }
 0x1d4   :  { %v5425_v15 = vsub.s32 %v1680_v43, %v1683_v18  ;;  %v1763_v54 = vshll.u32 %v7189_v26, %v1751_v46  ;;  %v7422_v10 = vand.u32 2147483647, %v5229_v62  ;;  %v1706_v63 = vsub.s32 4, %v1682_v7 }
 0x1d5   :  { %v1545_v31 = vand.u32 2147483647, %v1544_v28  ;;  %v1756_v3 = vor.u32 %v1755_v39, %v1754_v21  ;;  %v5440_v56 = vor.u32 %v1758_v23, %v1757_v37  ;;  %v1766_v52 = vshll.u32 %v7184_v27, %v1751_v46 }
 0x1d6   :  { %vm5434_vm10 = vcmp.le.f32.partialorder %v7422_v10, 0.7853982  ;;  %vm1685_vm11 = vcmp.lt.s32.totalorder %v5425_v15, 0  ;;  %v1686_v43 = vsub.s32 0, %v5425_v15  ;;  %v1767_v1 = vshrl.u32 %v7182_v59, %v1752_v32 }
 0x1d7   :  { %v1548_v33 = vmul.f32 %v1547_v53, %v1545_v31  ;;  %v5445_v51 = vor.u32 %v1761_v49, %v1760_v57  ;;  %v1765_v6 = vor.u32 %v1764_v14, %v1763_v54  ;;  %v5448_v41 = vand.u32 65535, %v5418_v20  ;;  %v5486_v54 = vpop.f32.mrf.mxu2 }
 0x1d8   :  { %v1687_v36 = vsel %vm1685_vm11, %v1686_v43, %v5425_v15  ;;  %v1768_v10 = vor.u32 %v1767_v1, %v1766_v52  ;;  %v5451_v39 = vshrl.u32 %v5418_v20, 16  ;;  %v5455_v21 = vsel %vm1584_vm9, %v1706_v63, %v1682_v7 }
 0x1d9   :  { %v1549_v18 = vxor.u32 2147483648, %v1548_v33  ;;  %v1688_v28 = vclz %v1687_v36  ;;  %vm1769_vm12 = vcmp.lt.s32.totalorder %v5421_v22, 1  ;;  %vm1770_vm13 = vcmp.lt.s32.totalorder %v5421_v22, 2 }
 0x1da   :  { %vm1771_vm14 = vcmp.lt.s32.totalorder %v5421_v22, 3  ;;  %vm1772_vm15 = vcmp.lt.s32.totalorder %v5421_v22, 4  ;;  %v1777_v37 = vsel %vm1769_vm12, %v1756_v3, %v5440_v56  ;;  %v1781_v14 = vsel %vm1769_vm12, %v5440_v56, %v5445_v51 }
 0x1db   :  { %v1550_v46 = vsel %vm1429_vm3, %v1549_v18, %v1548_v33  ;;  %v4256_v23 = vadd.s32 4294967294, %v1688_v28  ;;  %v1778_v49 = vsel %vm1772_vm15, %v1765_v6, 920167782  ;;  %v1782_v31 = vsel %vm1772_vm15, %v1768_v10, 1326507024 }
 0x1dc   :  { %v5469_v7 = vsel %vm5397_vm5, %v5227_v60, %v1550_v46  ;;  %v1779_v2 = vsel %vm1771_vm14, %v5445_v51, %v1778_v49  ;;  %v1783_v57 = vsel %vm1771_vm14, %v1765_v6, %v1782_v31  ;;  %v1753_v63 = vshrl.u32 %v4458_v38, %v1752_v32 }
 0x1dd   :  { %v1555_v53 = vmul.f32 %v5469_v7, %v5469_v7  ;;  %vm4257_vm0 = vcmp.lt.s32.totalorder %v4256_v23, 0  ;;  %v1784_v33 = vsel %vm1770_vm13, %v1781_v14, %v1783_v57  ;;  %v5492_v52 = vadd.f32 %v1385_v58, %v5386_v48 }
 0x1de   :  { %v1691_v43 = vsel %vm4257_vm0, 0, %v4256_v23  ;;  %v1709_v28 = vsel %vm5434_vm10, 0, %v5455_v21  ;;  %v1780_v6 = vsel %vm1770_vm13, %v1777_v37, %v1779_v2  ;;  %v1788_v46 = vand.u32 65535, %v1784_v33 }
 0x1df   :  { %v1556_v1 = vmul.f32 -0.001358992, %v1555_v53  ;;  %v1563_v36 = vmul.f32 -0.00019511016, %v1555_v53  ;;  %v1692_v18 = vsub.s32 32, %v1691_v43  ;;  %v1696_v10 = vsub.s32 4294967266, %v1691_v43 }
 0x1e0   :  { %v1789_v23 = vshrl.u32 %v1784_v33, 16  ;;  %v1693_v14 = vshll.u32 %v5425_v15, %v1691_v43  ;;  %v5503_v31 = vsel %vm1769_vm12, %v1753_v63, %v1756_v3  ;;  %v5507_v16 = vmul.u32 %v1788_v46, %v5451_v39  ;;  %v1231_v63 = vpop.f32.mrf.mxu2 }
 0x1e1   :  { %v1557_v32 = vadd.f32 0.041655596, %v1556_v1  ;;  %v1564_v49 = vadd.f32 0.008332121, %v1563_v36  ;;  %v1694_v48 = vshrl.u32 %v5415_v47, %v1692_v18  ;;  %v1697_v58 = vadd.s32 127, %v1696_v10 }
 0x1e2   :  { %v1791_v57 = vmul.u32 %v1789_v23, %v5448_v41  ;;  %v1811_v33 = vshrl.u32 %v1780_v6, 16  ;;  %v1790_v36 = vmul.u32 %v1788_v46, %v5448_v41  ;;  %v1810_v43 = vand.u32 65535, %v1780_v6 }
 0x1e3   :  { %v1558_v59 = vmul.f32 %v1557_v32, %v1555_v53  ;;  %v1565_v37 = vmul.f32 %v1564_v49, %v1555_v53  ;;  %v1695_v2 = vor.u32 %v1694_v48, %v1693_v14  ;;  %v1698_v1 = vshll.u32 %v1697_v58, 23 }
 0x1e4   :  { %v1794_v15 = vshll.u32 %v1791_v57, 16  ;;  %v1793_v10 = vmul.u32 %v1789_v23, %v5451_v39  ;;  %v1796_v3 = vshll.u32 %v5507_v16, 16  ;;  %vm1574_vm1 = vcmp.eq.s32.totalorder %v5412_v34, 0 }
 0x1e5   :  { %v1559_v47 = vadd.f32 -0.4999988, %v1558_v59  ;;  %v1566_v18 = vadd.f32 -0.16666654, %v1565_v37  ;;  %vm1577_vm2 = vcmp.eq.s32.totalorder %v5412_v34, 2  ;;  %v1702_v49 = vcvt.s32.f32 %v1695_v2 }
 0x1e6   :  { %v1699_v32 = vor.u32 4788187, %v1698_v1  ;;  %vm1798_vm3 = vc.u32 %v1790_v36, %v1794_v15  ;;  %v1800_v14 = vadd.s32 %v1794_v15, %v1790_v36  ;;  %vm1573_vm4 = vcmp.lt.s32.totalorder %v5412_v34, 2 }
 0x1e7   :  { %v1560_v48 = vmul.f32 %v1559_v47, %v1555_v53  ;;  %v1567_v58 = vmul.f32 %v1566_v18, %v1555_v53  ;;  %v1799_v59 = vsel %vm1798_vm3, 1, %v4464_v55  ;;  %v1813_v6 = vmul.u32 %v1811_v33, %v5448_v41 }
 0x1e8   :  { %vm1570_vm5 = vweird.f32 %v5227_v60  ;;  %v1700_v46 = vand.u32 2147483647, %v1699_v32  ;;  %v1801_v23 = vadd.s32 %v1799_v59, %v1793_v10  ;;  %vm1802_vm6 = vc.u32 %v1800_v14, %v1796_v3 }
 0x1e9   :  { %v1814_v37 = vmul.u32 %v1810_v43, %v5451_v39  ;;  %v1561_v63 = vadd.f32 1.0, %v1560_v48  ;;  %v1568_v1 = vadd.f32 1.0, %v1567_v58  ;;  %v1774_v2 = vsel %vm1772_vm15, %v5445_v51, 2102212464 }
 0x1ea   :  { %v1803_v53 = vsel %vm1802_vm6, 1, %v4464_v55  ;;  %v1703_v36 = vmul.f32 %v1702_v49, %v1700_v46  ;;  %v1812_v47 = vmul.u32 %v1810_v43, %v5448_v41  ;;  %v1816_v18 = vshll.u32 %v1813_v6, 16 }
 0x1eb   :  { %v1805_v15 = vadd.s32 %v1803_v53, %v1801_v23  ;;  %v1569_v27 = vmul.f32 %v1568_v1, %v5469_v7  ;;  %v1578_v32 = vxor.u32 2147483648, %v1561_v63  ;;  %v1795_v10 = vshrl.u32 %v1791_v57, 16 }
 0x1ec   :  { %v1815_v3 = vmul.u32 %v1811_v33, %v5451_v39  ;;  %v1704_v14 = vxor.u32 2147483648, %v1703_v36  ;;  %v1818_v48 = vshll.u32 %v1814_v37, 16  ;;  %vm1820_vm7 = vc.u32 %v1812_v47, %v1816_v18 }
 0x1ed   :  { %v1822_v58 = vadd.s32 %v1816_v18, %v1812_v47  ;;  %v1575_v59 = vxor.u32 2147483648, %v1569_v27  ;;  %v1775_v51 = vsel %vm1771_vm14, %v5440_v56, %v1774_v2  ;;  %v1806_v49 = vadd.s32 %v1805_v15, %v1795_v10 }
 0x1ee   :  { %v1821_v46 = vsel %vm1820_vm7, 1, %v4464_v55  ;;  %v1705_v41 = vsel %vm1584_vm9, %v1704_v14, %v1703_v36  ;;  %v1797_v7 = vshrl.u32 %v5507_v16, 16  ;;  %v1579_v33 = vsel %vm1577_vm2, %v1578_v32, %v1569_v27 }
 0x1ef   :  { %v1823_v57 = vadd.s32 %v1821_v46, %v1815_v3  ;;  %vm1824_vm8 = vc.u32 %v1822_v58, %v1818_v48  ;;  %v1576_v39 = vsel %vm1574_vm1, %v1561_v63, %v1575_v59  ;;  %v1708_v56 = vsel %vm5434_vm10, %v5229_v62, %v1705_v41 }
 0x1f0   :  { %v1825_v43 = vsel %vm1824_vm8, 1, %v4464_v55  ;;  %v1580_v23 = vsel %vm1573_vm4, %v1576_v39, %v1579_v33  ;;  %v1710_v1 = vmul.f32 %v1708_v56, %v1708_v56  ;;  %v1817_v2 = vshrl.u32 %v1813_v6, 16  ;;  %v1242_v39 = vpop.f32.mrf.mxu3 }
 0x1f1   :  { %v1827_v16 = vadd.s32 %v1825_v43, %v1823_v57  ;;  %v1581_v53 = vsel %vm1570_vm5, nan, %v1580_v23  ;;  %v1776_v63 = vsel %vm1770_vm13, %v5503_v31, %v1775_v51  ;;  %v1807_v27 = vadd.s32 %v1806_v49, %v1797_v7 }
 0x1f2   :  { %v1819_v36 = vshrl.u32 %v1814_v37, 16  ;;  %3752 = vst [vmem:[%s7026_s3] sm:$0xff] %v1581_v53  ;;  %v1711_v15 = vmul.f32 -0.001358992, %v1710_v1  ;;  %v1718_v47 = vmul.f32 -0.00019511016, %v1710_v1  ;;  %v1895_v18 = vand.u32 2139095040, %v5492_v52 }
 0x1f3   :  { %v1828_v34 = vadd.s32 %v1827_v16, %v1817_v2  ;;  %v1826_v6 = vadd.s32 %v1822_v58, %v1818_v48  ;;  %v1892_v32 = vand.u32 2147483647, %v5492_v52  ;;  %v1367_v60 = vadd.f32 %v5486_v54, %v5410_v50 }
 0x1f4   :  { %v1386_v22 = vperm.slane %v5219_v5, 4  ;;  %v1712_v31 = vadd.f32 0.041655596, %v1711_v15  ;;  %v1719_v10 = vadd.f32 0.008332121, %v1718_v47  ;;  %v1896_v3 = vshrl.u32 %v1895_v18, 23 }
 0x1f5   :  { %v1829_v37 = vadd.s32 %v1828_v34, %v1819_v36  ;;  %v1726_v14 = vadd.s32 3, %v1709_v28  ;;  %vm1832_vm9 = vc.u32 %v1807_v27, %v1826_v6  ;;  %v1830_v49 = vmul.u32 %v5418_v20, %v1776_v63 }
 0x1f6   :  { %v1713_v59 = vmul.f32 %v1712_v31, %v1710_v1  ;;  %v1720_v51 = vmul.f32 %v1719_v10, %v1710_v1  ;;  %v4261_v58 = vadd.s32 4294967169, %v1896_v3  ;;  %v1899_v50 = vand.u32 8388607, %v1892_v32 }
 0x1f7   :  { %v1833_v48 = vadd.s32 1, %v1829_v37  ;;  %v5563_v5 = vadd.f32 %v1386_v22, %v1367_v60  ;;  %v1047_v21 = vadd.f32 %v5159_v0, %v7425_v40  ;;  %v1727_v28 = vand.u32 3, %v1726_v14 }
 0x1f8   :  { %v1714_v54 = vadd.f32 -0.4999988, %v1713_v59  ;;  %v1721_v46 = vadd.f32 -0.16666654, %v1720_v51  ;;  %v1902_v7 = vadd.s32 1, %v4261_v58  ;;  %v1900_v20 = vor.u32 8388608, %v1899_v50 }
 0x1f9   :  { %v1834_v41 = vsel %vm1832_vm9, %v1833_v48, %v1829_v37  ;;  %v5567_v16 = vadd.f32 %v1242_v39, %v1047_v21  ;;  %v2050_v15 = vand.u32 2139095040, %v5563_v5  ;;  %vm1725_vm11 = vweird.f32 %v5229_v62  ;;  %v1244_v48 = vpop.f32.mrf.mxu3 }
 0x1fa   :  { %v1835_v57 = vadd.s32 %v1834_v41, %v1830_v49  ;;  %v1715_v33 = vmul.f32 %v1714_v54, %v1710_v1  ;;  %v1722_v43 = vmul.f32 %v1721_v46, %v1710_v1  ;;  %vm1903_vm10 = vcmp.gt.s32.totalorder %v1902_v7, 0 }
 0x1fb   :  { %v1904_v2 = vsel %vm1903_vm10, %v1902_v7, 0  ;;  %vm1728_vm12 = vcmp.lt.s32.totalorder %v1727_v28, 2  ;;  %vm1729_vm13 = vcmp.eq.s32.totalorder %v1727_v28, 0  ;;  %vm1732_vm14 = vcmp.eq.s32.totalorder %v1727_v28, 2 }
 0x1fc   :  { %v1836_v23 = vadd.s32 536870912, %v1835_v57  ;;  %v1716_v53 = vadd.f32 1.0, %v1715_v33  ;;  %v1723_v63 = vadd.f32 1.0, %v1722_v43  ;;  %v1906_v36 = vand.u32 31, %v1904_v2 }
 0x1fd   :  { %v5571_v1 = vadd.s32 %v1826_v6, %v1807_v27  ;;  %v5573_v22 = vshll.u32 %v1900_v20, 8  ;;  %v5575_v10 = vshrl.u32 %v1904_v2, 5  ;;  %v2051_v3 = vshrl.u32 %v2050_v15, 23 }
 0x1fe   :  { %v1837_v0 = vshrl.u32 %v1836_v23, 30  ;;  %v1724_v47 = vmul.f32 %v1723_v63, %v1708_v56  ;;  %v1733_v34 = vxor.u32 2147483648, %v1716_v53  ;;  %v1907_v18 = vsub.s32 32, %v1906_v36 }
 0x1ff   :  { %v1909_v59 = vshll.u32 %v4458_v38, %v1906_v36  ;;  %vm1739_vm15 = vcmp.lt.s32.totalorder %v5382_v30, 0  ;;  %v1912_v58 = vshll.u32 %v7420_v35, %v1906_v36  ;;  %v1915_v49 = vshll.u32 %v7421_v42, %v1906_v36 }
 0x200   :  { %v1838_v60 = vshll.u32 %v1837_v0, 30  ;;  %v1730_v31 = vxor.u32 2147483648, %v1724_v47  ;;  %v1910_v37 = vshrl.u32 %v7420_v35, %v1907_v18  ;;  %v1913_v56 = vshrl.u32 %v7421_v42, %v1907_v18 }
 0x201   :  { %v1916_v51 = vshrl.u32 %v7189_v26, %v1907_v18  ;;  %v1734_v6 = vsel %vm1732_vm14, %v1733_v34, %v1724_v47  ;;  %v1918_v40 = vshll.u32 %v7189_v26, %v1906_v36  ;;  %v7426_v21 = vmov 920167782  }
 0x202   :  { %v5578_v14 = vsub.s32 %v1835_v57, %v1838_v60  ;;  %v1731_v27 = vsel %vm1729_vm13, %v1716_v53, %v1730_v31  ;;  %v1911_v46 = vor.u32 %v1910_v37, %v1909_v59  ;;  %v1914_v7 = vor.u32 %v1913_v56, %v1912_v58 }
 0x203   :  { %v1735_v50 = vsel %vm1728_vm12, %v1731_v27, %v1734_v6  ;;  %v1919_v57 = vshrl.u32 %v7426_v21, %v1907_v18  ;;  %v1917_v39 = vor.u32 %v1916_v51, %v1915_v49  ;;  %v1921_v33 = vshll.u32 %v7426_v21, %v1906_v36 }
 0x204   :  { %vm1840_vm0 = vcmp.lt.s32.totalorder %v5578_v14, 0  ;;  %v1841_v54 = vsub.s32 0, %v5578_v14  ;;  %v1736_v41 = vsel %vm1725_vm11, nan, %v1735_v50  ;;  %v7427_v43 = vmov 1326507024  }
 0x205   :  { %3753 = vst [vmem:[%s7026_s3 + $0x8] sm:$0xff] %v1736_v41  ;;  %v1922_v23 = vshrl.u32 %v7427_v43, %v1907_v18  ;;  %v7428_v20 = vand.u32 2147483647, %v5382_v30  ;;  %v1920_v53 = vor.u32 %v1919_v57, %v1918_v40  ;;  %v1941_v63 = vand.u32 65535, %v5573_v22 }
 0x206   :  { %v1842_v28 = vsel %vm1840_vm0, %v1841_v54, %v5578_v14  ;;  %v1942_v15 = vshrl.u32 %v5573_v22, 16  ;;  %v1861_v47 = vsub.s32 4, %v1837_v0  ;;  %v1908_v34 = vshrl.u32 %v4458_v38, %v1907_v18 }
 0x207   :  { %vm5602_vm1 = vcmp.le.f32.partialorder %v7428_v20, 0.7853982  ;;  %v1843_v2 = vclz %v1842_v28  ;;  %v1923_v60 = vor.u32 %v1922_v23, %v1921_v33  ;;  %v4264_v31 = vadd.s32 4294967169, %v2051_v3 }
 0x208   :  { %vm1924_vm2 = vcmp.lt.s32.totalorder %v5575_v10, 1  ;;  %vm1925_vm3 = vcmp.lt.s32.totalorder %v5575_v10, 2  ;;  %vm1927_vm4 = vcmp.lt.s32.totalorder %v5575_v10, 4  ;;  %vm1926_vm5 = vcmp.lt.s32.totalorder %v5575_v10, 3 }
 0x209   :  { %v4259_v36 = vadd.s32 4294967294, %v1843_v2  ;;  %v1932_v37 = vsel %vm1924_vm2, %v1911_v46, %v1914_v7  ;;  %v1933_v59 = vsel %vm1927_vm4, %v1920_v53, 920167782  ;;  %v1936_v56 = vsel %vm1924_vm2, %v1914_v7, %v1917_v39 }
 0x20a   :  { %v1929_v18 = vsel %vm1927_vm4, %v1917_v39, 2102212464  ;;  %v1934_v3 = vsel %vm1926_vm5, %v1917_v39, %v1933_v59  ;;  %v1937_v51 = vsel %vm1927_vm4, %v1923_v60, 1326507024  ;;  %v5621_v27 = vsel %vm1739_vm15, %v1861_v47, %v1837_v0 }
 0x20b   :  { %vm4260_vm6 = vcmp.lt.s32.totalorder %v4259_v36, 0  ;;  %v1935_v6 = vsel %vm1925_vm3, %v1932_v37, %v1934_v3  ;;  %v1938_v58 = vsel %vm1926_vm5, %v1920_v53, %v1937_v51  ;;  %v1928_v54 = vsel %vm1924_vm2, %v1908_v34, %v1911_v46 }
 0x20c   :  { %v1846_v48 = vsel %vm4260_vm6, 0, %v4259_v36  ;;  %v1939_v41 = vsel %vm1925_vm3, %v1936_v56, %v1938_v58  ;;  %v1930_v40 = vsel %vm1926_vm5, %v1914_v7, %v1929_v18  ;;  %v1966_v28 = vshrl.u32 %v1935_v6, 16 }
 0x20d   :  { %v1847_v49 = vsub.s32 32, %v1846_v48  ;;  %v1851_v50 = vsub.s32 4294967266, %v1846_v48  ;;  %v1943_v57 = vand.u32 65535, %v1939_v41  ;;  %v1944_v0 = vshrl.u32 %v1939_v41, 16 }
 0x20e   :  { %v1848_v39 = vshll.u32 %v5578_v14, %v1846_v48  ;;  %v1965_v20 = vand.u32 65535, %v1935_v6  ;;  %v1864_v2 = vsel %vm5602_vm1, 0, %v5621_v27  ;;  %v7186_v47 = vand.u32 2147483647, %v5563_v5 }
 0x20f   :  { %v1849_v33 = vshrl.u32 %v5571_v1, %v1847_v49  ;;  %v1852_v23 = vadd.s32 127, %v1851_v50  ;;  %v1946_v46 = vmul.u32 %v1944_v0, %v1941_v63  ;;  %v1947_v53 = vmul.u32 %v1943_v57, %v1942_v15 }
 0x210   :  { %v5641_v7 = vsel %vm1925_vm3, %v1928_v54, %v1930_v40  ;;  %v1968_v36 = vmul.u32 %v1966_v28, %v1941_v63  ;;  %v1945_v14 = vmul.u32 %v1943_v57, %v1941_v63  ;;  %v1948_v37 = vmul.u32 %v1944_v0, %v1942_v15 }
 0x211   :  { %v1850_v34 = vor.u32 %v1849_v33, %v1848_v39  ;;  %v1853_v60 = vshll.u32 %v1852_v23, 23  ;;  %v1949_v1 = vshll.u32 %v1946_v46, 16  ;;  %v2057_v59 = vadd.s32 1, %v4264_v31 }
 0x212   :  { %v1951_v18 = vshll.u32 %v1947_v53, 16  ;;  %v1967_v3 = vmul.u32 %v1965_v20, %v1941_v63  ;;  %v1969_v51 = vmul.u32 %v1965_v20, %v1942_v15  ;;  %v1971_v6 = vshll.u32 %v1968_v36, 16 }
 0x213   :  { %v1854_v56 = vor.u32 4788187, %v1853_v60  ;;  %v1857_v48 = vcvt.s32.f32 %v1850_v34  ;;  %vm1953_vm7 = vc.u32 %v1945_v14, %v1949_v1  ;;  %v1955_v27 = vadd.s32 %v1949_v1, %v1945_v14 }
 0x214   :  { %v1954_v49 = vsel %vm1953_vm7, 1, %v4464_v55  ;;  %v1970_v50 = vmul.u32 %v1966_v28, %v1942_v15  ;;  %v1973_v10 = vshll.u32 %v1969_v51, 16  ;;  %vm1975_vm9 = vc.u32 %v1967_v3, %v1971_v6 }
 0x215   :  { %v1855_v58 = vand.u32 2147483647, %v1854_v56  ;;  %v1956_v54 = vadd.s32 %v1954_v49, %v1948_v37  ;;  %vm1957_vm8 = vc.u32 %v1955_v27, %v1951_v18  ;;  %v1977_v41 = vadd.s32 %v1971_v6, %v1967_v3 }
 0x216   :  { %v1958_v31 = vsel %vm1957_vm8, 1, %v4464_v55  ;;  %v1976_v57 = vsel %vm1975_vm9, 1, %v4464_v55  ;;  %vm2058_vm10 = vcmp.gt.s32.totalorder %v2057_v59, 0  ;;  %v1950_v63 = vshrl.u32 %v1946_v46, 16 }
 0x217   :  { %v1858_v40 = vmul.f32 %v1857_v48, %v1855_v58  ;;  %v1960_v0 = vadd.s32 %v1958_v31, %v1956_v54  ;;  %v1978_v39 = vadd.s32 %v1976_v57, %v1970_v50  ;;  %vm1979_vm11 = vc.u32 %v1977_v41, %v1973_v10 }
 0x218   :  { %v1952_v23 = vshrl.u32 %v1947_v53, 16  ;;  %v1980_v20 = vsel %vm1979_vm11, 1, %v4464_v55  ;;  %v2059_v15 = vsel %vm2058_vm10, %v2057_v59, 0  ;;  %v1972_v34 = vshrl.u32 %v1968_v36, 16 }
 0x219   :  { %v1859_v33 = vxor.u32 2147483648, %v1858_v40  ;;  %v1961_v28 = vadd.s32 %v1960_v0, %v1950_v63  ;;  %v1982_v60 = vadd.s32 %v1980_v20, %v1978_v39  ;;  %v2061_v14 = vand.u32 31, %v2059_v15 }
 0x21a   :  { %v1974_v1 = vshrl.u32 %v1969_v51, 16  ;;  %v5649_v56 = vadd.s32 %v1977_v41, %v1973_v10  ;;  %v2054_v46 = vand.u32 8388607, %v7186_v47  ;;  %v1881_v48 = vadd.s32 3, %v1864_v2 }
 0x21b   :  { %v1860_v37 = vsel %vm1739_vm15, %v1859_v33, %v1858_v40  ;;  %v5656_v18 = vadd.s32 %v1961_v28, %v1952_v23  ;;  %v1983_v59 = vadd.s32 %v1982_v60, %v1972_v34  ;;  %v5658_v3 = vsub.s32 32, %v2061_v14 }
 0x21c   :  { %v1863_v53 = vsel %vm5602_vm1, %v5382_v30, %v1860_v37  ;;  %v1985_v27 = vmul.u32 %v5573_v22, %v5641_v7  ;;  %v5662_v51 = vshrl.u32 %v2059_v15, 5  ;;  %v2064_v58 = vshll.u32 %v4458_v38, %v2061_v14 }
 0x21d   :  { %v1865_v36 = vmul.f32 %v1863_v53, %v1863_v53  ;;  %v1984_v6 = vadd.s32 %v1983_v59, %v1974_v1  ;;  %vm1987_vm12 = vc.u32 %v5656_v18, %v5649_v56  ;;  %v2067_v62 = vshll.u32 %v7420_v35, %v2061_v14 }
 0x21e   :  { %v2065_v10 = vshrl.u32 %v7420_v35, %v5658_v3  ;;  %v2068_v2 = vshrl.u32 %v7421_v42, %v5658_v3  ;;  %v2071_v22 = vshrl.u32 %v7189_v26, %v5658_v3  ;;  %v2073_v7 = vshll.u32 %v7189_v26, %v2061_v14 }
 0x21f   :  { %v1866_v49 = vmul.f32 -0.001358992, %v1865_v36  ;;  %v1873_v50 = vmul.f32 -0.00019511016, %v1865_v36  ;;  %v1988_v54 = vadd.s32 1, %v1984_v6  ;;  %v2074_v41 = vshrl.u32 %v7426_v21, %v5658_v3 }
 0x220   :  { %v5677_v57 = vor.u32 %v2065_v10, %v2064_v58  ;;  %v2070_v63 = vshll.u32 %v7421_v42, %v2061_v14  ;;  %v5680_v39 = vor.u32 %v2068_v2, %v2067_v62  ;;  %v2076_v23 = vshll.u32 %v7426_v21, %v2061_v14 }
 0x221   :  { %v1867_v40 = vadd.f32 0.041655596, %v1866_v49  ;;  %v1874_v31 = vadd.f32 0.008332121, %v1873_v50  ;;  %v1989_v0 = vsel %vm1987_vm12, %v1988_v54, %v1984_v6  ;;  %v2075_v33 = vor.u32 %v2074_v41, %v2073_v7 }
 0x222   :  { %v1990_v28 = vadd.s32 %v1989_v0, %v1985_v27  ;;  %v2077_v34 = vshrl.u32 %v7427_v43, %v5658_v3  ;;  %v2055_v60 = vor.u32 8388608, %v2054_v46  ;;  %v5685_v37 = vor.u32 %v2071_v22, %v2070_v63 }
 0x223   :  { %v1868_v20 = vmul.f32 %v1867_v40, %v1865_v36  ;;  %v1875_v15 = vmul.f32 %v1874_v31, %v1865_v36  ;;  %vm2082_vm13 = vcmp.lt.s32.totalorder %v5662_v51, 4  ;;  %v1882_v62 = vand.u32 3, %v1881_v48 }
 0x224   :  { %v1991_v58 = vadd.s32 536870912, %v1990_v28  ;;  %v2078_v6 = vor.u32 %v2077_v34, %v2076_v23  ;;  %vm2079_vm14 = vcmp.lt.s32.totalorder %v5662_v51, 1  ;;  %vm2081_vm15 = vcmp.lt.s32.totalorder %v5662_v51, 3 }
 0x225   :  { %v1869_v1 = vadd.f32 -0.4999988, %v1868_v20  ;;  %v1876_v59 = vadd.f32 -0.16666654, %v1875_v15  ;;  %v2088_v14 = vsel %vm2082_vm13, %v2075_v33, 920167782  ;;  %v2087_v46 = vsel %vm2079_vm14, %v5677_v57, %v5680_v39 }
 0x226   :  { %v5692_v50 = vshrl.u32 %v1991_v58, 30  ;;  %vm2080_vm0 = vcmp.lt.s32.totalorder %v5662_v51, 2  ;;  %v2089_v48 = vsel %vm2081_vm15, %v5685_v37, %v2088_v14  ;;  %v2092_v10 = vsel %vm2082_vm13, %v2078_v6, 1326507024 }
 0x227   :  { %v1870_v27 = vmul.f32 %v1869_v1, %v1865_v36  ;;  %v1877_v49 = vmul.f32 %v1876_v59, %v1865_v36  ;;  %v5704_v2 = vshll.u32 %v2055_v60, 8  ;;  %v2091_v7 = vsel %vm2079_vm14, %v5680_v39, %v5685_v37 }
 0x228   :  { %v1993_v22 = vshll.u32 %v5692_v50, 30  ;;  %v2090_v41 = vsel %vm2080_vm0, %v2087_v46, %v2089_v48  ;;  %v2093_v40 = vsel %vm2081_vm15, %v2075_v33, %v2092_v10  ;;  %vm1883_vm1 = vcmp.lt.s32.totalorder %v1882_v62, 2 }
 0x229   :  { %v1871_v54 = vadd.f32 1.0, %v1870_v27  ;;  %v1878_v36 = vadd.f32 1.0, %v1877_v49  ;;  %vm1884_vm2 = vcmp.eq.s32.totalorder %v1882_v62, 0  ;;  %vm1887_vm3 = vcmp.eq.s32.totalorder %v1882_v62, 2 }
 0x22a   :  { %v1994_v0 = vsub.s32 %v1990_v28, %v1993_v22  ;;  %v2094_v23 = vsel %vm2080_vm0, %v2091_v7, %v2093_v40  ;;  %v2121_v20 = vshrl.u32 %v2090_v41, 16  ;;  %v2096_v60 = vand.u32 65535, %v5704_v2 }
 0x22b   :  { %v1879_v31 = vmul.f32 %v1878_v36, %v1863_v53  ;;  %v1888_v63 = vxor.u32 2147483648, %v1871_v54  ;;  %v2097_v1 = vshrl.u32 %v5704_v2, 16  ;;  %v2098_v59 = vand.u32 65535, %v2094_v23  ;;  %v5722_v53 = vld [vmem:[%s7025_s2] sm:$0xff] }
 0x22c   :  { %vm1995_vm4 = vcmp.lt.s32.totalorder %v1994_v0, 0  ;;  %v1996_v34 = vsub.s32 0, %v1994_v0  ;;  %v2099_v58 = vshrl.u32 %v2094_v23, 16  ;;  %v1387_v33 = vperm.slane %v5722_v53, 5 }
 0x22d   :  { %v1885_v15 = vxor.u32 2147483648, %v1879_v31  ;;  %v1889_v6 = vsel %vm1887_vm3, %v1888_v63, %v1879_v31  ;;  %v2120_v27 = vand.u32 65535, %v2090_v41  ;;  %vm1880_vm5 = vweird.f32 %v5382_v30 }
 0x22e   :  { %v1997_v14 = vsel %vm1995_vm4, %v1996_v34, %v1994_v0  ;;  %v5727_v48 = vmul.u32 %v2121_v20, %v2096_v60  ;;  %v1986_v36 = vadd.s32 %v5649_v56, %v5656_v18  ;;  %v2101_v22 = vmul.u32 %v2099_v58, %v2096_v60 }
 0x22f   :  { %v1886_v28 = vsel %vm1884_vm2, %v1871_v54, %v1885_v15  ;;  %v1998_v46 = vclz %v1997_v14  ;;  %v2102_v7 = vmul.u32 %v2098_v59, %v2097_v1  ;;  %vm1894_vm6 = vcmp.lt.s32.totalorder %v5492_v52, 0 }
 0x230   :  { %v1890_v49 = vsel %vm1883_vm1, %v1886_v28, %v1889_v6  ;;  %v2016_v30 = vsub.s32 4, %v5692_v50  ;;  %v2063_v62 = vshrl.u32 %v4458_v38, %v5658_v3  ;;  %v5739_v41 = vadd.f32 %v1387_v33, %v5567_v16 }
 0x231   :  { %v1891_v10 = vsel %vm1880_vm5, nan, %v1890_v49  ;;  %v4262_v54 = vadd.s32 4294967294, %v1998_v46  ;;  %v2100_v40 = vmul.u32 %v2098_v59, %v2096_v60  ;;  %v2104_v31 = vshll.u32 %v2101_v22, 16 }
 0x232   :  { %3754 = vst [vmem:[%s7026_s3 + $0x10] sm:$0xff] %v1891_v10  ;;  %v2122_v56 = vmul.u32 %v2120_v27, %v2096_v60  ;;  %v2124_v18 = vmul.u32 %v2120_v27, %v2097_v1  ;;  %v2103_v63 = vmul.u32 %v2099_v58, %v2097_v1  ;;  %v2105_v23 = vshrl.u32 %v2101_v22, 16 }
 0x233   :  { %vm4263_vm7 = vcmp.lt.s32.totalorder %v4262_v54, 0  ;;  %v2126_v15 = vshll.u32 %v5727_v48, 16  ;;  %v2106_v28 = vshll.u32 %v2102_v7, 16  ;;  %vm2108_vm8 = vc.u32 %v2100_v40, %v2104_v31 }
 0x234   :  { %v2001_v34 = vsel %vm4263_vm7, 0, %v4262_v54  ;;  %v2110_v6 = vadd.s32 %v2104_v31, %v2100_v40  ;;  %vm5744_vm9 = vcmp.le.f32.partialorder %v1892_v32, 0.7853982  ;;  %v2109_v60 = vsel %vm2108_vm8, 1, %v4464_v55 }
 0x235   :  { %v2002_v16 = vsub.s32 32, %v2001_v34  ;;  %v2006_v59 = vsub.s32 4294967266, %v2001_v34  ;;  %v2125_v33 = vmul.u32 %v2121_v20, %v2097_v1  ;;  %v2003_v14 = vshll.u32 %v1994_v0, %v2001_v34  ;;  %v1255_v1 = vpop.f32.mrf.mxu0 }
 0x236   :  { %v2111_v58 = vadd.s32 %v2109_v60, %v2103_v63  ;;  %vm2112_vm10 = vc.u32 %v2110_v6, %v2106_v28  ;;  %vm2130_vm11 = vc.u32 %v2122_v56, %v2126_v15  ;;  %v2128_v32 = vshll.u32 %v2124_v18, 16 }
 0x237   :  { %v2004_v27 = vshrl.u32 %v1986_v36, %v2002_v16  ;;  %v2007_v49 = vadd.s32 127, %v2006_v59  ;;  %v2113_v46 = vsel %vm2112_vm10, 1, %v4464_v55  ;;  %v2131_v10 = vsel %vm2130_vm11, 1, %v4464_v55 }
 0x238   :  { %v2115_v22 = vadd.s32 %v2113_v46, %v2111_v58  ;;  %v2132_v54 = vadd.s32 %v2126_v15, %v2122_v56  ;;  %v2133_v40 = vadd.s32 %v2131_v10, %v2125_v33  ;;  %v2084_v20 = vsel %vm2082_vm13, %v5685_v37, 2102212464 }
 0x239   :  { %v2005_v31 = vor.u32 %v2004_v27, %v2003_v14  ;;  %v2008_v47 = vshll.u32 %v2007_v49, 23  ;;  %v2205_v0 = vand.u32 2139095040, %v5739_v41  ;;  %v2017_v36 = vsel %vm1894_vm6, %v2016_v30, %v5692_v50  ;;  %v7433_v49 = vld [vmem:[#allocation43_spill] sm:$0xff] }
 0x23a   :  { %v2107_v63 = vshrl.u32 %v2102_v7, 16  ;;  %v2116_v34 = vadd.s32 %v2115_v22, %v2105_v23  ;;  %vm2134_vm12 = vc.u32 %v2132_v54, %v2128_v32  ;;  %v7188_v15 = vand.u32 2147483647, %v5739_v41 }
 0x23b   :  { %v2009_v28 = vor.u32 4788187, %v2008_v47  ;;  %v2135_v56 = vsel %vm2134_vm12, 1, %v4464_v55  ;;  %v2206_v6 = vshrl.u32 %v2205_v0, 23  ;;  %v2083_v37 = vsel %vm2079_vm14, %v2063_v62, %v5677_v57 }
 0x23c   :  { %v2085_v16 = vsel %vm2081_vm15, %v5680_v39, %v2084_v20  ;;  %v2127_v59 = vshrl.u32 %v5727_v48, 16  ;;  %v2137_v50 = vadd.s32 %v2135_v56, %v2133_v40  ;;  %v2012_v30 = vcvt.s32.f32 %v2005_v31  ;;  %v7434_v56 = vld [vmem:[#allocation31_spill] sm:$0xff] }
 0x23d   :  { %v2010_v7 = vand.u32 2147483647, %v2009_v28  ;;  %v2117_v23 = vadd.s32 %v2116_v34, %v2107_v63  ;;  %v4267_v47 = vadd.s32 4294967169, %v2206_v6  ;;  %v2019_v60 = vsel %vm5744_vm9, 0, %v2017_v36  ;;  %v1257_v40 = vpop.f32.mrf.mxu0 }
 0x23e   :  { %v2129_v33 = vshrl.u32 %v2124_v18, 16  ;;  %v2138_v14 = vadd.s32 %v2137_v50, %v2127_v59  ;;  %v2136_v27 = vadd.s32 %v2132_v54, %v2128_v32  ;;  %v2209_v57 = vand.u32 8388607, %v7188_v15  ;;  %v5817_v40 = vpop.f32.mrf.mxu1 }
 0x23f   :  { %v2013_v58 = vmul.f32 %v2012_v30, %v2010_v7  ;;  %v2212_v62 = vadd.s32 1, %v4267_v47  ;;  %v1060_v39 = vadd.f32 %v5162_v4, %v7433_v49  ;;  %v2086_v48 = vsel %vm2080_vm0, %v2083_v37, %v2085_v16 }
 0x240   :  { %v2139_v46 = vadd.s32 %v2138_v14, %v2129_v33  ;;  %v2036_v22 = vadd.s32 3, %v2019_v60  ;;  %vm2142_vm13 = vc.u32 %v2117_v23, %v2136_v27  ;;  %v1388_v32 = vperm.slane %v5722_v53, 6 }
 0x241   :  { %v2014_v10 = vxor.u32 2147483648, %v2013_v58  ;;  %vm2213_vm14 = vcmp.gt.s32.totalorder %v2212_v62, 0  ;;  %v1369_v20 = vadd.f32 %v1255_v1, %v1060_v39  ;;  %v2140_v0 = vmul.u32 %v5704_v2, %v2086_v48 }
 0x242   :  { %v2143_v18 = vadd.s32 1, %v2139_v46  ;;  %v2214_v31 = vsel %vm2213_vm14, %v2212_v62, 0  ;;  %v2210_v4 = vor.u32 8388608, %v2209_v57  ;;  %v5790_v6 = vadd.f32 %v5171_v19, %v7434_v56 }
 0x243   :  { %v2015_v54 = vsel %vm1894_vm6, %v2014_v10, %v2013_v58  ;;  %v2216_v36 = vand.u32 31, %v2214_v31  ;;  %v5792_v37 = vand.u32 3, %v2036_v22  ;;  %v5794_v2 = vadd.f32 %v1388_v32, %v1369_v20 }
 0x244   :  { %v5782_v51 = vsel %vm5744_vm9, %v5492_v52, %v2015_v54  ;;  %v2144_v63 = vsel %vm2142_vm13, %v2143_v18, %v2139_v46  ;;  %v5796_v50 = vshll.u32 %v2210_v4, 8  ;;  %v5798_v7 = vshrl.u32 %v2214_v31, 5 }
 0x245   :  { %v2020_v34 = vmul.f32 %v5782_v51, %v5782_v51  ;;  %v2145_v28 = vadd.s32 %v2144_v63, %v2140_v0  ;;  %v5786_v1 = vsub.s32 32, %v2216_v36  ;;  %v2219_v58 = vshll.u32 %v4458_v38, %v2216_v36 }
 0x246   :  { %v2222_v57 = vshll.u32 %v7420_v35, %v2216_v36  ;;  %v2228_v49 = vshll.u32 %v7189_v26, %v2216_v36  ;;  %v2225_v22 = vshll.u32 %v7421_v42, %v2216_v36  ;;  %v2231_v32 = vshll.u32 %v7426_v21, %v2216_v36 }
 0x247   :  { %v2021_v16 = vmul.f32 -0.001358992, %v2020_v34  ;;  %v2028_v59 = vmul.f32 -0.00019511016, %v2020_v34  ;;  %v2146_v3 = vadd.s32 536870912, %v2145_v28  ;;  %v2220_v30 = vshrl.u32 %v7420_v35, %v5786_v1 }
 0x248   :  { %v2223_v47 = vshrl.u32 %v7421_v42, %v5786_v1  ;;  %v2229_v19 = vshrl.u32 %v7426_v21, %v5786_v1  ;;  %v2226_v62 = vshrl.u32 %v7189_v26, %v5786_v1  ;;  %v2232_v39 = vshrl.u32 %v7427_v43, %v5786_v1 }
 0x249   :  { %v2022_v60 = vadd.f32 0.041655596, %v2021_v16  ;;  %v2029_v33 = vadd.f32 0.008332121, %v2028_v59  ;;  %v5806_v14 = vshrl.u32 %v2146_v3, 30  ;;  %v5819_v18 = vor.u32 %v2220_v30, %v2219_v58 }
 0x24a   :  { %v5821_v31 = vor.u32 %v2223_v47, %v2222_v57  ;;  %v2230_v20 = vor.u32 %v2229_v19, %v2228_v49  ;;  %vm2042_vm15 = vcmp.eq.s32.totalorder %v5792_v37, 2  ;;  %v2141_v4 = vadd.s32 %v2136_v27, %v2117_v23 }
 0x24b   :  { %v2023_v48 = vmul.f32 %v2022_v60, %v2020_v34  ;;  %v2030_v46 = vmul.f32 %v2029_v33, %v2020_v34  ;;  %v2148_v10 = vshll.u32 %v5806_v14, 30  ;;  %vm2039_vm0 = vcmp.eq.s32.totalorder %v5792_v37, 0 }
 0x24c   :  { %v2227_v56 = vor.u32 %v2226_v62, %v2225_v22  ;;  %v2233_v16 = vor.u32 %v2232_v39, %v2231_v32  ;;  %vm2234_vm1 = vcmp.lt.s32.totalorder %v5798_v7, 1  ;;  %vm2237_vm2 = vcmp.lt.s32.totalorder %v5798_v7, 4 }
 0x24d   :  { %v2024_v54 = vadd.f32 -0.4999988, %v2023_v48  ;;  %v2031_v0 = vadd.f32 -0.16666654, %v2030_v46  ;;  %v5825_v63 = vsub.s32 %v2145_v28, %v2148_v10  ;;  %vm2038_vm3 = vcmp.lt.s32.totalorder %v5792_v37, 2  ;;  %v1270_v48 = vpop.f32.mrf.mxu1 }
 0x24e   :  { %vm2035_vm5 = vweird.f32 %v5492_v52  ;;  %vm2049_vm6 = vcmp.lt.s32.totalorder %v5563_v5, 0  ;;  %v2242_v23 = vsel %vm2234_vm1, %v5819_v18, %v5821_v31  ;;  %v2243_v27 = vsel %vm2237_vm2, %v2230_v20, 920167782 }
 0x24f   :  { %v2025_v59 = vmul.f32 %v2024_v54, %v2020_v34  ;;  %v2032_v3 = vmul.f32 %v2031_v0, %v2020_v34  ;;  %vm2150_vm4 = vcmp.lt.s32.totalorder %v5825_v63, 0  ;;  %v2151_v36 = vsub.s32 0, %v5825_v63 }
 0x250   :  { %v2251_v34 = vand.u32 65535, %v5796_v50  ;;  %v7187_v28 = vand.u32 2147483647, %v5794_v2  ;;  %vm2236_vm7 = vcmp.lt.s32.totalorder %v5798_v7, 3  ;;  %vm2235_vm8 = vcmp.lt.s32.totalorder %v5798_v7, 2 }
 0x251   :  { %v2026_v30 = vadd.f32 1.0, %v2025_v59  ;;  %v2033_v47 = vadd.f32 1.0, %v2032_v3  ;;  %v2152_v19 = vsel %vm2150_vm4, %v2151_v36, %v5825_v63  ;;  %v2244_v33 = vsel %vm2236_vm7, %v2227_v56, %v2243_v27 }
 0x252   :  { %v2153_v60 = vclz %v2152_v19  ;;  %v2246_v58 = vsel %vm2234_vm1, %v5821_v31, %v2227_v56  ;;  %v2245_v49 = vsel %vm2235_vm8, %v2242_v23, %v2244_v33  ;;  %v2247_v39 = vsel %vm2237_vm2, %v2233_v16, 1326507024 }
 0x253   :  { %v2034_v57 = vmul.f32 %v2033_v47, %v5782_v51  ;;  %v2043_v62 = vxor.u32 2147483648, %v2026_v30  ;;  %v2252_v10 = vshrl.u32 %v5796_v50, 16  ;;  %v2360_v22 = vand.u32 2139095040, %v5794_v2 }
 0x254   :  { %v4265_v46 = vadd.s32 4294967294, %v2153_v60  ;;  %v5860_v32 = vand.u32 8388607, %v7187_v28  ;;  %v2171_v51 = vsub.s32 4, %v5806_v14  ;;  %v2218_v0 = vshrl.u32 %v4458_v38, %v5786_v1 }
 0x255   :  { %v2040_v54 = vxor.u32 2147483648, %v2034_v57  ;;  %v2248_v59 = vsel %vm2236_vm7, %v2230_v20, %v2247_v39  ;;  %v2044_v16 = vsel %vm2042_vm15, %v2043_v62, %v2034_v57  ;;  %v2275_v36 = vand.u32 65535, %v2245_v49 }
 0x256   :  { %vm4266_vm9 = vcmp.lt.s32.totalorder %v4265_v46, 0  ;;  %v2249_v3 = vsel %vm2235_vm8, %v2246_v58, %v2248_v59  ;;  %v2276_v20 = vshrl.u32 %v2245_v49, 16  ;;  %v7435_v62 = vand.u32 2147483647, %v5563_v5 }
 0x257   :  { %v2041_v23 = vsel %vm2039_vm0, %v2026_v30, %v2040_v54  ;;  %v2156_v27 = vsel %vm4266_vm9, 0, %v4265_v46  ;;  %v2253_v47 = vand.u32 65535, %v2249_v3  ;;  %v2254_v19 = vshrl.u32 %v2249_v3, 16 }
 0x258   :  { %v2045_v1 = vsel %vm2038_vm3, %v2041_v23, %v2044_v16  ;;  %v2157_v60 = vsub.s32 32, %v2156_v27  ;;  %v2161_v33 = vsub.s32 4294967266, %v2156_v27  ;;  %vm5879_vm10 = vcmp.le.f32.partialorder %v7435_v62, 0.7853982 }
 0x259   :  { %v2046_v57 = vsel %vm2035_vm5, nan, %v2045_v1  ;;  %v2172_v30 = vsel %vm2049_vm6, %v2171_v51, %v5806_v14  ;;  %v2256_v39 = vmul.u32 %v2254_v19, %v2251_v34  ;;  %v2257_v48 = vmul.u32 %v2253_v47, %v2252_v10 }
 0x25a   :  { %3755 = vst [vmem:[%s7026_s3 + $0x18] sm:$0xff] %v2046_v57  ;;  %v2158_v37 = vshll.u32 %v5825_v63, %v2156_v27  ;;  %v2159_v52 = vshrl.u32 %v2141_v4, %v2157_v60  ;;  %v2162_v49 = vadd.s32 127, %v2161_v33  ;;  %v2239_v46 = vsel %vm2237_vm2, %v2227_v56, 2102212464 }
 0x25b   :  { %v2255_v54 = vmul.u32 %v2253_v47, %v2251_v34  ;;  %v2258_v59 = vmul.u32 %v2254_v19, %v2252_v10  ;;  %v2259_v16 = vshll.u32 %v2256_v39, 16  ;;  %v2277_v3 = vmul.u32 %v2275_v36, %v2251_v34 }
 0x25c   :  { %v2160_v23 = vor.u32 %v2159_v52, %v2158_v37  ;;  %v2163_v1 = vshll.u32 %v2162_v49, 23  ;;  %v2278_v14 = vmul.u32 %v2276_v20, %v2251_v34  ;;  %v2279_v51 = vmul.u32 %v2275_v36, %v2252_v10 }
 0x25d   :  { %v2261_v62 = vshll.u32 %v2257_v48, 16  ;;  %vm2263_vm11 = vc.u32 %v2255_v54, %v2259_v16  ;;  %v2265_v28 = vadd.s32 %v2259_v16, %v2255_v54  ;;  %v2361_v15 = vshrl.u32 %v2360_v22, 23 }
 0x25e   :  { %v2164_v57 = vor.u32 4788187, %v2163_v1  ;;  %v2260_v26 = vshrl.u32 %v2256_v39, 16  ;;  %v2264_v4 = vsel %vm2263_vm11, 1, %v4464_v55  ;;  %v2281_v63 = vshll.u32 %v2278_v14, 16 }
 0x25f   :  { %v2167_v27 = vcvt.s32.f32 %v2160_v23  ;;  %v2266_v60 = vadd.s32 %v2264_v4, %v2258_v59  ;;  %vm2267_vm12 = vc.u32 %v2265_v28, %v2261_v62  ;;  %v2280_v56 = vmul.u32 %v2276_v20, %v2252_v10 }
 0x260   :  { %v2165_v47 = vand.u32 2147483647, %v2164_v57  ;;  %v2268_v19 = vsel %vm2267_vm12, 1, %v4464_v55  ;;  %v2283_v33 = vshll.u32 %v2279_v51, 16  ;;  %vm2285_vm13 = vc.u32 %v2277_v3, %v2281_v63 }
 0x261   :  { %v2270_v34 = vadd.s32 %v2268_v19, %v2266_v60  ;;  %v2286_v36 = vsel %vm2285_vm13, 1, %v4464_v55  ;;  %v2287_v37 = vadd.s32 %v2281_v63, %v2277_v3  ;;  %v4270_v52 = vadd.s32 4294967169, %v2361_v15 }
 0x262   :  { %v2168_v22 = vmul.f32 %v2167_v27, %v2165_v47  ;;  %v2174_v39 = vsel %vm5879_vm10, 0, %v2172_v30  ;;  %v2238_v49 = vsel %vm2234_vm1, %v2218_v0, %v5819_v18  ;;  %v2288_v28 = vadd.s32 %v2286_v36, %v2280_v56 }
 0x263   :  { %v2240_v10 = vsel %vm2236_vm7, %v5821_v31, %v2239_v46  ;;  %v2271_v20 = vadd.s32 %v2270_v34, %v2260_v26  ;;  %vm2289_vm14 = vc.u32 %v2287_v37, %v2283_v33  ;;  %v2367_v54 = vadd.s32 1, %v4270_v52 }
 0x264   :  { %v2169_v59 = vxor.u32 2147483648, %v2168_v22  ;;  %v2262_v16 = vshrl.u32 %v2257_v48, 16  ;;  %v2290_v15 = vsel %vm2289_vm14, 1, %v4464_v55  ;;  %v5906_v3 = vadd.f32 %v5817_v40, %v5790_v6 }
 0x265   :  { %v2191_v30 = vadd.s32 3, %v2174_v39  ;;  %v2282_v23 = vshrl.u32 %v2278_v14, 16  ;;  %v2292_v1 = vadd.s32 %v2290_v15, %v2288_v28  ;;  %vm2368_vm15 = vcmp.gt.s32.totalorder %v2367_v54, 0 }
 0x266   :  { %v2170_v18 = vsel %vm2049_vm6, %v2169_v59, %v2168_v22  ;;  %v2241_v26 = vsel %vm2235_vm8, %v2238_v49, %v2240_v10  ;;  %v5912_v31 = vadd.s32 %v2271_v20, %v2262_v16  ;;  %v2369_v0 = vsel %vm2368_vm15, %v2367_v54, 0 }
 0x267   :  { %v2173_v48 = vsel %vm5879_vm10, %v5563_v5, %v2170_v18  ;;  %v2284_v46 = vshrl.u32 %v2279_v51, 16  ;;  %v2293_v6 = vadd.s32 %v2292_v1, %v2282_v23  ;;  %v5917_v62 = vadd.s32 %v2287_v37, %v2283_v33 }
 0x268   :  { %v2175_v40 = vmul.f32 %v2173_v48, %v2173_v48  ;;  %v2371_v14 = vand.u32 31, %v2369_v0  ;;  %v5919_v57 = vand.u32 3, %v2191_v30  ;;  %v2295_v63 = vmul.u32 %v5796_v50, %v2241_v26 }
 0x269   :  { %v2294_v4 = vadd.s32 %v2293_v6, %v2284_v46  ;;  %v2365_v7 = vor.u32 8388608, %v5860_v32  ;;  %vm2297_vm0 = vc.u32 %v5912_v31, %v5917_v62  ;;  %v5927_v56 = vshrl.u32 %v2369_v0, 5 }
 0x26a   :  { %v2176_v27 = vmul.f32 -0.001358992, %v2175_v40  ;;  %v2183_v60 = vmul.f32 -0.00019511016, %v2175_v40  ;;  %v5925_v58 = vsub.s32 32, %v2371_v14  ;;  %v2374_v47 = vshll.u32 %v4458_v38, %v2371_v14 }
 0x26b   :  { %v2298_v51 = vadd.s32 1, %v2294_v4  ;;  %v2377_v19 = vshll.u32 %v7420_v35, %v2371_v14  ;;  %v7438_v32 = vmov 2102212464   ;;  %v2380_v20 = vshll.u32 %v7421_v42, %v2371_v14 }
 0x26c   :  { %v2177_v33 = vadd.f32 0.041655596, %v2176_v27  ;;  %v2184_v34 = vadd.f32 0.008332121, %v2183_v60  ;;  %v2375_v50 = vshrl.u32 %v7420_v35, %v5925_v58  ;;  %v2383_v36 = vshll.u32 %v7438_v32, %v2371_v14 }
 0x26d   :  { %v2299_v37 = vsel %vm2297_vm0, %v2298_v51, %v2294_v4  ;;  %v2378_v52 = vshrl.u32 %v7421_v42, %v5925_v58  ;;  %v2381_v22 = vshrl.u32 %v7438_v32, %v5925_v58  ;;  %v2384_v39 = vshrl.u32 %v7426_v21, %v5925_v58 }
 0x26e   :  { %v2178_v49 = vmul.f32 %v2177_v33, %v2175_v40  ;;  %v2185_v28 = vmul.f32 %v2184_v34, %v2175_v40  ;;  %v2300_v10 = vadd.s32 %v2299_v37, %v2295_v63  ;;  %v5941_v54 = vor.u32 %v2375_v50, %v2374_v47  ;;  %v5965_v47 = vpop.f32.mrf.mxu2 }
 0x26f   :  { %v5943_v59 = vor.u32 %v2378_v52, %v2377_v19  ;;  %v2385_v16 = vor.u32 %v2384_v39, %v2383_v36  ;;  %v2386_v15 = vshll.u32 %v7426_v21, %v2371_v14  ;;  %v2387_v18 = vshrl.u32 %v7427_v43, %v5925_v58 }
 0x270   :  { %v2179_v30 = vadd.f32 -0.4999988, %v2178_v49  ;;  %v2186_v23 = vadd.f32 -0.16666654, %v2185_v28  ;;  %v2301_v1 = vadd.s32 536870912, %v2300_v10  ;;  %v5948_v26 = vor.u32 %v2381_v22, %v2380_v20 }
 0x271   :  { %vm2392_vm1 = vcmp.lt.s32.totalorder %v5927_v56, 4  ;;  %vm2193_vm2 = vcmp.lt.s32.totalorder %v5919_v57, 2  ;;  %v2388_v4 = vor.u32 %v2387_v18, %v2386_v15  ;;  %vm2389_vm3 = vcmp.lt.s32.totalorder %v5927_v56, 1 }
 0x272   :  { %v2180_v0 = vmul.f32 %v2179_v30, %v2175_v40  ;;  %v2187_v46 = vmul.f32 %v2186_v23, %v2175_v40  ;;  %v5952_v6 = vshrl.u32 %v2301_v1, 30  ;;  %vm2391_vm4 = vcmp.lt.s32.totalorder %v5927_v56, 3 }
 0x273   :  { %v2398_v14 = vsel %vm2392_vm1, %v2385_v16, 920167782  ;;  %v5958_v63 = vshll.u32 %v2365_v7, 8  ;;  %v2397_v40 = vsel %vm2389_vm3, %v5941_v54, %v5943_v59  ;;  %vm2194_vm5 = vcmp.eq.s32.totalorder %v5919_v57, 0 }
 0x274   :  { %v2181_v27 = vadd.f32 1.0, %v2180_v0  ;;  %v2188_v60 = vadd.f32 1.0, %v2187_v46  ;;  %v2303_v51 = vshll.u32 %v5952_v6, 30  ;;  %vm2390_vm6 = vcmp.lt.s32.totalorder %v5927_v56, 2 }
 0x275   :  { %v2399_v7 = vsel %vm2391_vm4, %v5948_v26, %v2398_v14  ;;  %v2402_v19 = vsel %vm2392_vm1, %v2388_v4, 1326507024  ;;  %v2401_v36 = vsel %vm2389_vm3, %v5943_v59, %v5948_v26  ;;  %vm2197_vm7 = vcmp.eq.s32.totalorder %v5919_v57, 2 }
 0x276   :  { %v2189_v33 = vmul.f32 %v2188_v60, %v2173_v48  ;;  %v2198_v34 = vxor.u32 2147483648, %v2181_v27  ;;  %v2304_v50 = vsub.s32 %v2300_v10, %v2303_v51  ;;  %v2400_v37 = vsel %vm2390_vm6, %v2397_v40, %v2399_v7  ;;  %v1283_v60 = vpop.f32.mrf.mxu2 }
 0x277   :  { %v2403_v52 = vsel %vm2391_vm4, %v2385_v16, %v2402_v19  ;;  %v1389_v22 = vperm.slane %v5722_v53, 7  ;;  %v2406_v49 = vand.u32 65535, %v5958_v63  ;;  %v2407_v20 = vshrl.u32 %v5958_v63, 16 }
 0x278   :  { %v2195_v39 = vxor.u32 2147483648, %v2189_v33  ;;  %vm2305_vm8 = vcmp.lt.s32.totalorder %v2304_v50, 0  ;;  %v2306_v48 = vsub.s32 0, %v2304_v50  ;;  %v2199_v28 = vsel %vm2197_vm7, %v2198_v34, %v2189_v33 }
 0x279   :  { %v2404_v10 = vsel %vm2390_vm6, %v2401_v36, %v2403_v52  ;;  %v2430_v15 = vand.u32 65535, %v2400_v37  ;;  %vm2190_vm9 = vweird.f32 %v5563_v5  ;;  %v2431_v0 = vshrl.u32 %v2400_v37, 16 }
 0x27a   :  { %v2196_v30 = vsel %vm2194_vm5, %v2181_v27, %v2195_v39  ;;  %v2307_v23 = vsel %vm2305_vm8, %v2306_v48, %v2304_v50  ;;  %v2408_v1 = vand.u32 65535, %v2404_v10  ;;  %v2409_v16 = vshrl.u32 %v2404_v10, 16 }
 0x27b   :  { %v2200_v53 = vsel %vm2193_vm2, %v2196_v30, %v2199_v28  ;;  %v2308_v18 = vclz %v2307_v23  ;;  %v2296_v27 = vadd.s32 %v5917_v62, %v5912_v31  ;;  %v5999_v40 = vadd.f32 %v1389_v22, %v5906_v3 }
 0x27c   :  { %v2201_v46 = vsel %vm2190_vm9, nan, %v2200_v53  ;;  %v2411_v4 = vmul.u32 %v2409_v16, %v2406_v49  ;;  %v2412_v14 = vmul.u32 %v2408_v1, %v2407_v20  ;;  %v2373_v5 = vshrl.u32 %v4458_v38, %v5925_v58 }
 0x27d   :  { %3756 = vst [vmem:[%s7026_s3 + $0x20] sm:$0xff] %v2201_v46  ;;  %v4268_v51 = vadd.s32 4294967294, %v2308_v18  ;;  %v2410_v57 = vmul.u32 %v2408_v1, %v2406_v49  ;;  %v2432_v19 = vmul.u32 %v2430_v15, %v2406_v49  ;;  %v2413_v33 = vmul.u32 %v2409_v16, %v2407_v20 }
 0x27e   :  { %v2414_v7 = vshll.u32 %v2411_v4, 16  ;;  %v2416_v34 = vshll.u32 %v2412_v14, 16  ;;  %v2433_v36 = vmul.u32 %v2431_v0, %v2406_v49  ;;  %v2434_v39 = vmul.u32 %v2430_v15, %v2407_v20 }
 0x27f   :  { %vm4269_vm10 = vcmp.lt.s32.totalorder %v4268_v51, 0  ;;  %v2415_v62 = vshrl.u32 %v2411_v4, 16  ;;  %vm2204_vm12 = vcmp.lt.s32.totalorder %v5739_v41, 0  ;;  %v2435_v58 = vmul.u32 %v2431_v0, %v2407_v20 }
 0x280   :  { %v2311_v37 = vsel %vm4269_vm10, 0, %v4268_v51  ;;  %vm2418_vm11 = vc.u32 %v2410_v57, %v2414_v7  ;;  %v2420_v52 = vadd.s32 %v2414_v7, %v2410_v57  ;;  %v2436_v28 = vshll.u32 %v2433_v36, 16 }
 0x281   :  { %v2312_v48 = vsub.s32 32, %v2311_v37  ;;  %v2316_v31 = vsub.s32 4294967266, %v2311_v37  ;;  %v2419_v3 = vsel %vm2418_vm11, 1, %v4464_v55  ;;  %v2313_v10 = vshll.u32 %v2304_v50, %v2311_v37 }
 0x282   :  { %v2421_v22 = vadd.s32 %v2419_v3, %v2413_v33  ;;  %vm2422_vm13 = vc.u32 %v2420_v52, %v2416_v34  ;;  %v2438_v16 = vshll.u32 %v2434_v39, 16  ;;  %vm2440_vm14 = vc.u32 %v2432_v19, %v2436_v28 }
 0x283   :  { %v2314_v30 = vshrl.u32 %v2296_v27, %v2312_v48  ;;  %v2317_v23 = vadd.s32 127, %v2316_v31  ;;  %v2423_v49 = vsel %vm2422_vm13, 1, %v4464_v55  ;;  %v2442_v15 = vadd.s32 %v2436_v28, %v2432_v19 }
 0x284   :  { %v2425_v1 = vadd.s32 %v2423_v49, %v2421_v22  ;;  %v2394_v46 = vsel %vm2392_vm1, %v5948_v26, 2102212464  ;;  %v2441_v4 = vsel %vm2440_vm14, 1, %v4464_v55  ;;  %v2326_v20 = vsub.s32 4, %v5952_v6 }
 0x285   :  { %v2315_v53 = vor.u32 %v2314_v30, %v2313_v10  ;;  %v2318_v18 = vshll.u32 %v2317_v23, 23  ;;  %v2443_v50 = vadd.s32 %v2441_v4, %v2435_v58  ;;  %vm2444_vm15 = vc.u32 %v2442_v15, %v2438_v16 }
 0x286   :  { %v2426_v0 = vadd.s32 %v2425_v1, %v2415_v62  ;;  %v2417_v27 = vshrl.u32 %v2412_v14, 16  ;;  %v2445_v51 = vsel %vm2444_vm15, 1, %v4464_v55  ;;  %v2512_v57 = vand.u32 2147483647, %v5999_v40 }
 0x287   :  { %v2319_v60 = vor.u32 4788187, %v2318_v18  ;;  %v2393_v7 = vsel %vm2389_vm3, %v2373_v5, %v5941_v54  ;;  %v2437_v19 = vshrl.u32 %v2433_v36, 16  ;;  %v2447_v33 = vadd.s32 %v2445_v51, %v2443_v50 }
 0x288   :  { %v2515_v26 = vand.u32 2139095040, %v5999_v40  ;;  %v2322_v37 = vcvt.s32.f32 %v2315_v53  ;;  %v2395_v52 = vsel %vm2391_vm4, %v5943_v59, %v2394_v46  ;;  %v2427_v48 = vadd.s32 %v2426_v0, %v2417_v27  ;;  %v6030_v59 = vld [vmem:[%s7025_s2 + $0x8] sm:$0xff] }
 0x289   :  { %v2320_v34 = vand.u32 2147483647, %v2319_v60  ;;  %v2439_v14 = vshrl.u32 %v2434_v39, 16  ;;  %v2448_v31 = vadd.s32 %v2447_v33, %v2437_v19  ;;  %v2519_v3 = vand.u32 8388607, %v2512_v57  ;;  %v7439_v39 = vld [vmem:[#allocation47_spill] sm:$0xff] }
 0x28a   :  { %v2516_v62 = vshrl.u32 %v2515_v26, 23  ;;  %v2327_v54 = vsel %vm2204_vm12, %v2326_v20, %v5952_v6  ;;  %v2446_v5 = vadd.s32 %v2442_v15, %v2438_v16  ;;  %v2396_v36 = vsel %vm2390_vm6, %v2393_v7, %v2395_v52  ;;  %v7441_v52 = vld [vmem:[#allocation55_spill] sm:$0xff] }
 0x28b   :  { %v2323_v22 = vmul.f32 %v2322_v37, %v2320_v34  ;;  %v2449_v58 = vadd.s32 %v2448_v31, %v2439_v14  ;;  %v1086_v10 = vadd.f32 %v5173_v13, %v7439_v39  ;;  %v7440_v30 = vand.u32 2147483647, %v5739_v41  ;;  %v6074_v39 = vpop.f32.mrf.mxu3 }
 0x28c   :  { %v4273_v28 = vadd.s32 4294967169, %v2516_v62  ;;  %vm2452_vm1 = vc.u32 %v2427_v48, %v2446_v5  ;;  %v2520_v1 = vor.u32 8388608, %v2519_v3  ;;  %v2450_v15 = vmul.u32 %v5958_v63, %v2396_v36 }
 0x28d   :  { %vm2203_vm0 = vcmp.le.f32.partialorder %v7440_v30, 0.7853982  ;;  %v2324_v23 = vxor.u32 2147483648, %v2323_v22  ;;  %v2453_v49 = vadd.s32 1, %v2449_v58  ;;  %v1371_v53 = vadd.f32 %v5965_v47, %v1086_v10 }
 0x28e   :  { %v2329_v6 = vsel %vm2203_vm0, 0, %v2327_v54  ;;  %v2522_v56 = vadd.s32 1, %v4273_v28  ;;  %v1390_v18 = vperm.slane %v6030_v59, 0  ;;  %v6042_v27 = vshll.u32 %v2520_v1, 8 }
 0x28f   :  { %v2325_v16 = vsel %vm2204_vm12, %v2324_v23, %v2323_v22  ;;  %v2454_v46 = vsel %vm2452_vm1, %v2453_v49, %v2449_v58  ;;  %v2346_v20 = vadd.s32 3, %v2329_v6  ;;  %v6054_v14 = vadd.f32 %v5197_v29, %v7441_v52 }
 0x290   :  { %v2328_v13 = vsel %vm2203_vm0, %v5739_v41, %v2325_v16  ;;  %vm2523_vm2 = vcmp.gt.s32.totalorder %v2522_v56, 0  ;;  %v2455_v0 = vadd.s32 %v2454_v46, %v2450_v15  ;;  %v6044_v33 = vadd.f32 %v1390_v18, %v1371_v53 }
 0x291   :  { %v2330_v4 = vmul.f32 %v2328_v13, %v2328_v13  ;;  %v2524_v50 = vsel %vm2523_vm2, %v2522_v56, 0  ;;  %v6048_v34 = vand.u32 3, %v2346_v20  ;;  %v6056_v31 = vadd.s32 %v2446_v5, %v2427_v48 }
 0x292   :  { %v2526_v60 = vand.u32 31, %v2524_v50  ;;  %v2456_v19 = vadd.s32 536870912, %v2455_v0  ;;  %v6059_v62 = vand.u32 65535, %v6042_v27  ;;  %v6062_v3 = vshrl.u32 %v6042_v27, 16 }
 0x293   :  { %v2331_v51 = vmul.f32 -0.001358992, %v2330_v4  ;;  %v2338_v7 = vmul.f32 -0.00019511016, %v2330_v4  ;;  %v2667_v58 = vand.u32 2147483647, %v6044_v33  ;;  %vm2345_vm8 = vweird.f32 %v5739_v41 }
 0x294   :  { %v6046_v63 = vsub.s32 32, %v2526_v60  ;;  %v6050_v37 = vshrl.u32 %v2456_v19, 30  ;;  %v6066_v28 = vshrl.u32 %v2524_v50, 5  ;;  %vm2352_vm3 = vcmp.eq.s32.totalorder %v6048_v34, 2 }
 0x295   :  { %v2332_v47 = vadd.f32 0.041655596, %v2331_v51  ;;  %v2339_v26 = vadd.f32 0.008332121, %v2338_v7  ;;  %v2529_v6 = vshll.u32 %v4458_v38, %v2526_v60  ;;  %vm2349_vm4 = vcmp.eq.s32.totalorder %v6048_v34, 0 }
 0x296   :  { %v2458_v36 = vshll.u32 %v6050_v37, 30  ;;  %v2530_v29 = vshrl.u32 %v7420_v35, %v6046_v63  ;;  %v2533_v48 = vshrl.u32 %v7421_v42, %v6046_v63  ;;  %v2539_v5 = vshrl.u32 %v7426_v21, %v6046_v63 }
 0x297   :  { %v2333_v22 = vmul.f32 %v2332_v47, %v2330_v4  ;;  %v2340_v54 = vmul.f32 %v2339_v26, %v2330_v4  ;;  %v2532_v49 = vshll.u32 %v7420_v35, %v2526_v60  ;;  %v2536_v1 = vshrl.u32 %v7438_v32, %v6046_v63 }
 0x298   :  { %v6077_v23 = vsub.s32 %v2455_v0, %v2458_v36  ;;  %v2538_v56 = vshll.u32 %v7438_v32, %v2526_v60  ;;  %v2542_v16 = vshrl.u32 %v7427_v43, %v6046_v63  ;;  %vm2348_vm5 = vcmp.lt.s32.totalorder %v6048_v34, 2 }
 0x299   :  { %v2334_v10 = vadd.f32 -0.4999988, %v2333_v22  ;;  %v2341_v30 = vadd.f32 -0.16666654, %v2340_v54  ;;  %vm2359_vm6 = vcmp.lt.s32.totalorder %v5794_v2, 0  ;;  %v2531_v46 = vor.u32 %v2530_v29, %v2529_v6 }
 0x29a   :  { %vm2460_vm7 = vcmp.lt.s32.totalorder %v6077_v23, 0  ;;  %v2461_v18 = vsub.s32 0, %v6077_v23  ;;  %v6092_v20 = vor.u32 %v2533_v48, %v2532_v49  ;;  %v2535_v0 = vshll.u32 %v7421_v42, %v2526_v60 }
 0x29b   :  { %v2335_v15 = vmul.f32 %v2334_v10, %v2330_v4  ;;  %v2342_v53 = vmul.f32 %v2341_v30, %v2330_v4  ;;  %v2540_v50 = vor.u32 %v2539_v5, %v2538_v56  ;;  %v2541_v19 = vshll.u32 %v7426_v21, %v2526_v60 }
 0x29c   :  { %v2462_v4 = vsel %vm2460_vm7, %v2461_v18, %v6077_v23  ;;  %v2537_v26 = vor.u32 %v2536_v1, %v2535_v0  ;;  %v2670_v52 = vand.u32 2139095040, %v6044_v33  ;;  %v6100_v22 = vand.u32 8388607, %v2667_v58 }
 0x29d   :  { %v2336_v51 = vadd.f32 1.0, %v2335_v15  ;;  %v2343_v7 = vadd.f32 1.0, %v2342_v53  ;;  %v2463_v47 = vclz %v2462_v4  ;;  %v7442_v29 = vand.u32 2147483647, %v5794_v2 }
 0x29e   :  { %v2543_v5 = vor.u32 %v2542_v16, %v2541_v19  ;;  %vm2544_vm10 = vcmp.lt.s32.totalorder %v6066_v28, 1  ;;  %v2481_v10 = vsub.s32 4, %v6050_v37  ;;  %vm2547_vm11 = vcmp.lt.s32.totalorder %v6066_v28, 4 }
 0x29f   :  { %v2344_v54 = vmul.f32 %v2343_v7, %v2328_v13  ;;  %v2353_v36 = vxor.u32 2147483648, %v2336_v51  ;;  %vm6104_vm9 = vcmp.le.f32.partialorder %v7442_v29, 0.7853982  ;;  %v4271_v60 = vadd.s32 4294967294, %v2463_v47  ;;  %v1296_v13 = vpop.f32.mrf.mxu3 }
 0x2a0   :  { %v2552_v30 = vsel %vm2544_vm10, %v2531_v46, %v6092_v20  ;;  %vm2545_vm12 = vcmp.lt.s32.totalorder %v6066_v28, 2  ;;  %vm2546_vm13 = vcmp.lt.s32.totalorder %v6066_v28, 3  ;;  %v2553_v49 = vsel %vm2547_vm11, %v2540_v50, 920167782 }
 0x2a1   :  { %v2350_v6 = vxor.u32 2147483648, %v2344_v54  ;;  %v2354_v1 = vsel %vm2352_vm3, %v2353_v36, %v2344_v54  ;;  %vm4272_vm14 = vcmp.lt.s32.totalorder %v4271_v60, 0  ;;  %v2554_v56 = vsel %vm2546_vm13, %v2537_v26, %v2553_v49 }
 0x2a2   :  { %v2556_v16 = vsel %vm2544_vm10, %v6092_v20, %v2537_v26  ;;  %v2466_v53 = vsel %vm4272_vm14, 0, %v4271_v60  ;;  %v2555_v18 = vsel %vm2545_vm12, %v2552_v30, %v2554_v56  ;;  %v2557_v0 = vsel %vm2547_vm11, %v2543_v5, 1326507024 }
 0x2a3   :  { %v2351_v15 = vsel %vm2349_vm4, %v2336_v51, %v2350_v6  ;;  %v2467_v4 = vsub.s32 32, %v2466_v53  ;;  %v2471_v19 = vsub.s32 4294967266, %v2466_v53  ;;  %v6136_v47 = vsel %vm2359_vm6, %v2481_v10, %v6050_v37 }
 0x2a4   :  { %v2355_v7 = vsel %vm2348_vm5, %v2351_v15, %v2354_v1  ;;  %v2558_v54 = vsel %vm2546_vm13, %v2540_v50, %v2557_v0  ;;  %v2585_v36 = vand.u32 65535, %v2555_v18  ;;  %v2586_v29 = vshrl.u32 %v2555_v18, 16 }
 0x2a5   :  { %v2356_v51 = vsel %vm2345_vm8, nan, %v2355_v7  ;;  %v2468_v34 = vshll.u32 %v6077_v23, %v2466_v53  ;;  %v2469_v5 = vshrl.u32 %v6056_v31, %v2467_v4  ;;  %v2472_v60 = vadd.s32 127, %v2471_v19 }
 0x2a6   :  { %3757 = vst [vmem:[%s7026_s3 + $0x28] sm:$0xff] %v2356_v51  ;;  %v2559_v37 = vsel %vm2545_vm12, %v2556_v16, %v2558_v54  ;;  %v2528_v41 = vshrl.u32 %v4458_v38, %v6046_v63  ;;  %v2588_v50 = vmul.u32 %v2586_v29, %v6059_v62  ;;  %v2484_v49 = vsel %vm6104_vm9, 0, %v6136_v47 }
 0x2a7   :  { %v2563_v10 = vand.u32 65535, %v2559_v37  ;;  %v2564_v30 = vshrl.u32 %v2559_v37, 16  ;;  %v2470_v13 = vor.u32 %v2469_v5, %v2468_v34  ;;  %v2473_v6 = vshll.u32 %v2472_v60, 23 }
 0x2a8   :  { %v2589_v23 = vmul.u32 %v2585_v36, %v6062_v3  ;;  %v2548_v31 = vsel %vm2544_vm10, %v2528_v41, %v2531_v46  ;;  %v2549_v1 = vsel %vm2547_vm11, %v2537_v26, 2102212464  ;;  %v2587_v15 = vmul.u32 %v2585_v36, %v6059_v62 }
 0x2a9   :  { %v2566_v63 = vmul.u32 %v2564_v30, %v6059_v62  ;;  %v2567_v56 = vmul.u32 %v2563_v10, %v6062_v3  ;;  %v2474_v16 = vor.u32 4788187, %v2473_v6  ;;  %v2590_v53 = vmul.u32 %v2586_v29, %v6062_v3 }
 0x2aa   :  { %v2591_v18 = vshll.u32 %v2588_v50, 16  ;;  %v2477_v0 = vcvt.s32.f32 %v2470_v13  ;;  %v2565_v7 = vmul.u32 %v2563_v10, %v6059_v62  ;;  %v2568_v4 = vmul.u32 %v2564_v30, %v6062_v3 }
 0x2ab   :  { %v2569_v19 = vshll.u32 %v2566_v63, 16  ;;  %v2475_v46 = vand.u32 2147483647, %v2474_v16  ;;  %v2571_v47 = vshll.u32 %v2567_v56, 16  ;;  %v2593_v51 = vshll.u32 %v2589_v23, 16 }
 0x2ac   :  { %vm2595_vm15 = vc.u32 %v2587_v15, %v2591_v18  ;;  %v2597_v34 = vadd.s32 %v2591_v18, %v2587_v15  ;;  %v2671_v60 = vshrl.u32 %v2670_v52, 23  ;;  %v2550_v62 = vsel %vm2546_vm13, %v6092_v20, %v2549_v1 }
 0x2ad   :  { %vm2573_vm0 = vc.u32 %v2565_v7, %v2569_v19  ;;  %v2575_v26 = vadd.s32 %v2569_v19, %v2565_v7  ;;  %v2596_v54 = vsel %vm2595_vm15, 1, %v4464_v55  ;;  %v2478_v5 = vmul.f32 %v2477_v0, %v2475_v46 }
 0x2ae   :  { %v2574_v36 = vsel %vm2573_vm0, 1, %v4464_v55  ;;  %v2598_v29 = vadd.s32 %v2596_v54, %v2590_v53  ;;  %vm2599_vm2 = vc.u32 %v2597_v34, %v2593_v51  ;;  %v4276_v30 = vadd.s32 4294967169, %v2671_v60 }
 0x2af   :  { %v2576_v3 = vadd.s32 %v2574_v36, %v2568_v4  ;;  %vm2577_vm1 = vc.u32 %v2575_v26, %v2571_v47  ;;  %v2479_v37 = vxor.u32 2147483648, %v2478_v5  ;;  %v2600_v10 = vsel %vm2599_vm2, 1, %v4464_v55 }
 0x2b0   :  { %v2578_v41 = vsel %vm2577_vm1, 1, %v4464_v55  ;;  %v2570_v13 = vshrl.u32 %v2566_v63, 16  ;;  %v2592_v16 = vshrl.u32 %v2588_v50, 16  ;;  %v2602_v15 = vadd.s32 %v2600_v10, %v2598_v29 }
 0x2b1   :  { %v2580_v6 = vadd.s32 %v2578_v41, %v2576_v3  ;;  %v2480_v52 = vsel %vm2359_vm6, %v2479_v37, %v2478_v5  ;;  %v2572_v53 = vshrl.u32 %v2567_v56, 16  ;;  %v2677_v18 = vadd.s32 1, %v4276_v30 }
 0x2b2   :  { %v6179_v20 = vadd.f32 %v6074_v39, %v6054_v14  ;;  %v2483_v1 = vsel %vm6104_vm9, %v5794_v2, %v2480_v52  ;;  %v2594_v7 = vshrl.u32 %v2589_v23, 16  ;;  %v2603_v4 = vadd.s32 %v2602_v15, %v2592_v16 }
 0x2b3   :  { %v2581_v0 = vadd.s32 %v2580_v6, %v2570_v13  ;;  %v2485_v63 = vmul.f32 %v2483_v1, %v2483_v1  ;;  %v2501_v19 = vadd.s32 3, %v2484_v49  ;;  %v2551_v50 = vsel %vm2545_vm12, %v2548_v31, %v2550_v62 }
 0x2b4   :  { %vm2678_vm3 = vcmp.gt.s32.totalorder %v2677_v18, 0  ;;  %v6188_v56 = vadd.s32 %v2597_v34, %v2593_v51  ;;  %v2604_v47 = vadd.s32 %v2603_v4, %v2594_v7  ;;  %v2605_v49 = vmul.u32 %v6042_v27, %v2551_v50 }
 0x2b5   :  { %v6186_v46 = vadd.s32 %v2581_v0, %v2572_v53  ;;  %v2679_v14 = vsel %vm2678_vm3, %v2677_v18, 0  ;;  %v2486_v39 = vmul.f32 -0.001358992, %v2485_v63  ;;  %v2493_v26 = vmul.f32 -0.00019511016, %v2485_v63 }
 0x2b6   :  { %v2681_v54 = vand.u32 31, %v2679_v14  ;;  %v2608_v48 = vadd.s32 1, %v2604_v47  ;;  %v2502_v31 = vand.u32 3, %v2501_v19  ;;  %v2675_v60 = vor.u32 8388608, %v6100_v22 }
 0x2b7   :  { %vm2607_vm4 = vc.u32 %v6186_v46, %v6188_v56  ;;  %v2487_v23 = vadd.f32 0.041655596, %v2486_v39  ;;  %v2494_v5 = vadd.f32 0.008332121, %v2493_v26  ;;  %v6196_v62 = vshrl.u32 %v2679_v14, 5 }
 0x2b8   :  { %v6193_v28 = vsub.s32 32, %v2681_v54  ;;  %v2609_v36 = vsel %vm2607_vm4, %v2608_v48, %v2604_v47  ;;  %vm2504_vm5 = vcmp.eq.s32.totalorder %v2502_v31, 0  ;;  %v2684_v22 = vshll.u32 %v4458_v38, %v2681_v54 }
 0x2b9   :  { %v2488_v29 = vmul.f32 %v2487_v23, %v2485_v63  ;;  %v2495_v51 = vmul.f32 %v2494_v5, %v2485_v63  ;;  %v2610_v34 = vadd.s32 %v2609_v36, %v2605_v49  ;;  %v2687_v6 = vshll.u32 %v7420_v35, %v2681_v54 }
 0x2ba   :  { %v2685_v3 = vshrl.u32 %v7420_v35, %v6193_v28  ;;  %v2688_v37 = vshrl.u32 %v7421_v42, %v6193_v28  ;;  %v2694_v27 = vshrl.u32 %v7426_v21, %v6193_v28  ;;  %v2691_v13 = vshrl.u32 %v7438_v32, %v6193_v28 }
 0x2bb   :  { %v2489_v41 = vadd.f32 -0.4999988, %v2488_v29  ;;  %v2496_v10 = vadd.f32 -0.16666654, %v2495_v51  ;;  %v2611_v30 = vadd.s32 536870912, %v2610_v34  ;;  %v2690_v16 = vshll.u32 %v7421_v42, %v2681_v54 }
 0x2bc   :  { %v2693_v15 = vshll.u32 %v7438_v32, %v2681_v54  ;;  %vm2503_vm6 = vcmp.lt.s32.totalorder %v2502_v31, 2  ;;  %v2697_v0 = vshrl.u32 %v7427_v43, %v6193_v28  ;;  %vm2500_vm7 = vweird.f32 %v5794_v2 }
 0x2bd   :  { %v2490_v52 = vmul.f32 %v2489_v41, %v2485_v63  ;;  %v2497_v53 = vmul.f32 %v2496_v10, %v2485_v63  ;;  %v6210_v18 = vshrl.u32 %v2611_v30, 30  ;;  %v6215_v7 = vor.u32 %v2685_v3, %v2684_v22 }
 0x2be   :  { %v6217_v4 = vor.u32 %v2688_v37, %v2687_v6  ;;  %v2695_v19 = vor.u32 %v2694_v27, %v2693_v15  ;;  %v2696_v50 = vshll.u32 %v7426_v21, %v2681_v54  ;;  %v2692_v63 = vor.u32 %v2691_v13, %v2690_v16 }
 0x2bf   :  { %v2491_v47 = vadd.f32 1.0, %v2490_v52  ;;  %v2498_v14 = vadd.f32 1.0, %v2497_v53  ;;  %v2613_v39 = vshll.u32 %v6210_v18, 30  ;;  %vm2507_vm8 = vcmp.eq.s32.totalorder %v2502_v31, 2 }
 0x2c0   :  { %v2698_v26 = vor.u32 %v2697_v0, %v2696_v50  ;;  %vm2699_vm9 = vcmp.lt.s32.totalorder %v6196_v62, 1  ;;  %v1391_v48 = vperm.slane %v6030_v59, 1  ;;  %vm2702_vm10 = vcmp.lt.s32.totalorder %v6196_v62, 4 }
 0x2c1   :  { %v2499_v23 = vmul.f32 %v2498_v14, %v2483_v1  ;;  %v2508_v5 = vxor.u32 2147483648, %v2491_v47  ;;  %v2614_v49 = vsub.s32 %v2610_v34, %v2613_v39  ;;  %vm2701_vm11 = vcmp.lt.s32.totalorder %v6196_v62, 3 }
 0x2c2   :  { %v2707_v54 = vsel %vm2699_vm9, %v6215_v7, %v6217_v4  ;;  %v2708_v36 = vsel %vm2702_vm10, %v2695_v19, 920167782  ;;  %v6231_v29 = vshll.u32 %v2675_v60, 8  ;;  %v2711_v1 = vsel %vm2699_vm9, %v6217_v4, %v2692_v63 }
 0x2c3   :  { %v2505_v51 = vxor.u32 2147483648, %v2499_v23  ;;  %vm2615_vm12 = vcmp.lt.s32.totalorder %v2614_v49, 0  ;;  %v2616_v3 = vsub.s32 0, %v2614_v49  ;;  %v2509_v34 = vsel %vm2507_vm8, %v2508_v5, %v2499_v23 }
 0x2c4   :  { %vm2700_vm13 = vcmp.lt.s32.totalorder %v6196_v62, 2  ;;  %v2709_v37 = vsel %vm2701_vm11, %v2692_v63, %v2708_v36  ;;  %v2712_v27 = vsel %vm2702_vm10, %v2698_v26, 1326507024  ;;  %v2716_v16 = vand.u32 65535, %v6231_v29 }
 0x2c5   :  { %v2506_v60 = vsel %vm2504_vm5, %v2491_v47, %v2505_v51  ;;  %v2617_v41 = vsel %vm2615_vm12, %v2616_v3, %v2614_v49  ;;  %v2710_v10 = vsel %vm2700_vm13, %v2707_v54, %v2709_v37  ;;  %v2713_v30 = vsel %vm2701_vm11, %v2695_v19, %v2712_v27 }
 0x2c6   :  { %v2510_v13 = vsel %vm2503_vm6, %v2506_v60, %v2509_v34  ;;  %v2618_v22 = vclz %v2617_v41  ;;  %v2714_v6 = vsel %vm2700_vm13, %v2711_v1, %v2713_v30  ;;  %v2717_v52 = vshrl.u32 %v6231_v29, 16 }
 0x2c7   :  { %v2511_v15 = vsel %vm2500_vm7, nan, %v2510_v13  ;;  %v2718_v53 = vand.u32 65535, %v2714_v6  ;;  %v2719_v0 = vshrl.u32 %v2714_v6, 16  ;;  %v6256_v50 = vadd.f32 %v5200_v45, %v5037_v24 }
 0x2c8   :  { %3758 = vst [vmem:[%s7026_s3 + $0x30] sm:$0xff] %v2511_v15  ;;  %v4274_v31 = vadd.s32 4294967294, %v2618_v22  ;;  %v2740_v19 = vand.u32 65535, %v2710_v10  ;;  %v6262_v47 = vadd.f32 %v1391_v48, %v6179_v20  ;;  %v2606_v2 = vadd.s32 %v6188_v56, %v6186_v46 }
 0x2c9   :  { %v2683_v14 = vshrl.u32 %v4458_v38, %v6193_v28  ;;  %v2721_v39 = vmul.u32 %v2719_v0, %v2716_v16  ;;  %v2722_v26 = vmul.u32 %v2718_v53, %v2717_v52  ;;  %vm2514_vm14 = vcmp.lt.s32.totalorder %v5999_v40, 0 }
 0x2ca   :  { %vm4275_vm15 = vcmp.lt.s32.totalorder %v4274_v31, 0  ;;  %v2636_v24 = vsub.s32 4, %v6210_v18  ;;  %v2704_v45 = vsel %vm2702_vm10, %v2692_v63, 2102212464  ;;  %v2741_v23 = vshrl.u32 %v2710_v10, 16 }
 0x2cb   :  { %v2621_v5 = vsel %vm4275_vm15, 0, %v4274_v31  ;;  %v2720_v20 = vmul.u32 %v2718_v53, %v2716_v16  ;;  %v2723_v48 = vmul.u32 %v2719_v0, %v2717_v52  ;;  %v2724_v54 = vshll.u32 %v2721_v39, 16 }
 0x2cc   :  { %v2622_v36 = vsub.s32 32, %v2621_v5  ;;  %v2626_v46 = vsub.s32 4294967266, %v2621_v5  ;;  %v2742_v56 = vmul.u32 %v2740_v19, %v2716_v16  ;;  %v2744_v51 = vmul.u32 %v2740_v19, %v2717_v52 }
 0x2cd   :  { %v2726_v28 = vshll.u32 %v2722_v26, 16  ;;  %vm2728_vm0 = vc.u32 %v2720_v20, %v2724_v54  ;;  %v2730_v3 = vadd.s32 %v2724_v54, %v2720_v20  ;;  %v2743_v1 = vmul.u32 %v2741_v23, %v2716_v16 }
 0x2ce   :  { %v2623_v34 = vshll.u32 %v2614_v49, %v2621_v5  ;;  %v2624_v37 = vshrl.u32 %v2606_v2, %v2622_v36  ;;  %v2627_v27 = vadd.s32 127, %v2626_v46  ;;  %v2729_v60 = vsel %vm2728_vm0, 1, %v4464_v55  ;;  %v1307_v2 = vpop.f32.mrf.mxu0 }
 0x2cf   :  { %v2725_v41 = vshrl.u32 %v2721_v39, 16  ;;  %v2731_v63 = vadd.s32 %v2729_v60, %v2723_v48  ;;  %vm2732_vm1 = vc.u32 %v2730_v3, %v2726_v28  ;;  %v2746_v10 = vshll.u32 %v2743_v1, 16 }
 0x2d0   :  { %v2625_v30 = vor.u32 %v2624_v37, %v2623_v34  ;;  %v2628_v13 = vshll.u32 %v2627_v27, 23  ;;  %v2733_v22 = vsel %vm2732_vm1, 1, %v4464_v55  ;;  %v2745_v6 = vmul.u32 %v2741_v23, %v2717_v52 }
 0x2d1   :  { %v2735_v15 = vadd.s32 %v2733_v22, %v2731_v63  ;;  %v2748_v53 = vshll.u32 %v2744_v51, 16  ;;  %vm2750_vm2 = vc.u32 %v2742_v56, %v2746_v10  ;;  %v2752_v0 = vadd.s32 %v2746_v10, %v2742_v56 }
 0x2d2   :  { %v2629_v31 = vor.u32 4788187, %v2628_v13  ;;  %v2703_v49 = vsel %vm2699_vm9, %v2683_v14, %v6215_v7  ;;  %v2751_v16 = vsel %vm2750_vm2, 1, %v4464_v55  ;;  %v2822_v19 = vand.u32 2147483647, %v6262_v47 }
 0x2d3   :  { %v2637_v39 = vsel %vm2514_vm14, %v2636_v24, %v6210_v18  ;;  %v2736_v5 = vadd.s32 %v2735_v15, %v2725_v41  ;;  %v2753_v52 = vadd.s32 %v2751_v16, %v2745_v6  ;;  %vm2754_vm3 = vc.u32 %v2752_v0, %v2748_v53 }
 0x2d4   :  { %v2630_v23 = vand.u32 2147483647, %v2629_v31  ;;  %v2632_v20 = vcvt.s32.f32 %v2625_v30  ;;  %v2727_v48 = vshrl.u32 %v2722_v26, 16  ;;  %v2755_v54 = vsel %vm2754_vm3, 1, %v4464_v55 }
 0x2d5   :  { %v2747_v36 = vshrl.u32 %v2743_v1, 16  ;;  %v2757_v46 = vadd.s32 %v2755_v54, %v2753_v52  ;;  %v2825_v7 = vand.u32 2139095040, %v6262_v47  ;;  %v2829_v14 = vand.u32 8388607, %v2822_v19 }
 0x2d6   :  { %v2633_v56 = vmul.f32 %v2632_v20, %v2630_v23  ;;  %v2705_v18 = vsel %vm2701_vm11, %v6217_v4, %v2704_v45  ;;  %v2737_v24 = vadd.s32 %v2736_v5, %v2727_v48  ;;  %v2749_v28 = vshrl.u32 %v2744_v51, 16 }
 0x2d7   :  { %v2758_v3 = vadd.s32 %v2757_v46, %v2747_v36  ;;  %v2826_v34 = vshrl.u32 %v2825_v7, 23  ;;  %v1373_v26 = vadd.f32 %v1307_v2, %v6256_v50  ;;  %v1392_v37 = vperm.slane %v6030_v59, 2  ;;  %v1309_v50 = vpop.f32.mrf.mxu0 }
 0x2d8   :  { %vm6293_vm4 = vcmp.le.f32.partialorder %v2512_v57, 0.7853982  ;;  %v2634_v27 = vxor.u32 2147483648, %v2633_v56  ;;  %v2756_v60 = vadd.s32 %v2752_v0, %v2748_v53  ;;  %v2706_v41 = vsel %vm2700_vm13, %v2703_v49, %v2705_v18 }
 0x2d9   :  { %v2759_v4 = vadd.s32 %v2758_v3, %v2749_v28  ;;  %v4279_v45 = vadd.s32 4294967169, %v2826_v34  ;;  %v2830_v51 = vor.u32 8388608, %v2829_v14  ;;  %v2639_v59 = vsel %vm6293_vm4, 0, %v2637_v39  ;;  %v6343_v3 = vpop.f32.mrf.mxu1 }
 0x2da   :  { %v2635_v63 = vsel %vm2514_vm14, %v2634_v27, %v2633_v56  ;;  %vm2762_vm5 = vc.u32 %v2737_v24, %v2756_v60  ;;  %v6308_v62 = vadd.f32 %v1392_v37, %v1373_v26  ;;  %v2760_v22 = vmul.u32 %v6231_v29, %v2706_v41 }
 0x2db   :  { %v6306_v57 = vsel %vm6293_vm4, %v5999_v40, %v2635_v63  ;;  %v2763_v10 = vadd.s32 1, %v2759_v4  ;;  %v2832_v30 = vadd.s32 1, %v4279_v45  ;;  %v2656_v6 = vadd.s32 3, %v2639_v59 }
 0x2dc   :  { %v2640_v13 = vmul.f32 %v6306_v57, %v6306_v57  ;;  %v6313_v53 = vshll.u32 %v2830_v51, 8  ;;  %v6317_v2 = vadd.f32 %v5203_v44, %v5035_v17  ;;  %v2980_v5 = vand.u32 2139095040, %v6308_v62 }
 0x2dd   :  { %v2764_v15 = vsel %vm2762_vm5, %v2763_v10, %v2759_v4  ;;  %vm2833_vm6 = vcmp.gt.s32.totalorder %v2832_v30, 0  ;;  %vm2669_vm7 = vcmp.lt.s32.totalorder %v6044_v33, 0  ;;  %v6321_v20 = vand.u32 3, %v2656_v6 }
 0x2de   :  { %v2641_v0 = vmul.f32 -0.001358992, %v2640_v13  ;;  %v2648_v31 = vmul.f32 -0.00019511016, %v2640_v13  ;;  %v2765_v49 = vadd.s32 %v2764_v15, %v2760_v22  ;;  %v2834_v16 = vsel %vm2833_vm6, %v2832_v30, 0 }
 0x2df   :  { %v2836_v39 = vand.u32 31, %v2834_v16  ;;  %v6323_v48 = vadd.s32 %v2756_v60, %v2737_v24  ;;  %v2977_v36 = vand.u32 2147483647, %v6308_v62  ;;  %vm6328_vm8 = vcmp.le.f32.partialorder %v2667_v58, 0.7853982 }
 0x2e0   :  { %v2642_v52 = vadd.f32 0.041655596, %v2641_v0  ;;  %v2649_v23 = vadd.f32 0.008332121, %v2648_v31  ;;  %v2766_v29 = vadd.s32 536870912, %v2765_v49  ;;  %v6333_v14 = vand.u32 65535, %v6313_v53 }
 0x2e1   :  { %v2837_v54 = vsub.s32 32, %v2836_v39  ;;  %v6335_v56 = vshrl.u32 %v2834_v16, 5  ;;  %v2839_v18 = vshll.u32 %v4458_v38, %v2836_v39  ;;  %v6339_v24 = vshrl.u32 %v6313_v53, 16 }
 0x2e2   :  { %v2643_v46 = vmul.f32 %v2642_v52, %v2640_v13  ;;  %v2650_v7 = vmul.f32 %v2649_v23, %v2640_v13  ;;  %v2767_v44 = vshrl.u32 %v2766_v29, 30  ;;  %v6341_v28 = vshrl.u32 %v2980_v5, 23 }
 0x2e3   :  { %vm2659_vm9 = vcmp.eq.s32.totalorder %v6321_v20, 0  ;;  %vm2662_vm10 = vcmp.eq.s32.totalorder %v6321_v20, 2  ;;  %v2840_v1 = vshrl.u32 %v7420_v35, %v2837_v54  ;;  %v2842_v27 = vshll.u32 %v7420_v35, %v2836_v39 }
 0x2e4   :  { %v2644_v34 = vadd.f32 -0.4999988, %v2643_v46  ;;  %v2651_v58 = vadd.f32 -0.16666654, %v2650_v7  ;;  %v2768_v26 = vshll.u32 %v2767_v44, 30  ;;  %v2791_v37 = vsub.s32 4, %v2767_v44 }
 0x2e5   :  { %v2843_v60 = vshrl.u32 %v7421_v42, %v2837_v54  ;;  %v2846_v41 = vshrl.u32 %v7438_v32, %v2837_v54  ;;  %vm2658_vm11 = vcmp.lt.s32.totalorder %v6321_v20, 2  ;;  %v2849_v63 = vshrl.u32 %v7426_v21, %v2837_v54 }
 0x2e6   :  { %v2645_v4 = vmul.f32 %v2644_v34, %v2640_v13  ;;  %v2652_v45 = vmul.f32 %v2651_v58, %v2640_v13  ;;  %v2769_v51 = vsub.s32 %v2765_v49, %v2768_v26  ;;  %vm2655_vm12 = vweird.f32 %v5999_v40  ;;  %v1322_v34 = vpop.f32.mrf.mxu1 }
 0x2e7   :  { %v2792_v59 = vsel %vm2669_vm7, %v2791_v37, %v2767_v44  ;;  %v2845_v50 = vshll.u32 %v7421_v42, %v2836_v39  ;;  %v2848_v10 = vshll.u32 %v7438_v32, %v2836_v39  ;;  %v2852_v30 = vshrl.u32 %v7427_v43, %v2837_v54 }
 0x2e8   :  { %v2646_v22 = vadd.f32 1.0, %v2645_v4  ;;  %v2653_v6 = vadd.f32 1.0, %v2652_v45  ;;  %vm2770_vm13 = vcmp.lt.s32.totalorder %v2769_v51, 0  ;;  %v2771_v13 = vsub.s32 0, %v2769_v51 }
 0x2e9   :  { %v2841_v15 = vor.u32 %v2840_v1, %v2839_v18  ;;  %v2844_v0 = vor.u32 %v2843_v60, %v2842_v27  ;;  %v2847_v31 = vor.u32 %v2846_v41, %v2845_v50  ;;  %v2851_v49 = vshll.u32 %v7426_v21, %v2836_v39 }
 0x2ea   :  { %v2654_v16 = vmul.f32 %v2653_v6, %v6306_v57  ;;  %v2663_v5 = vxor.u32 2147483648, %v2646_v22  ;;  %v2772_v52 = vsel %vm2770_vm13, %v2771_v13, %v2769_v51  ;;  %v2850_v23 = vor.u32 %v2849_v63, %v2848_v10 }
 0x2eb   :  { %v2773_v29 = vclz %v2772_v52  ;;  %v2794_v46 = vsel %vm6328_vm8, 0, %v2792_v59  ;;  %v2838_v7 = vshrl.u32 %v4458_v38, %v2837_v54  ;;  %v2853_v44 = vor.u32 %v2852_v30, %v2851_v49 }
 0x2ec   :  { %v2660_v58 = vxor.u32 2147483648, %v2654_v16  ;;  %vm2854_vm14 = vcmp.lt.s32.totalorder %v6335_v56, 1  ;;  %vm2855_vm15 = vcmp.lt.s32.totalorder %v6335_v56, 2  ;;  %vm2856_vm0 = vcmp.lt.s32.totalorder %v6335_v56, 3 }
 0x2ed   :  { %v4277_v39 = vadd.s32 4294967294, %v2773_v29  ;;  %vm2857_vm1 = vcmp.lt.s32.totalorder %v6335_v56, 4  ;;  %v2858_v57 = vsel %vm2854_vm14, %v2838_v7, %v2841_v15  ;;  %v2862_v18 = vsel %vm2854_vm14, %v2841_v15, %v2844_v0 }
 0x2ee   :  { %v2661_v26 = vsel %vm2659_vm9, %v2646_v22, %v2660_v58  ;;  %v2664_v54 = vsel %vm2662_vm10, %v2663_v5, %v2654_v16  ;;  %v2859_v37 = vsel %vm2857_vm1, %v2847_v31, 2102212464  ;;  %v2863_v1 = vsel %vm2857_vm1, %v2850_v23, 920167782 }
 0x2ef   :  { %v2665_v27 = vsel %vm2658_vm11, %v2661_v26, %v2664_v54  ;;  %vm4278_vm2 = vcmp.lt.s32.totalorder %v4277_v39, 0  ;;  %v2864_v60 = vsel %vm2856_vm0, %v2847_v31, %v2863_v1  ;;  %v2866_v41 = vsel %vm2854_vm14, %v2844_v0, %v2847_v31 }
 0x2f0   :  { %v2666_v4 = vsel %vm2655_vm12, nan, %v2665_v27  ;;  %v2776_v45 = vsel %vm4278_vm2, 0, %v4277_v39  ;;  %v2865_v63 = vsel %vm2855_vm15, %v2862_v18, %v2864_v60  ;;  %v2867_v59 = vsel %vm2857_vm1, %v2853_v44, 1326507024 }
 0x2f1   :  { %3759 = vst [vmem:[%s7026_s3 + $0x38] sm:$0xff] %v2666_v4  ;;  %v2777_v50 = vsub.s32 32, %v2776_v45  ;;  %v2781_v20 = vsub.s32 4294967266, %v2776_v45  ;;  %v2860_v10 = vsel %vm2856_vm0, %v2844_v0, %v2859_v37  ;;  %v2868_v30 = vsel %vm2856_vm0, %v2850_v23, %v2867_v59 }
 0x2f2   :  { %v2778_v22 = vshll.u32 %v2769_v51, %v2776_v45  ;;  %v2869_v40 = vsel %vm2855_vm15, %v2866_v41, %v2868_v30  ;;  %v2895_v6 = vand.u32 65535, %v2865_v63  ;;  %v2896_v13 = vshrl.u32 %v2865_v63, 16 }
 0x2f3   :  { %v2779_v15 = vshrl.u32 %v6323_v48, %v2777_v50  ;;  %v2782_v31 = vadd.s32 127, %v2781_v20  ;;  %v2873_v49 = vand.u32 65535, %v2869_v40  ;;  %v2874_v16 = vshrl.u32 %v2869_v40, 16 }
 0x2f4   :  { %v2898_v5 = vmul.u32 %v2896_v13, %v6333_v14  ;;  %v2899_v52 = vmul.u32 %v2895_v6, %v6339_v24  ;;  %v4282_v0 = vadd.s32 4294967169, %v6341_v28  ;;  %v6395_v23 = vand.u32 8388607, %v2977_v36 }
 0x2f5   :  { %v2780_v51 = vor.u32 %v2779_v15, %v2778_v22  ;;  %v2783_v29 = vshll.u32 %v2782_v31, 23  ;;  %v6397_v7 = vadd.s32 3, %v2794_v46  ;;  %v2876_v44 = vmul.u32 %v2874_v16, %v6333_v14 }
 0x2f6   :  { %v6402_v48 = vsel %vm2855_vm15, %v2858_v57, %v2860_v10  ;;  %v2877_v34 = vmul.u32 %v2873_v49, %v6339_v24  ;;  %v2897_v58 = vmul.u32 %v2895_v6, %v6333_v14  ;;  %v2901_v39 = vshll.u32 %v2898_v5, 16 }
 0x2f7   :  { %v2784_v28 = vor.u32 4788187, %v2783_v29  ;;  %v2875_v18 = vmul.u32 %v2873_v49, %v6333_v14  ;;  %v2879_v26 = vshll.u32 %v2876_v44, 16  ;;  %v2900_v54 = vmul.u32 %v2896_v13, %v6339_v24 }
 0x2f8   :  { %v2787_v37 = vcvt.s32.f32 %v2780_v51  ;;  %v2878_v46 = vmul.u32 %v2874_v16, %v6339_v24  ;;  %v2881_v1 = vshll.u32 %v2877_v34, 16  ;;  %v2903_v27 = vshll.u32 %v2899_v52, 16 }
 0x2f9   :  { %v2785_v60 = vand.u32 2147483647, %v2784_v28  ;;  %vm2883_vm3 = vc.u32 %v2875_v18, %v2879_v26  ;;  %v2885_v56 = vadd.s32 %v2879_v26, %v2875_v18  ;;  %vm2905_vm4 = vc.u32 %v2897_v58, %v2901_v39 }
 0x2fa   :  { %v2884_v57 = vsel %vm2883_vm3, 1, %v4464_v55  ;;  %v2906_v41 = vsel %vm2905_vm4, 1, %v4464_v55  ;;  %v2907_v4 = vadd.s32 %v2901_v39, %v2897_v58  ;;  %v2987_v45 = vadd.s32 1, %v4282_v0 }
 0x2fb   :  { %v2788_v63 = vmul.f32 %v2787_v37, %v2785_v60  ;;  %v2886_v14 = vadd.s32 %v2884_v57, %v2878_v46  ;;  %vm2887_vm5 = vc.u32 %v2885_v56, %v2881_v1  ;;  %v2908_v59 = vadd.s32 %v2906_v41, %v2900_v54 }
 0x2fc   :  { %v2880_v50 = vshrl.u32 %v2876_v44, 16  ;;  %v2888_v20 = vsel %vm2887_vm5, 1, %v4464_v55  ;;  %vm2909_vm6 = vc.u32 %v2907_v4, %v2903_v27  ;;  %vm2988_vm9 = vcmp.gt.s32.totalorder %v2987_v45, 0 }
 0x2fd   :  { %v2789_v24 = vxor.u32 2147483648, %v2788_v63  ;;  %v2890_v10 = vadd.s32 %v2888_v20, %v2886_v14  ;;  %v2910_v30 = vsel %vm2909_vm6, 1, %v4464_v55  ;;  %v2989_v22 = vsel %vm2988_vm9, %v2987_v45, 0 }
 0x2fe   :  { %v2902_v40 = vshrl.u32 %v2898_v5, 16  ;;  %v2912_v6 = vadd.s32 %v2910_v30, %v2908_v59  ;;  %v2915_v13 = vmul.u32 %v6313_v53, %v6402_v48  ;;  %v2991_v15 = vand.u32 31, %v2989_v22 }
 0x2ff   :  { %v2790_v31 = vsel %vm2669_vm7, %v2789_v24, %v2788_v63  ;;  %v2882_v49 = vshrl.u32 %v2877_v34, 16  ;;  %v2891_v16 = vadd.s32 %v2890_v10, %v2880_v50  ;;  %v6419_v0 = vadd.f32 %v6343_v3, %v6317_v2 }
 0x300   :  { %v2793_v51 = vsel %vm6328_vm8, %v6044_v33, %v2790_v31  ;;  %v2904_v29 = vshrl.u32 %v2899_v52, 16  ;;  %v2913_v5 = vadd.s32 %v2912_v6, %v2902_v40  ;;  %v6424_v44 = vsub.s32 32, %v2991_v15 }
 0x301   :  { %v2795_v58 = vmul.f32 %v2793_v51, %v2793_v51  ;;  %v6426_v53 = vadd.s32 %v2891_v16, %v2882_v49  ;;  %v6428_v48 = vadd.s32 %v2907_v4, %v2903_v27  ;;  %v6430_v39 = vshrl.u32 %v2989_v22, 5 }
 0x302   :  { %v2914_v34 = vadd.s32 %v2913_v5, %v2904_v29  ;;  %v2994_v28 = vshll.u32 %v4458_v38, %v2991_v15  ;;  %v2995_v2 = vshrl.u32 %v7420_v35, %v6424_v44  ;;  %v2998_v17 = vshrl.u32 %v7421_v42, %v6424_v44 }
 0x303   :  { %v2796_v3 = vmul.f32 -0.001358992, %v2795_v58  ;;  %v2803_v52 = vmul.f32 -0.00019511016, %v2795_v58  ;;  %vm2917_vm7 = vc.u32 %v6426_v53, %v6428_v48  ;;  %v2997_v18 = vshll.u32 %v7420_v35, %v2991_v15 }
 0x304   :  { %v2918_v26 = vadd.s32 1, %v2914_v34  ;;  %v6440_v54 = vor.u32 %v2995_v2, %v2994_v28  ;;  %v3000_v37 = vshll.u32 %v7421_v42, %v2991_v15  ;;  %v3001_v46 = vshrl.u32 %v7438_v32, %v6424_v44 }
 0x305   :  { %v2797_v1 = vadd.f32 0.041655596, %v2796_v3  ;;  %v2804_v27 = vadd.f32 0.008332121, %v2803_v52  ;;  %v3003_v60 = vshll.u32 %v7438_v32, %v2991_v15  ;;  %v3004_v56 = vshrl.u32 %v7426_v21, %v6424_v44 }
 0x306   :  { %v2919_v57 = vsel %vm2917_vm7, %v2918_v26, %v2914_v34  ;;  %v6448_v41 = vor.u32 %v2998_v17, %v2997_v18  ;;  %v3006_v4 = vshll.u32 %v7426_v21, %v2991_v15  ;;  %v3007_v45 = vshrl.u32 %v7427_v43, %v6424_v44  ;;  %v6482_v26 = vpop.f32.mrf.mxu2 }
 0x307   :  { %v2798_v63 = vmul.f32 %v2797_v1, %v2795_v58  ;;  %v2805_v14 = vmul.f32 %v2804_v27, %v2795_v58  ;;  %v2920_v59 = vadd.s32 %v2919_v57, %v2915_v13  ;;  %v3005_v50 = vor.u32 %v3004_v56, %v3003_v60 }
 0x308   :  { %v2985_v20 = vor.u32 8388608, %v6395_v23  ;;  %v3002_v24 = vor.u32 %v3001_v46, %v3000_v37  ;;  %v3008_v10 = vor.u32 %v3007_v45, %v3006_v4  ;;  %vm3012_vm8 = vcmp.lt.s32.totalorder %v6430_v39, 4 }
 0x309   :  { %v2799_v30 = vadd.f32 -0.4999988, %v2798_v63  ;;  %v2806_v22 = vadd.f32 -0.16666654, %v2805_v14  ;;  %v2921_v40 = vadd.s32 536870912, %v2920_v59  ;;  %v2812_v6 = vand.u32 3, %v6397_v7 }
 0x30a   :  { %vm3009_vm10 = vcmp.lt.s32.totalorder %v6430_v39, 1  ;;  %vm3011_vm11 = vcmp.lt.s32.totalorder %v6430_v39, 3  ;;  %v3018_v15 = vsel %vm3012_vm8, %v3005_v50, 920167782  ;;  %vm3010_vm12 = vcmp.lt.s32.totalorder %v6430_v39, 2 }
 0x30b   :  { %v2800_v13 = vmul.f32 %v2799_v30, %v2795_v58  ;;  %v2807_v31 = vmul.f32 %v2806_v22, %v2795_v58  ;;  %v6460_v49 = vshrl.u32 %v2921_v40, 30  ;;  %v3017_v23 = vsel %vm3009_vm10, %v6440_v54, %v6448_v41 }
 0x30c   :  { %v3019_v7 = vsel %vm3011_vm11, %v3002_v24, %v3018_v15  ;;  %v3022_v16 = vsel %vm3012_vm8, %v3008_v10, 1326507024  ;;  %v3021_v58 = vsel %vm3009_vm10, %v6448_v41, %v3002_v24  ;;  %vm2810_vm13 = vweird.f32 %v6044_v33 }
 0x30d   :  { %v2801_v29 = vadd.f32 1.0, %v2800_v13  ;;  %v2808_v5 = vadd.f32 1.0, %v2807_v31  ;;  %v2923_v34 = vshll.u32 %v6460_v49, 30  ;;  %v3020_v28 = vsel %vm3010_vm12, %v3017_v23, %v3019_v7 }
 0x30e   :  { %v3023_v2 = vsel %vm3011_vm11, %v3005_v50, %v3022_v16  ;;  %v6480_v17 = vshll.u32 %v2985_v20, 8  ;;  %vm2813_vm14 = vcmp.lt.s32.totalorder %v2812_v6, 2  ;;  %vm2814_vm15 = vcmp.eq.s32.totalorder %v2812_v6, 0  ;;  %v1335_v7 = vpop.f32.mrf.mxu2 }
 0x30f   :  { %v2809_v3 = vmul.f32 %v2808_v5, %v2793_v51  ;;  %v2818_v52 = vxor.u32 2147483648, %v2801_v29  ;;  %v2924_v18 = vsub.s32 %v2920_v59, %v2923_v34  ;;  %vm2817_vm0 = vcmp.eq.s32.totalorder %v2812_v6, 2 }
 0x310   :  { %v3024_v37 = vsel %vm3010_vm12, %v3021_v58, %v3023_v2  ;;  %v3051_v46 = vshrl.u32 %v3020_v28, 16  ;;  %v3014_v60 = vsel %vm3012_vm8, %v3002_v24, 2102212464  ;;  %v3026_v56 = vand.u32 65535, %v6480_v17 }
 0x311   :  { %v2815_v1 = vxor.u32 2147483648, %v2809_v3  ;;  %vm2925_vm1 = vcmp.lt.s32.totalorder %v2924_v18, 0  ;;  %v2926_v27 = vsub.s32 0, %v2924_v18  ;;  %v3027_v51 = vshrl.u32 %v6480_v17, 16 }
 0x312   :  { %v3028_v57 = vand.u32 65535, %v3024_v37  ;;  %v3029_v4 = vshrl.u32 %v3024_v37, 16  ;;  %v2819_v63 = vsel %vm2817_vm0, %v2818_v52, %v2809_v3  ;;  %v3050_v59 = vand.u32 65535, %v3020_v28 }
 0x313   :  { %v2816_v45 = vsel %vm2814_vm15, %v2801_v29, %v2815_v1  ;;  %v2927_v14 = vsel %vm2925_vm1, %v2926_v27, %v2924_v18  ;;  %v2993_v10 = vshrl.u32 %v4458_v38, %v6424_v44  ;;  %v6493_v30 = vmul.u32 %v3051_v46, %v3026_v56 }
 0x314   :  { %v2820_v50 = vsel %vm2813_vm14, %v2816_v45, %v2819_v63  ;;  %v2928_v20 = vclz %v2927_v14  ;;  %v1138_v24 = vadd.f32 %v5205_v11, %v5071_v8  ;;  %v3031_v40 = vmul.u32 %v3029_v4, %v3026_v56 }
 0x315   :  { %v2821_v22 = vsel %vm2810_vm13, nan, %v2820_v50  ;;  %v3032_v15 = vmul.u32 %v3028_v57, %v3027_v51  ;;  %v2916_v6 = vadd.s32 %v6428_v48, %v6426_v53  ;;  %v3013_v44 = vsel %vm3009_vm10, %v2993_v10, %v6440_v54 }
 0x316   :  { %3760 = vst [vmem:[%s7026_s3 + $0x40] sm:$0xff] %v2821_v22  ;;  %v4280_v13 = vadd.s32 4294967294, %v2928_v20  ;;  %v3015_v8 = vsel %vm3011_vm11, %v6448_v41, %v3014_v60  ;;  %v3030_v11 = vmul.u32 %v3028_v57, %v3026_v56  ;;  %v3034_v33 = vshll.u32 %v3031_v40, 16 }
 0x317   :  { %v3052_v31 = vmul.u32 %v3050_v59, %v3026_v56  ;;  %v3054_v23 = vmul.u32 %v3050_v59, %v3027_v51  ;;  %v3033_v16 = vmul.u32 %v3029_v4, %v3027_v51  ;;  %v3035_v29 = vshrl.u32 %v3031_v40, 16 }
 0x318   :  { %vm4281_vm2 = vcmp.lt.s32.totalorder %v4280_v13, 0  ;;  %v3056_v5 = vshll.u32 %v6493_v30, 16  ;;  %v3036_v48 = vshll.u32 %v3032_v15, 16  ;;  %vm3038_vm3 = vc.u32 %v3030_v11, %v3034_v33 }
 0x319   :  { %v2931_v53 = vsel %vm4281_vm2, 0, %v4280_v13  ;;  %v3040_v34 = vadd.s32 %v3034_v33, %v3030_v11  ;;  %vm2824_vm4 = vcmp.lt.s32.totalorder %v6262_v47, 0  ;;  %v3039_v41 = vsel %vm3038_vm3, 1, %v4464_v55 }
 0x31a   :  { %v2932_v54 = vsub.s32 32, %v2931_v53  ;;  %v2936_v58 = vsub.s32 4294967266, %v2931_v53  ;;  %v3055_v28 = vmul.u32 %v3051_v46, %v3027_v51  ;;  %v2933_v2 = vshll.u32 %v2924_v18, %v2931_v53  ;;  %v6518_v46 = vld [vmem:[%s7025_s2 + $0x8] sm:$0xff] }
 0x31b   :  { %v3041_v3 = vadd.s32 %v3039_v41, %v3033_v16  ;;  %vm3042_vm5 = vc.u32 %v3040_v34, %v3036_v48  ;;  %vm3060_vm6 = vc.u32 %v3052_v31, %v3056_v5  ;;  %v3058_v56 = vshll.u32 %v3054_v23, 16 }
 0x31c   :  { %v2934_v52 = vshrl.u32 %v2916_v6, %v2932_v54  ;;  %v2937_v37 = vadd.s32 127, %v2936_v58  ;;  %v3043_v1 = vsel %vm3042_vm5, 1, %v4464_v55  ;;  %v3061_v27 = vsel %vm3060_vm6, 1, %v4464_v55 }
 0x31d   :  { %v3045_v60 = vadd.s32 %v3043_v1, %v3041_v3  ;;  %v3062_v57 = vadd.s32 %v3056_v5, %v3052_v31  ;;  %v3063_v4 = vadd.s32 %v3061_v27, %v3055_v28  ;;  %v1393_v18 = vperm.slane %v6518_v46, 3 }
 0x31e   :  { %v2935_v45 = vor.u32 %v2934_v52, %v2933_v2  ;;  %v2938_v63 = vshll.u32 %v2937_v37, 23  ;;  %v1375_v51 = vadd.f32 %v6482_v26, %v1138_v24  ;;  %v2946_v14 = vsub.s32 4, %v6460_v49 }
 0x31f   :  { %v3046_v59 = vadd.s32 %v3045_v60, %v3035_v29  ;;  %vm3064_vm9 = vc.u32 %v3062_v57, %v3058_v56  ;;  %v1394_v50 = vperm.slane %v6518_v46, 4  ;;  %v3037_v10 = vshrl.u32 %v3032_v15, 16 }
 0x320   :  { %v2939_v20 = vor.u32 4788187, %v2938_v63  ;;  %v3065_v22 = vsel %vm3064_vm9, 1, %v4464_v55  ;;  %v6526_v40 = vadd.f32 %v1393_v18, %v6419_v0  ;;  %v2942_v6 = vcvt.s32.f32 %v2935_v45 }
 0x321   :  { %v3057_v13 = vshrl.u32 %v6493_v30, 16  ;;  %v3067_v11 = vadd.s32 %v3065_v22, %v3063_v4  ;;  %v6529_v33 = vadd.f32 %v1394_v50, %v1375_v51  ;;  %v3047_v24 = vadd.s32 %v3046_v59, %v3037_v10 }
 0x322   :  { %v2940_v26 = vand.u32 2147483647, %v2939_v20  ;;  %v3132_v31 = vand.u32 2147483647, %v6526_v40  ;;  %v3135_v7 = vand.u32 2139095040, %v6526_v40  ;;  %v2947_v15 = vsel %vm2824_vm4, %v2946_v14, %v6460_v49 }
 0x323   :  { %v3059_v16 = vshrl.u32 %v3054_v23, 16  ;;  %v3068_v29 = vadd.s32 %v3067_v11, %v3057_v13  ;;  %v3066_v5 = vadd.s32 %v3062_v57, %v3058_v56  ;;  %vm2823_vm7 = vcmp.le.f32.partialorder %v2822_v19, 0.7853982 }
 0x324   :  { %v2943_v0 = vmul.f32 %v2942_v6, %v2940_v26  ;;  %v3136_v53 = vshrl.u32 %v3135_v7, 23  ;;  %v3139_v30 = vand.u32 8388607, %v3132_v31  ;;  %v3016_v48 = vsel %vm3010_vm12, %v3013_v44, %v3015_v8 }
 0x325   :  { %v3069_v34 = vadd.s32 %v3068_v29, %v3059_v16  ;;  %v3290_v54 = vand.u32 2139095040, %v6529_v33  ;;  %v2949_v41 = vsel %vm2823_vm7, 0, %v2947_v15  ;;  %vm3072_vm8 = vc.u32 %v3047_v24, %v3066_v5 }
 0x326   :  { %v2944_v58 = vxor.u32 2147483648, %v2943_v0  ;;  %v4285_v49 = vadd.s32 4294967169, %v3136_v53  ;;  %v3140_v28 = vor.u32 8388608, %v3139_v30  ;;  %v3070_v3 = vmul.u32 %v6480_v17, %v3016_v48 }
 0x327   :  { %v3073_v23 = vadd.s32 1, %v3069_v34  ;;  %v2966_v37 = vadd.s32 3, %v2949_v41  ;;  %v3291_v44 = vshrl.u32 %v3290_v54, 23  ;;  %v6551_v59 = vadd.s32 %v3066_v5, %v3047_v24 }
 0x328   :  { %v2945_v2 = vsel %vm2824_vm4, %v2944_v58, %v2943_v0  ;;  %v3142_v52 = vadd.s32 1, %v4285_v49  ;;  %v6547_v60 = vshll.u32 %v3140_v28, 8  ;;  %v3287_v10 = vand.u32 2147483647, %v6529_v33 }
 0x329   :  { %v2948_v19 = vsel %vm2823_vm7, %v6262_v47, %v2945_v2  ;;  %v3074_v39 = vsel %vm3072_vm8, %v3073_v23, %v3069_v34  ;;  %v6549_v45 = vand.u32 3, %v2966_v37  ;;  %v4288_v18 = vadd.s32 4294967169, %v3291_v44 }
 0x32a   :  { %v2950_v8 = vmul.f32 %v2948_v19, %v2948_v19  ;;  %v3075_v1 = vadd.s32 %v3074_v39, %v3070_v3  ;;  %vm3143_vm10 = vcmp.gt.s32.totalorder %v3142_v52, 0  ;;  %v6554_v20 = vand.u32 65535, %v6547_v60 }
 0x32b   :  { %v3144_v27 = vsel %vm3143_vm10, %v3142_v52, 0  ;;  %vm2979_vm11 = vcmp.lt.s32.totalorder %v6308_v62, 0  ;;  %v6559_v11 = vshrl.u32 %v6547_v60, 16  ;;  %vm2972_vm12 = vcmp.eq.s32.totalorder %v6549_v45, 2 }
 0x32c   :  { %v2951_v56 = vmul.f32 -0.001358992, %v2950_v8  ;;  %v2958_v57 = vmul.f32 -0.00019511016, %v2950_v8  ;;  %v3076_v4 = vadd.s32 536870912, %v3075_v1  ;;  %v3146_v63 = vand.u32 31, %v3144_v27 }
 0x32d   :  { %v6562_v26 = vshrl.u32 %v3144_v27, 5  ;;  %v6566_v15 = vadd.s32 1, %v4288_v18  ;;  %vm2969_vm13 = vcmp.eq.s32.totalorder %v6549_v45, 0  ;;  %vm2968_vm14 = vcmp.lt.s32.totalorder %v6549_v45, 2 }
 0x32e   :  { %v2952_v17 = vadd.f32 0.041655596, %v2951_v56  ;;  %v2959_v51 = vadd.f32 0.008332121, %v2958_v57  ;;  %v3077_v14 = vshrl.u32 %v3076_v4, 30  ;;  %v3147_v50 = vsub.s32 32, %v3146_v63 }
 0x32f   :  { %v3149_v5 = vshll.u32 %v4458_v38, %v3146_v63  ;;  %v3152_v30 = vshll.u32 %v7420_v35, %v3146_v63  ;;  %v3155_v48 = vshll.u32 %v7421_v42, %v3146_v63  ;;  %vm2965_vm0 = vweird.f32 %v6262_v47 }
 0x330   :  { %v2953_v22 = vmul.f32 %v2952_v17, %v2950_v8  ;;  %v2960_v6 = vmul.f32 %v2959_v51, %v2950_v8  ;;  %v3078_v13 = vshll.u32 %v3077_v14, 30  ;;  %v3150_v24 = vshrl.u32 %v7420_v35, %v3147_v50 }
 0x331   :  { %v3153_v7 = vshrl.u32 %v7421_v42, %v3147_v50  ;;  %v3101_v53 = vsub.s32 4, %v3077_v14  ;;  %v3156_v34 = vshrl.u32 %v7438_v32, %v3147_v50  ;;  %v3158_v28 = vshll.u32 %v7438_v32, %v3146_v63 }
 0x332   :  { %v2954_v16 = vadd.f32 -0.4999988, %v2953_v22  ;;  %v2961_v29 = vadd.f32 -0.16666654, %v2960_v6  ;;  %v6568_v0 = vsub.s32 %v3075_v1, %v3078_v13  ;;  %v3151_v49 = vor.u32 %v3150_v24, %v3149_v5 }
 0x333   :  { %v3154_v23 = vor.u32 %v3153_v7, %v3152_v30  ;;  %v3159_v2 = vshrl.u32 %v7426_v21, %v3147_v50  ;;  %v3162_v39 = vshrl.u32 %v7427_v43, %v3147_v50  ;;  %vm6585_vm1 = vcmp.le.f32.partialorder %v2977_v36, 0.7853982 }
 0x334   :  { %v2955_v54 = vmul.f32 %v2954_v16, %v2950_v8  ;;  %v2962_v58 = vmul.f32 %v2961_v29, %v2950_v8  ;;  %vm3080_vm15 = vcmp.lt.s32.totalorder %v6568_v0, 0  ;;  %v3081_v41 = vsub.s32 0, %v6568_v0 }
 0x335   :  { %v3157_v1 = vor.u32 %v3156_v34, %v3155_v48  ;;  %v3160_v27 = vor.u32 %v3159_v2, %v3158_v28  ;;  %v3161_v56 = vshll.u32 %v7426_v21, %v3146_v63  ;;  %v3148_v18 = vshrl.u32 %v4458_v38, %v3147_v50 }
 0x336   :  { %v2956_v3 = vadd.f32 1.0, %v2955_v54  ;;  %v2963_v52 = vadd.f32 1.0, %v2962_v58  ;;  %v3082_v37 = vsel %vm3080_vm15, %v3081_v41, %v6568_v0  ;;  %vm3164_vm2 = vcmp.lt.s32.totalorder %v6562_v26, 1 }
 0x337   :  { %v3083_v8 = vclz %v3082_v37  ;;  %v3102_v51 = vsel %vm2979_vm11, %v3101_v53, %v3077_v14  ;;  %v3163_v22 = vor.u32 %v3162_v39, %v3161_v56  ;;  %vm3165_vm3 = vcmp.lt.s32.totalorder %v6562_v26, 2 }
 0x338   :  { %v2964_v57 = vmul.f32 %v2963_v52, %v2948_v19  ;;  %v2973_v4 = vxor.u32 2147483648, %v2956_v3  ;;  %vm3166_vm4 = vcmp.lt.s32.totalorder %v6562_v26, 3  ;;  %vm3167_vm5 = vcmp.lt.s32.totalorder %v6562_v26, 4 }
 0x339   :  { %v4283_v17 = vadd.s32 4294967294, %v3083_v8  ;;  %v3169_v19 = vsel %vm3167_vm5, %v3157_v1, 2102212464  ;;  %v3172_v63 = vsel %vm3164_vm2, %v3151_v49, %v3154_v23  ;;  %v3173_v14 = vsel %vm3167_vm5, %v3160_v27, 920167782 }
 0x33a   :  { %v2970_v36 = vxor.u32 2147483648, %v2964_v57  ;;  %v2974_v6 = vsel %vm2972_vm12, %v2973_v4, %v2964_v57  ;;  %v3168_v24 = vsel %vm3164_vm2, %v3148_v18, %v3151_v49  ;;  %v3174_v7 = vsel %vm3166_vm4, %v3157_v1, %v3173_v14 }
 0x33b   :  { %vm4284_vm6 = vcmp.lt.s32.totalorder %v4283_v17, 0  ;;  %v3170_v53 = vsel %vm3166_vm4, %v3154_v23, %v3169_v19  ;;  %v3175_v34 = vsel %vm3165_vm3, %v3172_v63, %v3174_v7  ;;  %v3176_v54 = vsel %vm3164_vm2, %v3154_v23, %v3157_v1  ;;  %v6654_v19 = vpop.f32.mrf.mxu3 }
 0x33c   :  { %v2971_v50 = vsel %vm2969_vm13, %v2956_v3, %v2970_v36  ;;  %v3086_v13 = vsel %vm4284_vm6, 0, %v4283_v17  ;;  %v3177_v41 = vsel %vm3167_vm5, %v3163_v22, 1326507024  ;;  %v3205_v47 = vand.u32 65535, %v3175_v34 }
 0x33d   :  { %v2975_v16 = vsel %vm2968_vm14, %v2971_v50, %v2974_v6  ;;  %v3087_v29 = vsub.s32 32, %v3086_v13  ;;  %v3091_v5 = vsub.s32 4294967266, %v3086_v13  ;;  %v3088_v48 = vshll.u32 %v6568_v0, %v3086_v13 }
 0x33e   :  { %v2976_v30 = vsel %vm2965_vm0, nan, %v2975_v16  ;;  %v3104_v0 = vsel %vm6585_vm1, 0, %v3102_v51  ;;  %v6632_v49 = vsel %vm3165_vm3, %v3168_v24, %v3170_v53  ;;  %v3178_v23 = vsel %vm3166_vm4, %v3160_v27, %v3177_v41 }
 0x33f   :  { %3761 = vst [vmem:[%s7026_s3 + $0x48] sm:$0xff] %v2976_v30  ;;  %v3089_v45 = vshrl.u32 %v6551_v59, %v3087_v29  ;;  %v3092_v58 = vadd.s32 127, %v3091_v5  ;;  %v3206_v28 = vshrl.u32 %v3175_v34, 16  ;;  %v3179_v59 = vsel %vm3165_vm3, %v3176_v54, %v3178_v23 }
 0x340   :  { %vm3298_vm9 = vcmp.gt.s32.totalorder %v6566_v15, 0  ;;  %v3183_v52 = vand.u32 65535, %v3179_v59  ;;  %v3184_v37 = vshrl.u32 %v3179_v59, 16  ;;  %v3209_v8 = vmul.u32 %v3205_v47, %v6559_v11 }
 0x341   :  { %v3090_v2 = vor.u32 %v3089_v45, %v3088_v48  ;;  %v3093_v3 = vshll.u32 %v3092_v58, 23  ;;  %v3208_v39 = vmul.u32 %v3206_v28, %v6554_v20  ;;  %v6641_v56 = vadd.s32 3, %v3104_v0 }
 0x342   :  { %v3225_v27 = vmul.u32 %v6547_v60, %v6632_v49  ;;  %v6647_v57 = vand.u32 8388607, %v3287_v10  ;;  %v3186_v26 = vmul.u32 %v3184_v37, %v6554_v20  ;;  %v3187_v4 = vmul.u32 %v3183_v52, %v6559_v11 }
 0x343   :  { %v3094_v1 = vor.u32 4788187, %v3093_v3  ;;  %v3207_v18 = vmul.u32 %v3205_v47, %v6554_v20  ;;  %v3299_v17 = vsel %vm3298_vm9, %v6566_v15, 0  ;;  %v3097_v22 = vcvt.s32.f32 %v3090_v2 }
 0x344   :  { %v3210_v36 = vmul.u32 %v3206_v28, %v6559_v11  ;;  %v3211_v6 = vshll.u32 %v3208_v39, 16  ;;  %v3185_v63 = vmul.u32 %v3183_v52, %v6554_v20  ;;  %v3188_v14 = vmul.u32 %v3184_v37, %v6559_v11  ;;  %v1348_v37 = vpop.f32.mrf.mxu3 }
 0x345   :  { %v3095_v51 = vand.u32 2147483647, %v3094_v1  ;;  %v3189_v50 = vshll.u32 %v3186_v26, 16  ;;  %v3213_v13 = vshll.u32 %v3209_v8, 16  ;;  %v3191_v7 = vshll.u32 %v3187_v4, 16 }
 0x346   :  { %vm3215_vm7 = vc.u32 %v3207_v18, %v3211_v6  ;;  %v3217_v16 = vadd.s32 %v3211_v6, %v3207_v18  ;;  %v3301_v5 = vand.u32 31, %v3299_v17  ;;  %v3212_v20 = vshrl.u32 %v3208_v39, 16 }
 0x347   :  { %v3098_v24 = vmul.f32 %v3097_v22, %v3095_v51  ;;  %vm3193_vm8 = vc.u32 %v3185_v63, %v3189_v50  ;;  %v3195_v29 = vadd.s32 %v3189_v50, %v3185_v63  ;;  %v3216_v15 = vsel %vm3215_vm7, 1, %v4464_v55 }
 0x348   :  { %v3194_v30 = vsel %vm3193_vm8, 1, %v4464_v55  ;;  %v3218_v48 = vadd.s32 %v3216_v15, %v3210_v36  ;;  %vm3219_vm10 = vc.u32 %v3217_v16, %v3213_v13  ;;  %v6664_v41 = vsub.s32 32, %v3301_v5 }
 0x349   :  { %v3099_v53 = vxor.u32 2147483648, %v3098_v24  ;;  %v3196_v34 = vadd.s32 %v3194_v30, %v3188_v14  ;;  %vm3197_vm12 = vc.u32 %v3195_v29, %v3191_v7  ;;  %v3220_v11 = vsel %vm3219_vm10, 1, %v4464_v55 }
 0x34a   :  { %v3198_v45 = vsel %vm3197_vm12, 1, %v4464_v55  ;;  %v3222_v58 = vadd.s32 %v3220_v11, %v3218_v48  ;;  %v3190_v0 = vshrl.u32 %v3186_v26, 16  ;;  %v6669_v28 = vshrl.u32 %v3299_v17, 5 }
 0x34b   :  { %v3100_v54 = vsel %vm2979_vm11, %v3099_v53, %v3098_v24  ;;  %v3200_v23 = vadd.s32 %v3198_v45, %v3196_v34  ;;  %v3192_v3 = vshrl.u32 %v3187_v4, 16  ;;  %v3214_v59 = vshrl.u32 %v3209_v8, 16 }
 0x34c   :  { %v3103_v47 = vsel %vm6585_vm1, %v6308_v62, %v3100_v54  ;;  %v3223_v52 = vadd.s32 %v3222_v58, %v3212_v20  ;;  %v6671_v1 = vadd.s32 %v3217_v16, %v3213_v13  ;;  %v3304_v18 = vshll.u32 %v4458_v38, %v3301_v5 }
 0x34d   :  { %v3105_v2 = vmul.f32 %v3103_v47, %v3103_v47  ;;  %v3201_v39 = vadd.s32 %v3200_v23, %v3190_v0  ;;  %v3307_v51 = vshll.u32 %v7420_v35, %v3301_v5  ;;  %v3305_v26 = vshrl.u32 %v7420_v35, %v6664_v41 }
 0x34e   :  { %v3224_v44 = vadd.s32 %v3223_v52, %v3214_v59  ;;  %v3308_v8 = vshrl.u32 %v7421_v42, %v6664_v41  ;;  %v3311_v4 = vshrl.u32 %v7438_v32, %v6664_v41  ;;  %v3313_v6 = vshll.u32 %v7438_v32, %v3301_v5 }
 0x34f   :  { %v3106_v22 = vmul.f32 -0.001358992, %v3105_v2  ;;  %v3113_v36 = vmul.f32 -0.00019511016, %v3105_v2  ;;  %v6677_v17 = vadd.s32 %v3201_v39, %v3192_v3  ;;  %v3314_v13 = vshrl.u32 %v7426_v21, %v6664_v41 }
 0x350   :  { %v3228_v50 = vadd.s32 1, %v3224_v44  ;;  %v3310_v24 = vshll.u32 %v7421_v42, %v3301_v5  ;;  %v3316_v7 = vshll.u32 %v7426_v21, %v3301_v5  ;;  %v3317_v16 = vshrl.u32 %v7427_v43, %v6664_v41 }
 0x351   :  { %v3107_v63 = vadd.f32 0.041655596, %v3106_v22  ;;  %v3114_v14 = vadd.f32 0.008332121, %v3113_v36  ;;  %vm3227_vm11 = vc.u32 %v6677_v17, %v6671_v1  ;;  %v3315_v30 = vor.u32 %v3314_v13, %v3313_v6 }
 0x352   :  { %v3229_v53 = vsel %vm3227_vm11, %v3228_v50, %v3224_v44  ;;  %v6695_v34 = vor.u32 %v3305_v26, %v3304_v18  ;;  %v6697_v20 = vor.u32 %v3308_v8, %v3307_v51  ;;  %v6699_v11 = vor.u32 %v3311_v4, %v3310_v24 }
 0x353   :  { %v3108_v29 = vmul.f32 %v3107_v63, %v3105_v2  ;;  %v3115_v15 = vmul.f32 %v3114_v14, %v3105_v2  ;;  %v3230_v48 = vadd.s32 %v3229_v53, %v3225_v27  ;;  %v3318_v5 = vor.u32 %v3317_v16, %v3316_v7 }
 0x354   :  { %v3122_v58 = vand.u32 3, %v6641_v56  ;;  %v3295_v23 = vor.u32 8388608, %v6647_v57  ;;  %vm3322_vm13 = vcmp.lt.s32.totalorder %v6669_v28, 4  ;;  %vm3319_vm14 = vcmp.lt.s32.totalorder %v6669_v28, 1 }
 0x355   :  { %v3109_v54 = vadd.f32 -0.4999988, %v3108_v29  ;;  %v3116_v45 = vadd.f32 -0.16666654, %v3115_v15  ;;  %v3231_v0 = vadd.s32 536870912, %v3230_v48  ;;  %vm3321_vm15 = vcmp.lt.s32.totalorder %v6669_v28, 3 }
 0x356   :  { %v3328_v60 = vsel %vm3322_vm13, %v3315_v30, 920167782  ;;  %v3327_v56 = vsel %vm3319_vm14, %v6695_v34, %v6697_v20  ;;  %v3331_v27 = vsel %vm3319_vm14, %v6697_v20, %v6699_v11  ;;  %v3332_v37 = vsel %vm3322_vm13, %v3318_v5, 1326507024 }
 0x357   :  { %v3110_v3 = vmul.f32 %v3109_v54, %v3105_v2  ;;  %v3117_v59 = vmul.f32 %v3116_v45, %v3105_v2  ;;  %v6707_v49 = vshrl.u32 %v3231_v0, 30  ;;  %v3329_v52 = vsel %vm3321_vm15, %v6699_v11, %v3328_v60 }
 0x358   :  { %vm3320_vm0 = vcmp.lt.s32.totalorder %v6669_v28, 2  ;;  %v3333_v18 = vsel %vm3321_vm15, %v3315_v30, %v3332_v37  ;;  %v6727_v51 = vshll.u32 %v3295_v23, 8  ;;  %vm3120_vm1 = vweird.f32 %v6308_v62 }
 0x359   :  { %v3111_v57 = vadd.f32 1.0, %v3110_v3  ;;  %v3118_v2 = vadd.f32 1.0, %v3117_v59  ;;  %v3233_v39 = vshll.u32 %v6707_v49, 30  ;;  %v3334_v44 = vsel %vm3320_vm0, %v3331_v27, %v3333_v18 }
 0x35a   :  { %vm3123_vm2 = vcmp.lt.s32.totalorder %v3122_v58, 2  ;;  %vm3124_vm3 = vcmp.eq.s32.totalorder %v3122_v58, 0  ;;  %v3330_v8 = vsel %vm3320_vm0, %v3327_v56, %v3329_v52  ;;  %vm3127_vm4 = vcmp.eq.s32.totalorder %v3122_v58, 2 }
 0x35b   :  { %v3119_v22 = vmul.f32 %v3118_v2, %v3103_v47  ;;  %v3128_v36 = vxor.u32 2147483648, %v3111_v57  ;;  %v3234_v26 = vsub.s32 %v3230_v48, %v3233_v39  ;;  %v3337_v6 = vshrl.u32 %v6727_v51, 16 }
 0x35c   :  { %v3338_v63 = vand.u32 65535, %v3334_v44  ;;  %v3336_v47 = vand.u32 65535, %v6727_v51  ;;  %v3339_v50 = vshrl.u32 %v3334_v44, 16  ;;  %v3360_v16 = vand.u32 65535, %v3330_v8 }
 0x35d   :  { %v3125_v4 = vxor.u32 2147483648, %v3119_v22  ;;  %vm3235_vm5 = vcmp.lt.s32.totalorder %v3234_v26, 0  ;;  %v3236_v14 = vsub.s32 0, %v3234_v26  ;;  %v3129_v24 = vsel %vm3127_vm4, %v3128_v36, %v3119_v22 }
 0x35e   :  { %v3342_v7 = vmul.u32 %v3338_v63, %v3337_v6  ;;  %v3341_v53 = vmul.u32 %v3339_v50, %v3336_v47  ;;  %v3361_v30 = vshrl.u32 %v3330_v8, 16  ;;  %v1151_v48 = vadd.f32 %v5212_v61, %v5074_v12 }
 0x35f   :  { %v3126_v13 = vsel %vm3124_vm3, %v3111_v57, %v3125_v4  ;;  %v3237_v15 = vsel %vm3235_vm5, %v3236_v14, %v3234_v26  ;;  %v1164_v5 = vadd.f32 %v5214_v9, %v5085_v25  ;;  %v3303_v58 = vshrl.u32 %v4458_v38, %v6664_v41 }
 0x360   :  { %v3130_v29 = vsel %vm3123_vm2, %v3126_v13, %v3129_v24  ;;  %v3238_v45 = vclz %v3237_v15  ;;  %v3340_v0 = vmul.u32 %v3338_v63, %v3336_v47  ;;  %v3344_v23 = vshll.u32 %v3341_v53, 16 }
 0x361   :  { %v3131_v54 = vsel %vm3120_vm1, nan, %v3130_v29  ;;  %v3226_v3 = vadd.s32 %v6671_v1, %v6677_v17  ;;  %v3343_v61 = vmul.u32 %v3339_v50, %v3337_v6  ;;  %v3346_v62 = vshll.u32 %v3342_v7, 16 }
 0x362   :  { %3762 = vst [vmem:[%s7026_s3 + $0x50] sm:$0xff] %v3131_v54  ;;  %v4286_v12 = vadd.s32 4294967294, %v3238_v45  ;;  %vm3348_vm6 = vc.u32 %v3340_v0, %v3344_v23  ;;  %v3350_v59 = vadd.s32 %v3344_v23, %v3340_v0  ;;  %v3363_v60 = vmul.u32 %v3361_v30, %v3336_v47  ;;  %v1359_v54 = vpop.f32.mrf.mxu0 }
 0x363   :  { %v3364_v56 = vmul.u32 %v3360_v16, %v3337_v6  ;;  %v3324_v25 = vsel %vm3322_vm13, %v6699_v11, 2102212464  ;;  %v3345_v9 = vshrl.u32 %v3341_v53, 16  ;;  %v3349_v41 = vsel %vm3348_vm6, 1, %v4464_v55 }
 0x364   :  { %vm4287_vm9 = vcmp.lt.s32.totalorder %v4286_v12, 0  ;;  %v3351_v57 = vadd.s32 %v3349_v41, %v3343_v61  ;;  %vm3352_vm7 = vc.u32 %v3350_v59, %v3346_v62  ;;  %v3366_v2 = vshll.u32 %v3363_v60, 16 }
 0x365   :  { %v3241_v27 = vsel %vm4287_vm9, 0, %v4286_v12  ;;  %v3353_v52 = vsel %vm3352_vm7, 1, %v4464_v55  ;;  %v3362_v37 = vmul.u32 %v3360_v16, %v3336_v47  ;;  %vm3134_vm8 = vcmp.lt.s32.totalorder %v6526_v40, 0 }
 0x366   :  { %v3242_v1 = vsub.s32 32, %v3241_v27  ;;  %v3246_v17 = vsub.s32 4294967266, %v3241_v27  ;;  %v3243_v39 = vshll.u32 %v3234_v26, %v3241_v27  ;;  %v3355_v18 = vadd.s32 %v3353_v52, %v3351_v57 }
 0x367   :  { %v3365_v22 = vmul.u32 %v3361_v30, %v3337_v6  ;;  %v3368_v36 = vshll.u32 %v3364_v56, 16  ;;  %vm3370_vm10 = vc.u32 %v3362_v37, %v3366_v2  ;;  %v3372_v8 = vadd.s32 %v3366_v2, %v3362_v37 }
 0x368   :  { %v3244_v44 = vshrl.u32 %v3226_v3, %v3242_v1  ;;  %v3247_v11 = vadd.s32 127, %v3246_v17  ;;  %v3323_v4 = vsel %vm3319_vm14, %v3303_v58, %v6695_v34  ;;  %v3356_v63 = vadd.s32 %v3355_v18, %v3345_v9 }
 0x369   :  { %v3371_v14 = vsel %vm3370_vm10, 1, %v4464_v55  ;;  %v1376_v50 = vadd.f32 %v6654_v19, %v1151_v48  ;;  %vm3374_vm12 = vc.u32 %v3372_v8, %v3368_v36  ;;  %v3325_v26 = vsel %vm3321_vm15, %v6697_v20, %v3324_v25 }
 0x36a   :  { %v3245_v47 = vor.u32 %v3244_v44, %v3243_v39  ;;  %v3248_v13 = vshll.u32 %v3247_v11, 23  ;;  %v3373_v24 = vadd.s32 %v3371_v14, %v3365_v22  ;;  %v3347_v6 = vshrl.u32 %v3342_v7, 16  ;;  %v1361_v17 = vpop.f32.mrf.mxu0 }
 0x36b   :  { %v3375_v16 = vsel %vm3374_vm12, 1, %v4464_v55  ;;  %v1395_v29 = vperm.slane %v6518_v46, 5  ;;  %v3256_v34 = vsub.s32 4, %v6707_v49  ;;  %v3367_v53 = vshrl.u32 %v3363_v60, 16 }
 0x36c   :  { %v3249_v15 = vor.u32 4788187, %v3248_v13  ;;  %v3377_v30 = vadd.s32 %v3375_v16, %v3373_v24  ;;  %v3357_v19 = vadd.s32 %v3356_v63, %v3347_v6  ;;  %v3369_v48 = vshrl.u32 %v3364_v56, 16 }
 0x36d   :  { %v6767_v45 = vadd.f32 %v1395_v29, %v1376_v50  ;;  %v1377_v58 = vadd.f32 %v1359_v54, %v1164_v5  ;;  %v3252_v23 = vcvt.s32.f32 %v3245_v47  ;;  %v1396_v20 = vperm.slane %v6518_v46, 6 }
 0x36e   :  { %v3250_v0 = vand.u32 2147483647, %v3249_v15  ;;  %v3378_v3 = vadd.s32 %v3377_v30, %v3367_v53  ;;  %v3326_v7 = vsel %vm3320_vm0, %v3323_v4, %v3325_v26  ;;  %v3376_v12 = vadd.s32 %v3372_v8, %v3368_v36 }
 0x36f   :  { %v3442_v61 = vand.u32 2147483647, %v6767_v45  ;;  %v3445_v62 = vand.u32 2139095040, %v6767_v45  ;;  %v3257_v60 = vsel %vm3134_vm8, %v3256_v34, %v6707_v49  ;;  %v6777_v5 = vadd.f32 %v1396_v20, %v1377_v58 }
 0x370   :  { %v3253_v59 = vmul.f32 %v3252_v23, %v3250_v0  ;;  %v3379_v56 = vadd.s32 %v3378_v3, %v3369_v48  ;;  %vm3382_vm11 = vc.u32 %v3357_v19, %v3376_v12  ;;  %vm3133_vm13 = vcmp.le.f32.partialorder %v3132_v31, 0.7853982 }
 0x371   :  { %v3446_v25 = vshrl.u32 %v3445_v62, 23  ;;  %v3449_v9 = vand.u32 8388607, %v3442_v61  ;;  %v3259_v41 = vsel %vm3133_vm13, 0, %v3257_v60  ;;  %v3380_v27 = vmul.u32 %v6727_v51, %v3326_v7 }
 0x372   :  { %v3254_v46 = vxor.u32 2147483648, %v3253_v59  ;;  %v3383_v28 = vadd.s32 1, %v3379_v56  ;;  %v3600_v2 = vand.u32 2139095040, %v6777_v5  ;;  %v3276_v18 = vadd.s32 3, %v3259_v41 }
 0x373   :  { %v4291_v57 = vadd.s32 4294967169, %v3446_v25  ;;  %v3450_v22 = vor.u32 8388608, %v3449_v9  ;;  %v3597_v14 = vand.u32 2147483647, %v6777_v5  ;;  %vm3289_vm15 = vcmp.lt.s32.totalorder %v6529_v33, 0 }
 0x374   :  { %v3255_v49 = vsel %vm3134_vm8, %v3254_v46, %v3253_v59  ;;  %v3384_v1 = vsel %vm3382_vm11, %v3383_v28, %v3379_v56  ;;  %v3601_v44 = vshrl.u32 %v3600_v2, 23  ;;  %v6789_v13 = vand.u32 3, %v3276_v18 }
 0x375   :  { %v3258_v52 = vsel %vm3133_vm13, %v6526_v40, %v3255_v49  ;;  %v3385_v37 = vadd.s32 %v3384_v1, %v3380_v27  ;;  %v3452_v31 = vadd.s32 1, %v4291_v57  ;;  %v6791_v24 = vshll.u32 %v3450_v22, 8 }
 0x376   :  { %v3260_v39 = vmul.f32 %v3258_v52, %v3258_v52  ;;  %v4294_v6 = vadd.s32 4294967169, %v3601_v44  ;;  %vm6798_vm0 = vcmp.le.f32.partialorder %v3287_v10, 0.7853982  ;;  %v3381_v30 = vadd.s32 %v3376_v12, %v3357_v19 }
 0x377   :  { %v3386_v36 = vadd.s32 536870912, %v3385_v37  ;;  %vm3453_vm14 = vcmp.gt.s32.totalorder %v3452_v31, 0  ;;  %v6806_v48 = vand.u32 8388607, %v3597_v14  ;;  %vm3282_vm1 = vcmp.eq.s32.totalorder %v6789_v13, 2 }
 0x378   :  { %v3261_v11 = vmul.f32 -0.001358992, %v3260_v39  ;;  %v3268_v51 = vmul.f32 -0.00019511016, %v3260_v39  ;;  %v3454_v8 = vsel %vm3453_vm14, %v3452_v31, 0  ;;  %v6810_v23 = vand.u32 65535, %v6791_v24 }
 0x379   :  { %v3387_v4 = vshrl.u32 %v3386_v36, 30  ;;  %v3456_v63 = vand.u32 31, %v3454_v8  ;;  %v6813_v3 = vshrl.u32 %v6791_v24, 16  ;;  %vm3279_vm2 = vcmp.eq.s32.totalorder %v6789_v13, 0 }
 0x37a   :  { %v3262_v50 = vadd.f32 0.041655596, %v3261_v11  ;;  %v3269_v47 = vadd.f32 0.008332121, %v3268_v51  ;;  %v6818_v19 = vshrl.u32 %v3454_v8, 5  ;;  %v6820_v20 = vadd.s32 1, %v4294_v6 }
 0x37b   :  { %v3388_v26 = vshll.u32 %v3387_v4, 30  ;;  %v3411_v15 = vsub.s32 4, %v3387_v4  ;;  %v6794_v34 = vsub.s32 32, %v3456_v63  ;;  %vm3278_vm4 = vcmp.lt.s32.totalorder %v6789_v13, 2 }
 0x37c   :  { %v3263_v16 = vmul.f32 %v3262_v50, %v3260_v39  ;;  %v3270_v29 = vmul.f32 %v3269_v47, %v3260_v39  ;;  %vm3275_vm5 = vweird.f32 %v6526_v40  ;;  %v3459_v56 = vshll.u32 %v4458_v38, %v3456_v63 }
 0x37d   :  { %v6802_v54 = vsub.s32 %v3385_v37, %v3388_v26  ;;  %v3412_v62 = vsel %vm3289_vm15, %v3411_v15, %v3387_v4  ;;  %v3460_v59 = vshrl.u32 %v7420_v35, %v6794_v34  ;;  %v3463_v25 = vshrl.u32 %v7421_v42, %v6794_v34 }
 0x37e   :  { %v3264_v58 = vadd.f32 -0.4999988, %v3263_v16  ;;  %v3271_v0 = vadd.f32 -0.16666654, %v3270_v29  ;;  %v3469_v46 = vshrl.u32 %v7426_v21, %v6794_v34  ;;  %v3466_v27 = vshrl.u32 %v7438_v32, %v6794_v34 }
 0x37f   :  { %vm3390_vm3 = vcmp.lt.s32.totalorder %v6802_v54, 0  ;;  %v3391_v10 = vsub.s32 0, %v6802_v54  ;;  %v3414_v57 = vsel %vm6798_vm0, 0, %v3412_v62  ;;  %v3462_v2 = vshll.u32 %v7420_v35, %v3456_v63 }
 0x380   :  { %v3265_v7 = vmul.f32 %v3264_v58, %v3260_v39  ;;  %v3272_v12 = vmul.f32 %v3271_v0, %v3260_v39  ;;  %v3465_v49 = vshll.u32 %v7421_v42, %v3456_v63  ;;  %v3468_v1 = vshll.u32 %v7438_v32, %v3456_v63 }
 0x381   :  { %v3392_v60 = vsel %vm3390_vm3, %v3391_v10, %v6802_v54  ;;  %v3461_v39 = vor.u32 %v3460_v59, %v3459_v56  ;;  %v3464_v18 = vor.u32 %v3463_v25, %v3462_v2  ;;  %v3471_v36 = vshll.u32 %v7426_v21, %v3456_v63 }
 0x382   :  { %v3266_v28 = vadd.f32 1.0, %v3265_v7  ;;  %v3273_v9 = vadd.f32 1.0, %v3272_v12  ;;  %v3393_v41 = vclz %v3392_v60  ;;  %v3470_v22 = vor.u32 %v3469_v46, %v3468_v1 }
 0x383   :  { %v3472_v44 = vshrl.u32 %v7427_v43, %v6794_v34  ;;  %v3467_v51 = vor.u32 %v3466_v27, %v3465_v49  ;;  %vm3474_vm9 = vcmp.lt.s32.totalorder %v6818_v19, 1  ;;  %vm3475_vm7 = vcmp.lt.s32.totalorder %v6818_v19, 2 }
 0x384   :  { %v3274_v17 = vmul.f32 %v3273_v9, %v3258_v52  ;;  %v3283_v37 = vxor.u32 2147483648, %v3266_v28  ;;  %v4289_v31 = vadd.s32 4294967294, %v3393_v41  ;;  %vm3477_vm8 = vcmp.lt.s32.totalorder %v6818_v19, 4 }
 0x385   :  { %v3473_v52 = vor.u32 %v3472_v44, %v3471_v36  ;;  %vm3476_vm10 = vcmp.lt.s32.totalorder %v6818_v19, 3  ;;  %v3482_v6 = vsel %vm3474_vm9, %v3461_v39, %v3464_v18  ;;  %v3483_v16 = vsel %vm3477_vm8, %v3470_v22, 920167782 }
 0x386   :  { %v3280_v11 = vxor.u32 2147483648, %v3274_v17  ;;  %vm4290_vm6 = vcmp.lt.s32.totalorder %v4289_v31, 0  ;;  %v3284_v8 = vsel %vm3282_vm1, %v3283_v37, %v3274_v17  ;;  %v3479_v10 = vsel %vm3477_vm8, %v3467_v51, 2102212464 }
 0x387   :  { %v3396_v4 = vsel %vm4290_vm6, 0, %v4289_v31  ;;  %v3484_v13 = vsel %vm3476_vm10, %v3467_v51, %v3483_v16  ;;  %v3486_v7 = vsel %vm3474_vm9, %v3464_v18, %v3467_v51  ;;  %v3487_v12 = vsel %vm3477_vm8, %v3473_v52, 1326507024 }
 0x388   :  { %v3281_v50 = vsel %vm3279_vm2, %v3266_v28, %v3280_v11  ;;  %v3397_v47 = vsub.s32 32, %v3396_v4  ;;  %v3401_v63 = vsub.s32 4294967266, %v3396_v4  ;;  %v3398_v15 = vshll.u32 %v6802_v54, %v3396_v4 }
 0x389   :  { %v3285_v26 = vsel %vm3278_vm4, %v3281_v50, %v3284_v8  ;;  %v3485_v40 = vsel %vm3475_vm7, %v3482_v6, %v3484_v13  ;;  %v3458_v54 = vshrl.u32 %v4458_v38, %v6794_v34  ;;  %v3431_v28 = vadd.s32 3, %v3414_v57 }
 0x38a   :  { %v3286_v29 = vsel %vm3275_vm5, nan, %v3285_v26  ;;  %v3399_v58 = vshrl.u32 %v3381_v30, %v3397_v47  ;;  %v3402_v0 = vadd.s32 127, %v3401_v63  ;;  %v3488_v30 = vsel %vm3476_vm10, %v3470_v22, %v3487_v12 }
 0x38b   :  { %3763 = vst [vmem:[%s7026_s3 + $0x58] sm:$0xff] %v3286_v29  ;;  %v3489_v60 = vsel %vm3475_vm7, %v3486_v7, %v3488_v30  ;;  %v3515_v56 = vand.u32 65535, %v3485_v40  ;;  %v3516_v25 = vshrl.u32 %v3485_v40, 16  ;;  %v3478_v27 = vsel %vm3474_vm9, %v3458_v54, %v3461_v39 }
 0x38c   :  { %v3400_v62 = vor.u32 %v3399_v58, %v3398_v15  ;;  %v3403_v59 = vshll.u32 %v3402_v0, 23  ;;  %v3493_v9 = vand.u32 65535, %v3489_v60  ;;  %v3494_v41 = vshrl.u32 %v3489_v60, 16 }
 0x38d   :  { %v3480_v2 = vsel %vm3476_vm10, %v3464_v18, %v3479_v10  ;;  %v3518_v49 = vmul.u32 %v3516_v25, %v6810_v23  ;;  %v3519_v1 = vmul.u32 %v3515_v56, %v6813_v3  ;;  %v3517_v57 = vmul.u32 %v3515_v56, %v6810_v23 }
 0x38e   :  { %v3404_v46 = vor.u32 4788187, %v3403_v59  ;;  %v3407_v17 = vcvt.s32.f32 %v3400_v62  ;;  %v3496_v37 = vmul.u32 %v3494_v41, %v6810_v23  ;;  %v3497_v31 = vmul.u32 %v3493_v9, %v6813_v3 }
 0x38f   :  { %v3520_v22 = vmul.u32 %v3516_v25, %v6813_v3  ;;  %v3521_v36 = vshll.u32 %v3518_v49, 16  ;;  %vm3608_vm12 = vcmp.gt.s32.totalorder %v6820_v20, 0  ;;  %v3495_v18 = vmul.u32 %v3493_v9, %v6810_v23 }
 0x390   :  { %v3405_v34 = vand.u32 2147483647, %v3404_v46  ;;  %v3498_v44 = vmul.u32 %v3494_v41, %v6813_v3  ;;  %v3499_v11 = vshll.u32 %v3496_v37, 16  ;;  %v3501_v51 = vshll.u32 %v3497_v31, 16 }
 0x391   :  { %v3523_v8 = vshll.u32 %v3519_v1, 16  ;;  %vm3525_vm11 = vc.u32 %v3517_v57, %v3521_v36  ;;  %v3527_v4 = vadd.s32 %v3521_v36, %v3517_v57  ;;  %v3522_v26 = vshrl.u32 %v3518_v49, 16 }
 0x392   :  { %v3408_v39 = vmul.f32 %v3407_v17, %v3405_v34  ;;  %vm3503_vm13 = vc.u32 %v3495_v18, %v3499_v11  ;;  %v3505_v50 = vadd.s32 %v3499_v11, %v3495_v18  ;;  %v3526_v47 = vsel %vm3525_vm11, 1, %v4464_v55 }
 0x393   :  { %v3504_v63 = vsel %vm3503_vm13, 1, %v4464_v55  ;;  %v3528_v6 = vadd.s32 %v3526_v47, %v3520_v22  ;;  %vm3529_vm14 = vc.u32 %v3527_v4, %v3523_v8  ;;  %v3609_v0 = vsel %vm3608_vm12, %v6820_v20, 0 }
 0x394   :  { %v3409_v52 = vxor.u32 2147483648, %v3408_v39  ;;  %v3506_v16 = vadd.s32 %v3504_v63, %v3498_v44  ;;  %vm3507_vm1 = vc.u32 %v3505_v50, %v3501_v51  ;;  %v3530_v3 = vsel %vm3529_vm14, 1, %v4464_v55 }
 0x395   :  { %v3508_v15 = vsel %vm3507_vm1, 1, %v4464_v55  ;;  %v3532_v58 = vadd.s32 %v3530_v3, %v3528_v6  ;;  %v3500_v13 = vshrl.u32 %v3496_v37, 16  ;;  %v3611_v12 = vand.u32 31, %v3609_v0 }
 0x396   :  { %v3410_v23 = vsel %vm3289_vm15, %v3409_v52, %v3408_v39  ;;  %v3510_v7 = vadd.s32 %v3508_v15, %v3506_v16  ;;  %v3481_v62 = vsel %vm3475_vm7, %v3478_v27, %v3480_v2  ;;  %v3502_v59 = vshrl.u32 %v3497_v31, 16 }
 0x397   :  { %v3413_v29 = vsel %vm6798_vm0, %v6529_v33, %v3410_v23  ;;  %v3524_v40 = vshrl.u32 %v3519_v1, 16  ;;  %v3533_v30 = vadd.s32 %v3532_v58, %v3522_v26  ;;  %v6901_v56 = vsub.s32 32, %v3611_v12 }
 0x398   :  { %v3415_v10 = vmul.f32 %v3413_v29, %v3413_v29  ;;  %v3511_v60 = vadd.s32 %v3510_v7, %v3500_v13  ;;  %v6903_v25 = vand.u32 3, %v3431_v28  ;;  %v3605_v20 = vor.u32 8388608, %v6806_v48 }
 0x399   :  { %v3534_v46 = vadd.s32 %v3533_v30, %v3524_v40  ;;  %v6908_v34 = vadd.s32 %v3527_v4, %v3523_v8  ;;  %v3535_v19 = vmul.u32 %v6791_v24, %v3481_v62  ;;  %v6911_v2 = vshrl.u32 %v3609_v0, 5 }
 0x39a   :  { %v3416_v54 = vmul.f32 -0.001358992, %v3415_v10  ;;  %v3423_v53 = vmul.f32 -0.00019511016, %v3415_v10  ;;  %v6906_v49 = vadd.s32 %v3511_v60, %v3502_v59  ;;  %v3614_v1 = vshll.u32 %v4458_v38, %v3611_v12 }
 0x39b   :  { %v3538_v27 = vadd.s32 1, %v3534_v46  ;;  %v3615_v48 = vshrl.u32 %v7420_v35, %v6901_v56  ;;  %v3617_v31 = vshll.u32 %v7420_v35, %v3611_v12  ;;  %v3618_v57 = vshrl.u32 %v7421_v42, %v6901_v56 }
 0x39c   :  { %v3417_v9 = vadd.f32 0.041655596, %v3416_v54  ;;  %v3424_v41 = vadd.f32 0.008332121, %v3423_v53  ;;  %vm3537_vm15 = vc.u32 %v6906_v49, %v6908_v34  ;;  %v3621_v24 = vshrl.u32 %v7438_v32, %v6901_v56 }
 0x39d   :  { %v3539_v28 = vsel %vm3537_vm15, %v3538_v27, %v3534_v46  ;;  %v3620_v18 = vshll.u32 %v7421_v42, %v3611_v12  ;;  %v3623_v44 = vshll.u32 %v7438_v32, %v3611_v12  ;;  %v3624_v11 = vshrl.u32 %v7426_v21, %v6901_v56 }
 0x39e   :  { %v3418_v17 = vmul.f32 %v3417_v9, %v3415_v10  ;;  %v3425_v37 = vmul.f32 %v3424_v41, %v3415_v10  ;;  %v3540_v39 = vadd.s32 %v3539_v28, %v3535_v19  ;;  %v3626_v51 = vshll.u32 %v7426_v21, %v3611_v12 }
 0x39f   :  { %v3627_v35 = vshrl.u32 %v7427_v43, %v6901_v56  ;;  %v6930_v50 = vor.u32 %v3615_v48, %v3614_v1  ;;  %v6932_v47 = vor.u32 %v3618_v57, %v3617_v31  ;;  %v6934_v63 = vor.u32 %v3621_v24, %v3620_v18 }
 0x3a0   :  { %v3419_v22 = vadd.f32 -0.4999988, %v3418_v17  ;;  %v3426_v36 = vadd.f32 -0.16666654, %v3425_v37  ;;  %v3541_v52 = vadd.s32 536870912, %v3540_v39  ;;  %v3625_v42 = vor.u32 %v3624_v11, %v3623_v44 }
 0x3a1   :  { %v3628_v26 = vor.u32 %v3627_v35, %v3626_v51  ;;  %vm3632_vm0 = vcmp.lt.s32.totalorder %v6911_v2, 4  ;;  %vm3433_vm2 = vcmp.lt.s32.totalorder %v6903_v25, 2  ;;  %vm3629_vm3 = vcmp.lt.s32.totalorder %v6911_v2, 1 }
 0x3a2   :  { %v3420_v8 = vmul.f32 %v3419_v22, %v3415_v10  ;;  %v3427_v4 = vmul.f32 %v3426_v36, %v3415_v10  ;;  %v6936_v23 = vshrl.u32 %v3541_v52, 30  ;;  %v3638_v21 = vsel %vm3632_vm0, %v3625_v42, 920167782 }
 0x3a3   :  { %vm3631_vm4 = vcmp.lt.s32.totalorder %v6911_v2, 3  ;;  %vm3437_vm5 = vcmp.eq.s32.totalorder %v6903_v25, 2  ;;  %v3637_v15 = vsel %vm3629_vm3, %v6930_v50, %v6932_v47  ;;  %v3642_v0 = vsel %vm3632_vm0, %v3628_v26, 1326507024 }
 0x3a4   :  { %v3421_v32 = vadd.f32 1.0, %v3420_v8  ;;  %v3428_v6 = vadd.f32 1.0, %v3427_v4  ;;  %v3543_v3 = vshll.u32 %v6936_v23, 30  ;;  %v3639_v58 = vsel %vm3631_vm4, %v6934_v63, %v3638_v21 }
 0x3a5   :  { %v3641_v13 = vsel %vm3629_vm3, %v6932_v47, %v6934_v63  ;;  %v6959_v7 = vshll.u32 %v3605_v20, 8  ;;  %vm3434_vm6 = vcmp.eq.s32.totalorder %v6903_v25, 0  ;;  %vm3630_vm9 = vcmp.lt.s32.totalorder %v6911_v2, 2 }
 0x3a6   :  { %v3429_v43 = vmul.f32 %v3428_v6, %v3413_v29  ;;  %v3438_v16 = vxor.u32 2147483648, %v3421_v32  ;;  %v3544_v10 = vsub.s32 %v3540_v39, %v3543_v3  ;;  %v3643_v62 = vsel %vm3631_vm4, %v3625_v42, %v3642_v0 }
 0x3a7   :  { %v3640_v30 = vsel %vm3630_vm9, %v3637_v15, %v3639_v58  ;;  %vm3430_vm8 = vweird.f32 %v6529_v33  ;;  %v3644_v53 = vsel %vm3630_vm9, %v3641_v13, %v3643_v62  ;;  %v3646_v20 = vand.u32 65535, %v6959_v7 }
 0x3a8   :  { %v3435_v29 = vxor.u32 2147483648, %v3429_v43  ;;  %v3439_v12 = vsel %vm3437_vm5, %v3438_v16, %v3429_v43  ;;  %vm3545_vm7 = vcmp.lt.s32.totalorder %v3544_v10, 0  ;;  %v3546_v40 = vsub.s32 0, %v3544_v10 }
 0x3a9   :  { %v3648_v9 = vand.u32 65535, %v3644_v53  ;;  %v3649_v19 = vshrl.u32 %v3644_v53, 16  ;;  %v3670_v27 = vand.u32 65535, %v3640_v30  ;;  %v3671_v1 = vshrl.u32 %v3640_v30, 16 }
 0x3aa   :  { %v3436_v59 = vsel %vm3434_vm6, %v3421_v32, %v3435_v29  ;;  %v3547_v46 = vsel %vm3545_vm7, %v3546_v40, %v3544_v10  ;;  %v3647_v33 = vshrl.u32 %v6959_v7, 16  ;;  %v3536_v37 = vadd.s32 %v6908_v34, %v6906_v49 }
 0x3ab   :  { %v3440_v54 = vsel %vm3433_vm2, %v3436_v59, %v3439_v12  ;;  %v3548_v41 = vclz %v3547_v46  ;;  %v3651_v17 = vmul.u32 %v3649_v19, %v3646_v20  ;;  %v3673_v28 = vmul.u32 %v3671_v1, %v3646_v20 }
 0x3ac   :  { %v3441_v60 = vsel %vm3430_vm8, nan, %v3440_v54  ;;  %v3652_v48 = vmul.u32 %v3648_v9, %v3647_v33  ;;  %v3650_v31 = vmul.u32 %v3648_v9, %v3646_v20  ;;  %v3672_v24 = vmul.u32 %v3670_v27, %v3646_v20 }
 0x3ad   :  { %3764 = vst [vmem:[%s7026_s3 + $0x60] sm:$0xff] %v3441_v60  ;;  %v4292_v25 = vadd.s32 4294967294, %v3548_v41  ;;  %v3654_v57 = vshll.u32 %v3651_v17, 16  ;;  %v3653_v36 = vmul.u32 %v3649_v19, %v3647_v33  ;;  %v3674_v39 = vmul.u32 %v3670_v27, %v3647_v33 }
 0x3ae   :  { %v3676_v18 = vshll.u32 %v3673_v28, 16  ;;  %v3675_v51 = vmul.u32 %v3671_v1, %v3647_v33  ;;  %v3656_v8 = vshll.u32 %v3652_v48, 16  ;;  %v3634_v15 = vsel %vm3632_vm0, %v6934_v63, 2102212464 }
 0x3af   :  { %vm4293_vm10 = vcmp.lt.s32.totalorder %v4292_v25, 0  ;;  %vm3658_vm12 = vc.u32 %v3650_v31, %v3654_v57  ;;  %v3660_v52 = vadd.s32 %v3654_v57, %v3650_v31  ;;  %v3678_v26 = vshll.u32 %v3674_v39, 16 }
 0x3b0   :  { %v3551_v22 = vsel %vm4293_vm10, 0, %v4292_v25  ;;  %v3659_v4 = vsel %vm3658_vm12, 1, %v4464_v55  ;;  %vm3680_vm11 = vc.u32 %v3672_v24, %v3676_v18  ;;  %v3682_v6 = vadd.s32 %v3676_v18, %v3672_v24 }
 0x3b1   :  { %v3552_v44 = vsub.s32 32, %v3551_v22  ;;  %v3556_v11 = vsub.s32 4294967266, %v3551_v22  ;;  %v3553_v35 = vshll.u32 %v3544_v10, %v3551_v22  ;;  %v3661_v42 = vadd.s32 %v3659_v4, %v3653_v36 }
 0x3b2   :  { %vm3662_vm13 = vc.u32 %v3660_v52, %v3656_v8  ;;  %v3681_v32 = vsel %vm3680_vm11, 1, %v4464_v55  ;;  %v3655_v58 = vshrl.u32 %v3651_v17, 16  ;;  %vm3684_vm14 = vc.u32 %v3682_v6, %v3678_v26 }
 0x3b3   :  { %v3554_v49 = vshrl.u32 %v3536_v37, %v3552_v44  ;;  %v3557_v34 = vadd.s32 127, %v3556_v11  ;;  %v3663_v16 = vsel %vm3662_vm13, 1, %v4464_v55  ;;  %v3683_v3 = vadd.s32 %v3681_v32, %v3675_v51 }
 0x3b4   :  { %v3665_v0 = vadd.s32 %v3663_v16, %v3661_v42  ;;  %v3613_v10 = vshrl.u32 %v4458_v38, %v6901_v56  ;;  %v3685_v13 = vsel %vm3684_vm14, 1, %v4464_v55  ;;  %v3657_v12 = vshrl.u32 %v3652_v48, 16 }
 0x3b5   :  { %v3555_v21 = vor.u32 %v3554_v49, %v3553_v35  ;;  %v3558_v43 = vshll.u32 %v3557_v34, 23  ;;  %v3677_v59 = vshrl.u32 %v3673_v28, 16  ;;  %v3687_v40 = vadd.s32 %v3685_v13, %v3683_v3 }
 0x3b6   :  { %v3666_v62 = vadd.s32 %v3665_v0, %v3655_v58  ;;  %v3633_v53 = vsel %vm3629_vm3, %v3613_v10, %v6930_v50  ;;  %v3635_v63 = vsel %vm3631_vm4, %v6932_v47, %v3634_v15  ;;  %v3679_v46 = vshrl.u32 %v3674_v39, 16 }
 0x3b7   :  { %v3559_v29 = vor.u32 4788187, %v3558_v43  ;;  %v3562_v54 = vcvt.s32.f32 %v3555_v21  ;;  %v3688_v20 = vadd.s32 %v3687_v40, %v3677_v59  ;;  %v3686_v56 = vadd.s32 %v3682_v6, %v3678_v26 }
 0x3b8   :  { %v3667_v60 = vadd.s32 %v3666_v62, %v3657_v12  ;;  %v3636_v55 = vsel %vm3630_vm9, %v3633_v53, %v3635_v63  ;;  %vm3444_vm15 = vcmp.lt.s32.totalorder %v6767_v45, 0  ;;  %vm6999_vm0 = vcmp.le.f32.partialorder %v3442_v61, 0.7853982 }
 0x3b9   :  { %v3560_v30 = vand.u32 2147483647, %v3559_v29  ;;  %v3689_v9 = vadd.s32 %v3688_v20, %v3679_v46  ;;  %v3690_v27 = vmul.u32 %v6959_v7, %v3636_v55  ;;  %v3566_v1 = vsub.s32 4, %v6936_v23 }
 0x3ba   :  { %vm3692_vm1 = vc.u32 %v3667_v60, %v3686_v56  ;;  %vm3585_vm3 = vweird.f32 %v6767_v45  ;;  %v3691_v58 = vadd.s32 %v3686_v56, %v3667_v60  ;;  %vm3599_vm7 = vcmp.lt.s32.totalorder %v6777_v5, 0 }
 0x3bb   :  { %v3563_v38 = vmul.f32 %v3562_v54, %v3560_v30  ;;  %v3693_v19 = vadd.s32 1, %v3689_v9  ;;  %v3567_v61 = vsel %vm3444_vm15, %v3566_v1, %v6936_v23  ;;  %vm3598_vm8 = vcmp.le.f32.partialorder %v3597_v14, 0.7853982 }
 0x3bc   :  { %v3569_v7 = vsel %vm6999_vm0, 0, %v3567_v61  ;;  %vm3740_vm13 = vweird.f32 %v6777_v5 }
 0x3bd   :  { %v3564_v41 = vxor.u32 2147483648, %v3563_v38  ;;  %v3694_v33 = vsel %vm3692_vm1, %v3693_v19, %v3689_v9  ;;  %v3586_v51 = vadd.s32 3, %v3569_v7 }
 0x3be   :  { %v3695_v17 = vadd.s32 %v3694_v33, %v3690_v27 }
 0x3bf   :  { %v3565_v47 = vsel %vm3444_vm15, %v3564_v41, %v3563_v38  ;;  %v3587_v34 = vand.u32 3, %v3586_v51 }
 0x3c0   :  { %v3568_v2 = vsel %vm6999_vm0, %v6767_v45, %v3565_v47  ;;  %v3696_v28 = vadd.s32 536870912, %v3695_v17 }
 0x3c1   :  { %v3570_v25 = vmul.f32 %v3568_v2, %v3568_v2  ;;  %vm3589_vm4 = vcmp.eq.s32.totalorder %v3587_v34, 0  ;;  %vm3592_vm5 = vcmp.eq.s32.totalorder %v3587_v34, 2  ;;  %vm3588_vm9 = vcmp.lt.s32.totalorder %v3587_v34, 2 }
 0x3c2   :  { %v3697_v24 = vshrl.u32 %v3696_v28, 30 }
 0x3c3   :  { %v3571_v37 = vmul.f32 -0.001358992, %v3570_v25  ;;  %v3578_v48 = vmul.f32 -0.00019511016, %v3570_v25 }
 0x3c4   :  { %v3698_v39 = vshll.u32 %v3697_v24, 30  ;;  %v3721_v46 = vsub.s32 4, %v3697_v24 }
 0x3c5   :  { %v3572_v31 = vadd.f32 0.041655596, %v3571_v37  ;;  %v3579_v57 = vadd.f32 0.008332121, %v3578_v48 }
 0x3c6   :  { %v3699_v11 = vsub.s32 %v3695_v17, %v3698_v39  ;;  %v3722_v9 = vsel %vm3599_vm7, %v3721_v46, %v3697_v24 }
 0x3c7   :  { %v3573_v22 = vmul.f32 %v3572_v31, %v3570_v25  ;;  %v3580_v36 = vmul.f32 %v3579_v57, %v3570_v25  ;;  %v3724_v50 = vsel %vm3598_vm8, 0, %v3722_v9 }
 0x3c8   :  { %vm3700_vm2 = vcmp.lt.s32.totalorder %v3699_v11, 0  ;;  %v3701_v4 = vsub.s32 0, %v3699_v11  ;;  %v3741_v33 = vadd.s32 3, %v3724_v50 }
 0x3c9   :  { %v3574_v18 = vadd.f32 -0.4999988, %v3573_v22  ;;  %v3581_v44 = vadd.f32 -0.16666654, %v3580_v36 }
 0x3ca   :  { %v3702_v23 = vsel %vm3700_vm2, %v3701_v4, %v3699_v11  ;;  %v3742_v48 = vand.u32 3, %v3741_v33 }
 0x3cb   :  { %v3575_v35 = vmul.f32 %v3574_v18, %v3570_v25  ;;  %v3582_v8 = vmul.f32 %v3581_v44, %v3570_v25  ;;  %v3703_v42 = vclz %v3702_v23 }
 0x3cc   :  { %vm3744_vm10 = vcmp.eq.s32.totalorder %v3742_v48, 0  ;;  %vm3747_vm12 = vcmp.eq.s32.totalorder %v3742_v48, 2  ;;  %vm3743_vm11 = vcmp.lt.s32.totalorder %v3742_v48, 2 }
 0x3cd   :  { %v3576_v52 = vadd.f32 1.0, %v3575_v35  ;;  %v3583_v49 = vadd.f32 1.0, %v3582_v8  ;;  %v4295_v6 = vadd.s32 4294967294, %v3703_v42 }
 0x3cf   :  { %v3584_v26 = vmul.f32 %v3583_v49, %v3568_v2  ;;  %v3593_v32 = vxor.u32 2147483648, %v3576_v52  ;;  %vm4296_vm6 = vcmp.lt.s32.totalorder %v4295_v6, 0 }
 0x3d0   :  { %v3706_v3 = vsel %vm4296_vm6, 0, %v4295_v6 }
 0x3d1   :  { %v3590_v21 = vxor.u32 2147483648, %v3584_v26  ;;  %v3594_v16 = vsel %vm3592_vm5, %v3593_v32, %v3584_v26  ;;  %v3707_v0 = vsub.s32 32, %v3706_v3  ;;  %v3711_v29 = vsub.s32 4294967266, %v3706_v3 }
 0x3d2   :  { %v3708_v13 = vshll.u32 %v3699_v11, %v3706_v3 }
 0x3d3   :  { %v3591_v43 = vsel %vm3589_vm4, %v3576_v52, %v3590_v21  ;;  %v3709_v12 = vshrl.u32 %v3691_v58, %v3707_v0  ;;  %v3712_v62 = vadd.s32 127, %v3711_v29 }
 0x3d4   :  { %v3595_v15 = vsel %vm3588_vm9, %v3591_v43, %v3594_v16 }
 0x3d5   :  { %v3596_v10 = vsel %vm3585_vm3, nan, %v3595_v15  ;;  %v3710_v45 = vor.u32 %v3709_v12, %v3708_v13  ;;  %v3713_v59 = vshll.u32 %v3712_v62, 23 }
 0x3d6   :  { %3765 = vst [vmem:[%s7026_s3 + $0x68] sm:$0xff] %v3596_v10 }
 0x3d7   :  { %v3714_v40 = vor.u32 4788187, %v3713_v59  ;;  %v3717_v54 = vcvt.s32.f32 %v3710_v45 }
 0x3d9   :  { %v3715_v30 = vand.u32 2147483647, %v3714_v40 }
 0x3db   :  { %v3718_v53 = vmul.f32 %v3717_v54, %v3715_v30 }
 0x3dd   :  { %v3719_v63 = vxor.u32 2147483648, %v3718_v53 }
 0x3df   :  { %v3720_v60 = vsel %vm3599_vm7, %v3719_v63, %v3718_v53 }
 0x3e0   :  { %v3723_v20 = vsel %vm3598_vm8, %v6777_v5, %v3720_v60 }
 0x3e1   :  { %v3725_v38 = vmul.f32 %v3723_v20, %v3723_v20 }
 0x3e3   :  { %v3726_v56 = vmul.f32 -0.001358992, %v3725_v38  ;;  %v3733_v55 = vmul.f32 -0.00019511016, %v3725_v38 }
 0x3e5   :  { %v3727_v41 = vadd.f32 0.041655596, %v3726_v56  ;;  %v3734_v19 = vadd.f32 0.008332121, %v3733_v55 }
 0x3e7   :  { %v3728_v47 = vmul.f32 %v3727_v41, %v3725_v38  ;;  %v3735_v27 = vmul.f32 %v3734_v19, %v3725_v38 }
 0x3e9   :  { %v3729_v1 = vadd.f32 -0.4999988, %v3728_v47  ;;  %v3736_v2 = vadd.f32 -0.16666654, %v3735_v27 }
 0x3eb   :  { %v3730_v25 = vmul.f32 %v3729_v1, %v3725_v38  ;;  %v3737_v17 = vmul.f32 %v3736_v2, %v3725_v38 }
 0x3ed   :  { %v3731_v37 = vadd.f32 1.0, %v3730_v25  ;;  %v3738_v14 = vadd.f32 1.0, %v3737_v17 }
 0x3ef   :  { %v3739_v28 = vmul.f32 %v3738_v14, %v3723_v20  ;;  %v3748_v61 = vxor.u32 2147483648, %v3731_v37 }
 0x3f1   :  { %v3745_v31 = vxor.u32 2147483648, %v3739_v28  ;;  %v3749_v24 = vsel %vm3747_vm12, %v3748_v61, %v3739_v28 }
 0x3f3   :  { %v3746_v57 = vsel %vm3744_vm10, %v3731_v37, %v3745_v31 }
 0x3f4   :  { %v3750_v7 = vsel %vm3743_vm11, %v3746_v57, %v3749_v24 }
 0x3f5   :  { %v3751_v22 = vsel %vm3740_vm13, nan, %v3750_v7 }
 0x3f6   :  { %3766 = vst [vmem:[%s7026_s3 + $0x70] sm:$0xff] %v3751_v22 }
 0x3f7   :  { %3771 = vsyncpa [#allocation3], 1 }

</bundles_post_ra>
